<compile_context>
chip_gen: v7x
topology: tpu7x:2x2x1
jax: 0.10.0
libtpu: 0.0.40
codegen_flags: <defaults>
</compile_context>

<pallas_src>
import functools

import numpy as np
import jax
import jax.numpy as jnp
from jax.experimental import pallas as pl
from jax.experimental.pallas import tpu as pltpu

BATCH = 2
NGF = 32                     # gf_dim
Z_DIM = 16                   # cfg.GAN.Z_DIM
CODE_DIM = 64                # code_dim (selects the upsample1/upsample2 path)
IN_DIM = Z_DIM + CODE_DIM    # 80  (cfg.GAN.B_CONDITION = True)
BN_EPS = 1e-5

# static geometry of the code_dim == 64 path
H0, W0 = 4, 4
C1 = NGF                     # conv1 input channels      (32)
H1, W1 = 8, 8
C1_OUT2 = NGF                # conv1 output ch before GLU (32)
C2 = NGF // 2                # conv2 input channels      (16)
H2, W2 = 16, 16
C2_OUT2 = NGF // 2           # conv2 output ch before GLU (16)
C_FINAL = NGF // 4           # final channels             (8)


# ---------------------------------------------------------------------------
# In-kernel helpers
# ---------------------------------------------------------------------------
def _stable_sigmoid(x):
    # sigmoid(x) == 0.5*(tanh(x/2)+1): EUP tanh, no overflow for large |x|.
    return 0.5 * (jnp.tanh(0.5 * x) + 1.0)


def _bn2d_glu(y, gb, w_pix, ch):
    """BatchNorm2d (batch statistics) + GLU.

    y : (R, 2*w_pix*ch) f32, lane layout [u: w*ch+c][gate: w_pix*ch + w*ch+c]
    gb: (2, 2*ch) f32 — row0 gamma, row1 beta in torch channel order
        (u channels 0..ch-1, gate channels ch..2ch-1).
    Returns (R, w_pix*ch) f32 with lanes w*ch + c (next stage's layout).
    """
    rows = y.shape[0]
    half = w_pix * ch
    count = float(rows * w_pix)

    def fold(v, off):                      # (1, 2*half) -> (1, ch)
        s = v[:, off:off + ch]
        for w in range(1, w_pix):
            s = s + v[:, off + w * ch:off + (w + 1) * ch]
        return s

    def tile(u_piece, g_piece):            # (1, ch) x2 -> (1, 2*half)
        return jnp.concatenate(
            [jnp.concatenate([u_piece] * w_pix, axis=1),
             jnp.concatenate([g_piece] * w_pix, axis=1)], axis=1)

    colsum = jnp.sum(y, axis=0, keepdims=True)
    mu_u = fold(colsum, 0) / count
    mu_g = fold(colsum, half) / count
    d = y - tile(mu_u, mu_g)
    colsq = jnp.sum(d * d, axis=0, keepdims=True)
    var_u = fold(colsq, 0) / count
    var_g = fold(colsq, half) / count
    sc_u = gb[0:1, :ch] * jax.lax.rsqrt(var_u + BN_EPS)
    sc_g = gb[0:1, ch:] * jax.lax.rsqrt(var_g + BN_EPS)
    yb = d * tile(sc_u, sc_g) + tile(gb[1:2, :ch], gb[1:2, ch:])
    return yb[:, :half] * _stable_sigmoid(yb[:, half:])


# ---------------------------------------------------------------------------
# The fused kernel
# ---------------------------------------------------------------------------
def _init_stage_g_kernel(c_ref, fcw_ref, fcgb_ref, w1_ref, gb1_ref,
                         w2_ref, gb2_ref, o_ref, p1_ref, p2_ref, *, batch):
    B = batch
    f32 = jnp.float32

    # ---- stage 1: fc = Linear -> BatchNorm1d -> GLU ----------------------
    a = c_ref[...].astype(jnp.bfloat16)                        # (B, 80)
    y = jnp.dot(a, fcw_ref[...], preferred_element_type=f32)   # (B, 1024)
    gb = fcgb_ref[...]                                         # (2, 1024)
    mu = jnp.mean(y, axis=0, keepdims=True)
    d = y - mu
    var = jnp.mean(d * d, axis=0, keepdims=True)
    yb = d * (gb[0:1, :] * jax.lax.rsqrt(var + BN_EPS)) + gb[1:2, :]
    nh = NGF * H0 * W0                                         # 512
    h1 = yb[:, :nh] * _stable_sigmoid(yb[:, nh:])              # lanes = (h*W0+w)*C1 + c

    # ---- nearest-2x upsample + SAME pad, scattered into p1 scratch -------
    # p1 rows: padded_row*B + b (padded_row 0..H1+1); lanes: padded_col*C1 + c
    p1_ref[...] = jnp.zeros(p1_ref.shape, p1_ref.dtype)
    zpad1 = jnp.zeros((B, C1), f32)
    for h in range(H0):
        pieces = [zpad1]
        for w in range(W0):
            sl = h1[:, (h * W0 + w) * C1:(h * W0 + w + 1) * C1]
            pieces += [sl, sl]                                 # x2 along W
        pieces.append(zpad1)
        row = jnp.concatenate(pieces, axis=1)                  # (B, (W1+2)*C1)
        p1_ref[(1 + 2 * h) * B:(1 + 2 * h) * B + B, :] = row   # x2 along H
        p1_ref[(2 + 2 * h) * B:(2 + 2 * h) * B + B, :] = row

    # ---- stage 2: conv3x3 as 3 banded matmuls -> BN2d -> GLU -------------
    p1 = p1_ref[...].astype(jnp.bfloat16)                      # (20, 320)
    r1 = H1 * B
    y1 = jnp.dot(p1[0:r1, :], w1_ref[0], preferred_element_type=f32)
    y1 = y1 + jnp.dot(p1[B:r1 + B, :], w1_ref[1], preferred_element_type=f32)
    y1 = y1 + jnp.dot(p1[2 * B:r1 + 2 * B, :], w1_ref[2],
                      preferred_element_type=f32)              # (16, 256)
    g1 = _bn2d_glu(y1, gb1_ref[...], W1, C1_OUT2 // 2)         # (16, 128)

    # ---- nearest-2x upsample + SAME pad -> p2 -----------------------------
    p2_ref[...] = jnp.zeros(p2_ref.shape, p2_ref.dtype)
    zpad2 = jnp.zeros((B, C2), f32)
    for h in range(H1):
        pieces = [zpad2]
        for w in range(W1):
            sl = g1[h * B:(h + 1) * B, w * C2:(w + 1) * C2]
            pieces += [sl, sl]
        pieces.append(zpad2)
        row = jnp.concatenate(pieces, axis=1)                  # (B, (W2+2)*C2)
        p2_ref[(1 + 2 * h) * B:(1 + 2 * h) * B + B, :] = row
        p2_ref[(2 + 2 * h) * B:(2 + 2 * h) * B + B, :] = row

    # ---- stage 3: conv3x3 -> BN2d -> GLU ----------------------------------
    p2 = p2_ref[...].astype(jnp.bfloat16)                      # (36, 288)
    r2 = H2 * B
    y2 = jnp.dot(p2[0:r2, :], w2_ref[0], preferred_element_type=f32)
    y2 = y2 + jnp.dot(p2[B:r2 + B, :], w2_ref[1], preferred_element_type=f32)
    y2 = y2 + jnp.dot(p2[2 * B:r2 + 2 * B, :], w2_ref[2],
                      preferred_element_type=f32)              # (32, 256)
    g2 = _bn2d_glu(y2, gb2_ref[...], W2, C2_OUT2 // 2)         # (32, 128) lane-dense

    o_ref[...] = g2.astype(o_ref.dtype)


def build_init_stage_g(batch):
    B = batch
    out_rows = H2 * B
    out_cols = W2 * (C2_OUT2 // 2)                             # 128 — lane-dense
    k1, n1 = (W1 + 2) * C1, W1 * C1_OUT2
    k2, n2 = (W2 + 2) * C2, W2 * C2_OUT2
    kernel = functools.partial(_init_stage_g_kernel, batch=B)

    flops = 2 * (B * IN_DIM * 2 * NGF * 16
                 + 3 * (H1 * B) * k1 * n1
                 + 3 * (H2 * B) * k2 * n2)
    transcendentals = B * NGF * 16 + H1 * B * W1 * 16 + H2 * B * W2 * 8
    bytes_accessed = (B * IN_DIM * 4 + IN_DIM * 2 * NGF * 16 * 2
                      + 2 * 2 * NGF * 16 * 4
                      + 3 * k1 * n1 * 2 + 2 * C1_OUT2 * 4
                      + 3 * k2 * n2 * 2 + 2 * C2_OUT2 * 4
                      + out_rows * out_cols * 4)

    return pl.pallas_call(
        kernel,
        out_shape=jax.ShapeDtypeStruct((out_rows, out_cols), jnp.float32),
        grid=(1,),
        in_specs=[
            pl.BlockSpec((B, IN_DIM), lambda i: (0, 0)),
            pl.BlockSpec((IN_DIM, 2 * NGF * 16), lambda i: (0, 0)),
            pl.BlockSpec((2, 2 * NGF * 16), lambda i: (0, 0)),
            pl.BlockSpec((3, k1, n1), lambda i: (0, 0, 0)),
            pl.BlockSpec((2, C1_OUT2), lambda i: (0, 0)),
            pl.BlockSpec((3, k2, n2), lambda i: (0, 0, 0)),
            pl.BlockSpec((2, C2_OUT2), lambda i: (0, 0)),
        ],
        out_specs=pl.BlockSpec((out_rows, out_cols), lambda i: (0, 0)),
        scratch_shapes=[
            pltpu.VMEM(((H1 + 2) * B, (W1 + 2) * C1), jnp.float32),
            pltpu.VMEM(((H2 + 2) * B, (W2 + 2) * C2), jnp.float32),
        ],
        compiler_params=pltpu.CompilerParams(
            dimension_semantics=("arbitrary",)),
        cost_estimate=pl.CostEstimate(
            flops=flops, transcendentals=transcendentals,
            bytes_accessed=bytes_accessed),
    )


def init_stage_g_forward(prep, c_code):
    B = c_code.shape[0]
    o2d = build_init_stage_g(B)(
        c_code, prep["fc_wm"], prep["fc_gb"],
        prep["w1m"], prep["gb1"], prep["w2m"], prep["gb2"])
    # kernel rows = (h, b), lanes = (w, c)  ->  NCHW like the torch module
    return o2d.reshape(H2, B, W2, C_FINAL).transpose(1, 3, 0, 2)


# ---------------------------------------------------------------------------
# Parameters: synthetic torch-layout weights + one-time kernel-layout prep
# ---------------------------------------------------------------------------
def init_params(key):
    ks = jax.random.split(key, 6)

    def w(k, shape):
        return 0.05 * jax.random.normal(k, shape, jnp.float32)

    def bn(k, n):
        k1, k2 = jax.random.split(k)
        return (1.0 + 0.1 * jax.random.normal(k1, (n,), jnp.float32),
                0.1 * jax.random.normal(k2, (n,), jnp.float32))

    p = {}
    p["fc_w"] = w(ks[0], (2 * NGF * 16, IN_DIM))       # Linear (out, in), bias=False
    p["fc_bn_g"], p["fc_bn_b"] = bn(ks[1], 2 * NGF * 16)
    p["up1_w"] = w(ks[2], (NGF, NGF, 3, 3))            # conv3x3(ngf, (ngf//2)*2)
    p["up1_bn_g"], p["up1_bn_b"] = bn(ks[3], NGF)
    p["up2_w"] = w(ks[4], (NGF // 2, NGF // 2, 3, 3))  # conv3x3(ngf//2, (ngf//4)*2)
    p["up2_bn_g"], p["up2_bn_b"] = bn(ks[5], NGF // 2)
    return p


def _conv_band_mats(w, w_out):
    # w: (C2, Cin, 3, 3) f32.  Returns (3, (w_out+2)*Cin, w_out*C2) banded
    # matrices: one per vertical tap, output columns ordered [all-u][all-gate]
    # (w-major, channel-minor) to match the kernel's lane layout.
    c2, cin, _, _ = w.shape
    ch = c2 // 2
    mats = np.zeros((3, (w_out + 2) * cin, w_out * c2), np.float32)
    for dr in range(3):
        for dw in range(3):
            blk = np.transpose(w[:, :, dr, dw])        # (Cin, C2)
            for j in range(w_out):
                rows = slice((j + dw) * cin, (j + dw + 1) * cin)
                mats[dr, rows, j * ch:(j + 1) * ch] = blk[:, :ch]
                mats[dr, rows,
                     w_out * ch + j * ch:w_out * ch + (j + 1) * ch] = blk[:, ch:]
    return mats


def prepare_params(p):
    # fc columns permuted (c,h,w) -> (h,w,c) so the fc output is already in
    # the kernel's row/lane layout; gamma/beta permuted identically.
    half = NGF * H0 * W0
    perm_half = np.transpose(
        np.arange(half).reshape(NGF, H0, W0), (1, 2, 0)).reshape(-1)
    perm = np.concatenate([perm_half, perm_half + half])

    fc_w = np.asarray(p["fc_w"])                       # (1024, 80)
    fc_wm = fc_w.T[:, perm]                            # (80, 1024)
    fc_gb = np.stack([np.asarray(p["fc_bn_g"])[perm],
                      np.asarray(p["fc_bn_b"])[perm]], axis=0)

    w1m = _conv_band_mats(np.asarray(p["up1_w"]), W1)  # (3, 320, 256)
    w2m = _conv_band_mats(np.asarray(p["up2_w"]), W2)  # (3, 288, 256)
    gb1 = np.stack([np.asarray(p["up1_bn_g"]), np.asarray(p["up1_bn_b"])], axis=0)
    gb2 = np.stack([np.asarray(p["up2_bn_g"]), np.asarray(p["up2_bn_b"])], axis=0)

    return {
        "fc_wm": jnp.asarray(fc_wm, jnp.bfloat16),
        "fc_gb": jnp.asarray(fc_gb, jnp.float32),
        "w1m": jnp.asarray(w1m, jnp.bfloat16),
        "gb1": jnp.asarray(gb1, jnp.float32),
        "w2m": jnp.asarray(w2m, jnp.bfloat16),
        "gb2": jnp.asarray(gb2, jnp.float32),
    }


# ---------------------------------------------------------------------------
# Pure-JAX reference (PyTorch semantics; bf16 matmul operands, f32 math)
# ---------------------------------------------------------------------------
def _upsample2x_nhwc(x):
    x = jnp.repeat(x, 2, axis=1)
    return jnp.repeat(x, 2, axis=2)


def _bn_ref(y, gamma, beta, axes):
    mu = jnp.mean(y, axis=axes, keepdims=True)
    var = jnp.mean(jnp.square(y - mu), axis=axes, keepdims=True)
    return (y - mu) * jax.lax.rsqrt(var + BN_EPS) * gamma + beta


def reference_forward(params, c_code):
    B = c_code.shape[0]
    y = jnp.dot(c_code.astype(jnp.bfloat16),
                jnp.transpose(params["fc_w"]).astype(jnp.bfloat16),
                preferred_element_type=jnp.float32)
    y = _bn_ref(y, params["fc_bn_g"], params["fc_bn_b"], axes=(0,))
    h = y[:, :NGF * 16] * jax.nn.sigmoid(y[:, NGF * 16:])
    x = jnp.transpose(h.reshape(B, NGF, 4, 4), (0, 2, 3, 1))       # NHWC

    def up_block(x, w, g, b):
        x = _upsample2x_nhwc(x)
        wt = jnp.transpose(w, (2, 3, 1, 0))                        # HWIO
        y = jax.lax.conv_general_dilated(
            x.astype(jnp.bfloat16), wt.astype(jnp.bfloat16),
            window_strides=(1, 1), padding="SAME",
            dimension_numbers=("NHWC", "HWIO", "NHWC"),
            preferred_element_type=jnp.float32)
        y = _bn_ref(y, g, b, axes=(0, 1, 2))
        n = y.shape[-1] // 2
        return y[..., :n] * jax.nn.sigmoid(y[..., n:])

    x = up_block(x, params["up1_w"], params["up1_bn_g"], params["up1_bn_b"])
    x = up_block(x, params["up2_w"], params["up2_bn_g"], params["up2_bn_b"])
    return jnp.transpose(x, (0, 3, 1, 2))


if __name__ == "__main__":
    key = jax.random.PRNGKey(0)
    pkey, ckey = jax.random.split(key)
    params = init_params(pkey)
    prep = prepare_params(params)

    # in_code = c_code has size Z_DIM + code_dim (B_CONDITION=True)
    c_code = jax.random.normal(ckey, (BATCH, IN_DIM), jnp.float32)

    out = jax.block_until_ready(jax.jit(init_stage_g_forward)(prep, c_code))
    assert out.shape == (BATCH, NGF // 4, 16, 16), out.shape
    assert bool(jnp.all(jnp.isfinite(out)))

    ref = jax.block_until_ready(jax.jit(reference_forward)(params, c_code))
    err_max = float(jnp.max(jnp.abs(out - ref)))
    err_mean = float(jnp.mean(jnp.abs(out - ref)))
    assert err_max < 0.3 and err_mean < 0.02, (err_max, err_mean)

    # TODO(synk): code_dim==128/256 branches (jointConv/downsample/residual/
    # upsample3/4 with x_var) are only constructed for those configs and are
    # not exercised here; BN running-stat updates are a training side effect
    # with no output and are not modeled.
    print("KERNEL_OK")
</pallas_src>

<mosaic_0001>
module attributes {stable_mosaic.version = 11 : i64} {
  func.func @_init_stage_g_kernel(%arg0: i32, %arg1: memref<2x80xf32, #tpu.memory_space<vmem>>, %arg2: memref<80x1024xbf16, #tpu.memory_space<vmem>>, %arg3: memref<2x1024xf32, #tpu.memory_space<vmem>>, %arg4: memref<3x320x256xbf16, #tpu.memory_space<vmem>>, %arg5: memref<2x32xf32, #tpu.memory_space<vmem>>, %arg6: memref<3x288x256xbf16, #tpu.memory_space<vmem>>, %arg7: memref<2x16xf32, #tpu.memory_space<vmem>>, %arg8: memref<32x128xf32, #tpu.memory_space<vmem>>, %arg9: memref<20x320xf32, #tpu.memory_space<vmem>>, %arg10: memref<36x288xf32, #tpu.memory_space<vmem>>) attributes {dimension_semantics = [#tpu.dimension_semantics<arbitrary>], iteration_bounds = array<i64: 1>, scalar_prefetch = 0 : i64, scratch_operands = 2 : i64, tpu.core_type = #tpu.core_type<tc>, window_params = [{pipeline_mode = #tpu.pipeline_mode<synchronous>, transform_indices = @transform_0, window_bounds = array<i64: 2, 80>}, {pipeline_mode = #tpu.pipeline_mode<synchronous>, transform_indices = @transform_1, window_bounds = array<i64: 80, 1024>}, {pipeline_mode = #tpu.pipeline_mode<synchronous>, transform_indices = @transform_2, window_bounds = array<i64: 2, 1024>}, {pipeline_mode = #tpu.pipeline_mode<synchronous>, transform_indices = @transform_3, window_bounds = array<i64: 3, 320, 256>}, {pipeline_mode = #tpu.pipeline_mode<synchronous>, transform_indices = @transform_4, window_bounds = array<i64: 2, 32>}, {pipeline_mode = #tpu.pipeline_mode<synchronous>, transform_indices = @transform_5, window_bounds = array<i64: 3, 288, 256>}, {pipeline_mode = #tpu.pipeline_mode<synchronous>, transform_indices = @transform_6, window_bounds = array<i64: 2, 16>}, {pipeline_mode = #tpu.pipeline_mode<synchronous>, transform_indices = @transform_7, window_bounds = array<i64: 32, 128>}]} {
    %c0 = arith.constant 0 : index
    %c0_0 = arith.constant 0 : index
    %0 = vector.load %arg1[%c0, %c0_0] : memref<2x80xf32, #tpu.memory_space<vmem>>, vector<2x80xf32>
    %1 = arith.truncf %0 : vector<2x80xf32> to vector<2x80xbf16>
    %c0_1 = arith.constant 0 : index
    %c0_2 = arith.constant 0 : index
    %2 = vector.load %arg2[%c0_1, %c0_2] : memref<80x1024xbf16, #tpu.memory_space<vmem>>, vector<80x1024xbf16>
    %cst = arith.constant dense<0.000000e+00> : vector<2x1024xf32>
    %3 = tpu.matmul %1, %2, %cst {dimension_numbers = #tpu.dot_dimension_numbers<[1], [0], [0], [1], [0, 0, 1, 1], [], []>} : vector<2x80xbf16>, vector<80x1024xbf16>, vector<2x1024xf32> -> vector<2x1024xf32>
    %c0_3 = arith.constant 0 : index
    %c0_4 = arith.constant 0 : index
    %4 = vector.load %arg3[%c0_3, %c0_4] : memref<2x1024xf32, #tpu.memory_space<vmem>>, vector<2x1024xf32>
    %cst_5 = arith.constant dense<0.000000e+00> : vector<1024xf32>
    %5 = vector.multi_reduction <add>, %3, %cst_5 [0] : vector<2x1024xf32> to vector<1024xf32>
    %6 = vector.shape_cast %5 : vector<1024xf32> to vector<1x1024xf32>
    %cst_6 = arith.constant 2.000000e+00 : f32
    %7 = vector.broadcast %cst_6 : f32 to vector<1x1024xf32>
    %8 = arith.divf %6, %7 : vector<1x1024xf32>
    %9 = vector.broadcast %8 : vector<1x1024xf32> to vector<2x1024xf32>
    %10 = arith.subf %3, %9 : vector<2x1024xf32>
    %11 = arith.mulf %10, %10 : vector<2x1024xf32>
    %cst_7 = arith.constant dense<0.000000e+00> : vector<1024xf32>
    %12 = vector.multi_reduction <add>, %11, %cst_7 [0] : vector<2x1024xf32> to vector<1024xf32>
    %13 = vector.shape_cast %12 : vector<1024xf32> to vector<1x1024xf32>
    %cst_8 = arith.constant 2.000000e+00 : f32
    %14 = vector.broadcast %cst_8 : f32 to vector<1x1024xf32>
    %15 = arith.divf %13, %14 : vector<1x1024xf32>
    %16 = vector.extract_strided_slice %4 {offsets = [0, 0], sizes = [1, 1024], strides = [1, 1]} : vector<2x1024xf32> to vector<1x1024xf32>
    %cst_9 = arith.constant 9.99999974E-6 : f32
    %17 = vector.broadcast %cst_9 : f32 to vector<1x1024xf32>
    %18 = arith.addf %15, %17 : vector<1x1024xf32>
    %19 = math.rsqrt %18 : vector<1x1024xf32>
    %20 = arith.mulf %16, %19 : vector<1x1024xf32>
    %21 = vector.broadcast %20 : vector<1x1024xf32> to vector<2x1024xf32>
    %22 = arith.mulf %10, %21 : vector<2x1024xf32>
    %23 = vector.extract_strided_slice %4 {offsets = [1, 0], sizes = [1, 1024], strides = [1, 1]} : vector<2x1024xf32> to vector<1x1024xf32>
    %24 = vector.broadcast %23 : vector<1x1024xf32> to vector<2x1024xf32>
    %25 = arith.addf %22, %24 : vector<2x1024xf32>
    %26 = vector.extract_strided_slice %25 {offsets = [0, 0], sizes = [2, 512], strides = [1, 1]} : vector<2x1024xf32> to vector<2x512xf32>
    %27 = vector.extract_strided_slice %25 {offsets = [0, 512], sizes = [2, 512], strides = [1, 1]} : vector<2x1024xf32> to vector<2x512xf32>
    %cst_10 = arith.constant 5.000000e-01 : f32
    %28 = vector.broadcast %cst_10 : f32 to vector<2x512xf32>
    %29 = arith.mulf %28, %27 : vector<2x512xf32>
    %30 = math.tanh %29 : vector<2x512xf32>
    %cst_11 = arith.constant 1.000000e+00 : f32
    %31 = vector.broadcast %cst_11 : f32 to vector<2x512xf32>
    %32 = arith.addf %30, %31 : vector<2x512xf32>
    %cst_12 = arith.constant 5.000000e-01 : f32
    %33 = vector.broadcast %cst_12 : f32 to vector<2x512xf32>
    %34 = arith.mulf %33, %32 : vector<2x512xf32>
    %35 = arith.mulf %26, %34 : vector<2x512xf32>
    %cst_13 = arith.constant 0.000000e+00 : f32
    %36 = vector.broadcast %cst_13 : f32 to vector<20x320xf32>
    %c0_14 = arith.constant 0 : index
    %c0_15 = arith.constant 0 : index
    %37 = vector.load %arg9[%c0_14, %c0_15] : memref<20x320xf32, #tpu.memory_space<vmem>>, vector<20x320xf32>
    tpu.vector_store %arg9[%c0_14, %c0_15], %36 {strides = array<i32>} : memref<20x320xf32, #tpu.memory_space<vmem>>, vector<20x320xf32>,
    %cst_16 = arith.constant 0.000000e+00 : f32
    %38 = vector.broadcast %cst_16 : f32 to vector<2x32xf32>
    %39 = vector.extract_strided_slice %35 {offsets = [0, 0], sizes = [2, 32], strides = [1, 1]} : vector<2x512xf32> to vector<2x32xf32>
    %40 = vector.extract_strided_slice %35 {offsets = [0, 32], sizes = [2, 32], strides = [1, 1]} : vector<2x512xf32> to vector<2x32xf32>
    %41 = vector.extract_strided_slice %35 {offsets = [0, 64], sizes = [2, 32], strides = [1, 1]} : vector<2x512xf32> to vector<2x32xf32>
    %42 = vector.extract_strided_slice %35 {offsets = [0, 96], sizes = [2, 32], strides = [1, 1]} : vector<2x512xf32> to vector<2x32xf32>
    %43 = tpu.concatenate %38, %39, %39, %40, %40, %41, %41, %42, %42, %38 in 1 : vector<2x32xf32>, vector<2x32xf32>, vector<2x32xf32>, vector<2x32xf32>, vector<2x32xf32>, vector<2x32xf32>, vector<2x32xf32>, vector<2x32xf32>, vector<2x32xf32>, vector<2x32xf32> -> vector<2x320xf32>
    %c2 = arith.constant 2 : index
    %c0_17 = arith.constant 0 : index
    %44 = vector.load %arg9[%c2, %c0_17] : memref<20x320xf32, #tpu.memory_space<vmem>>, vector<2x320xf32>
    tpu.vector_store %arg9[%c2, %c0_17], %43 {strides = array<i32>} : memref<20x320xf32, #tpu.memory_space<vmem>>, vector<2x320xf32>,
    %c4 = arith.constant 4 : index
    %c0_18 = arith.constant 0 : index
    %45 = vector.load %arg9[%c4, %c0_18] : memref<20x320xf32, #tpu.memory_space<vmem>>, vector<2x320xf32>
    tpu.vector_store %arg9[%c4, %c0_18], %43 {strides = array<i32>} : memref<20x320xf32, #tpu.memory_space<vmem>>, vector<2x320xf32>,
    %46 = vector.extract_strided_slice %35 {offsets = [0, 128], sizes = [2, 32], strides = [1, 1]} : vector<2x512xf32> to vector<2x32xf32>
    %47 = vector.extract_strided_slice %35 {offsets = [0, 160], sizes = [2, 32], strides = [1, 1]} : vector<2x512xf32> to vector<2x32xf32>
    %48 = vector.extract_strided_slice %35 {offsets = [0, 192], sizes = [2, 32], strides = [1, 1]} : vector<2x512xf32> to vector<2x32xf32>
    %49 = vector.extract_strided_slice %35 {offsets = [0, 224], sizes = [2, 32], strides = [1, 1]} : vector<2x512xf32> to vector<2x32xf32>
    %50 = tpu.concatenate %38, %46, %46, %47, %47, %48, %48, %49, %49, %38 in 1 : vector<2x32xf32>, vector<2x32xf32>, vector<2x32xf32>, vector<2x32xf32>, vector<2x32xf32>, vector<2x32xf32>, vector<2x32xf32>, vector<2x32xf32>, vector<2x32xf32>, vector<2x32xf32> -> vector<2x320xf32>
    %c6 = arith.constant 6 : index
    %c0_19 = arith.constant 0 : index
    %51 = vector.load %arg9[%c6, %c0_19] : memref<20x320xf32, #tpu.memory_space<vmem>>, vector<2x320xf32>
    tpu.vector_store %arg9[%c6, %c0_19], %50 {strides = array<i32>} : memref<20x320xf32, #tpu.memory_space<vmem>>, vector<2x320xf32>,
    %c8 = arith.constant 8 : index
    %c0_20 = arith.constant 0 : index
    %52 = vector.load %arg9[%c8, %c0_20] : memref<20x320xf32, #tpu.memory_space<vmem>>, vector<2x320xf32>
    tpu.vector_store %arg9[%c8, %c0_20], %50 {strides = array<i32>} : memref<20x320xf32, #tpu.memory_space<vmem>>, vector<2x320xf32>,
    %53 = vector.extract_strided_slice %35 {offsets = [0, 256], sizes = [2, 32], strides = [1, 1]} : vector<2x512xf32> to vector<2x32xf32>
    %54 = vector.extract_strided_slice %35 {offsets = [0, 288], sizes = [2, 32], strides = [1, 1]} : vector<2x512xf32> to vector<2x32xf32>
    %55 = vector.extract_strided_slice %35 {offsets = [0, 320], sizes = [2, 32], strides = [1, 1]} : vector<2x512xf32> to vector<2x32xf32>
    %56 = vector.extract_strided_slice %35 {offsets = [0, 352], sizes = [2, 32], strides = [1, 1]} : vector<2x512xf32> to vector<2x32xf32>
    %57 = tpu.concatenate %38, %53, %53, %54, %54, %55, %55, %56, %56, %38 in 1 : vector<2x32xf32>, vector<2x32xf32>, vector<2x32xf32>, vector<2x32xf32>, vector<2x32xf32>, vector<2x32xf32>, vector<2x32xf32>, vector<2x32xf32>, vector<2x32xf32>, vector<2x32xf32> -> vector<2x320xf32>
    %c10 = arith.constant 10 : index
    %c0_21 = arith.constant 0 : index
    %58 = vector.load %arg9[%c10, %c0_21] : memref<20x320xf32, #tpu.memory_space<vmem>>, vector<2x320xf32>
    tpu.vector_store %arg9[%c10, %c0_21], %57 {strides = array<i32>} : memref<20x320xf32, #tpu.memory_space<vmem>>, vector<2x320xf32>,
    %c12 = arith.constant 12 : index
    %c0_22 = arith.constant 0 : index
    %59 = vector.load %arg9[%c12, %c0_22] : memref<20x320xf32, #tpu.memory_space<vmem>>, vector<2x320xf32>
    tpu.vector_store %arg9[%c12, %c0_22], %57 {strides = array<i32>} : memref<20x320xf32, #tpu.memory_space<vmem>>, vector<2x320xf32>,
    %60 = vector.extract_strided_slice %35 {offsets = [0, 384], sizes = [2, 32], strides = [1, 1]} : vector<2x512xf32> to vector<2x32xf32>
    %61 = vector.extract_strided_slice %35 {offsets = [0, 416], sizes = [2, 32], strides = [1, 1]} : vector<2x512xf32> to vector<2x32xf32>
    %62 = vector.extract_strided_slice %35 {offsets = [0, 448], sizes = [2, 32], strides = [1, 1]} : vector<2x512xf32> to vector<2x32xf32>
    %63 = vector.extract_strided_slice %35 {offsets = [0, 480], sizes = [2, 32], strides = [1, 1]} : vector<2x512xf32> to vector<2x32xf32>
    %64 = tpu.concatenate %38, %60, %60, %61, %61, %62, %62, %63, %63, %38 in 1 : vector<2x32xf32>, vector<2x32xf32>, vector<2x32xf32>, vector<2x32xf32>, vector<2x32xf32>, vector<2x32xf32>, vector<2x32xf32>, vector<2x32xf32>, vector<2x32xf32>, vector<2x32xf32> -> vector<2x320xf32>
    %c14 = arith.constant 14 : index
    %c0_23 = arith.constant 0 : index
    %65 = vector.load %arg9[%c14, %c0_23] : memref<20x320xf32, #tpu.memory_space<vmem>>, vector<2x320xf32>
    tpu.vector_store %arg9[%c14, %c0_23], %64 {strides = array<i32>} : memref<20x320xf32, #tpu.memory_space<vmem>>, vector<2x320xf32>,
    %c16 = arith.constant 16 : index
    %c0_24 = arith.constant 0 : index
    %66 = vector.load %arg9[%c16, %c0_24] : memref<20x320xf32, #tpu.memory_space<vmem>>, vector<2x320xf32>
    tpu.vector_store %arg9[%c16, %c0_24], %64 {strides = array<i32>} : memref<20x320xf32, #tpu.memory_space<vmem>>, vector<2x320xf32>,
    %c0_25 = arith.constant 0 : index
    %c0_26 = arith.constant 0 : index
    %67 = vector.load %arg9[%c0_25, %c0_26] : memref<20x320xf32, #tpu.memory_space<vmem>>, vector<20x320xf32>
    %68 = arith.truncf %67 : vector<20x320xf32> to vector<20x320xbf16>
    %69 = vector.extract_strided_slice %68 {offsets = [0, 0], sizes = [16, 320], strides = [1, 1]} : vector<20x320xbf16> to vector<16x320xbf16>
    %c0_27 = arith.constant 0 : index
    %c0_28 = arith.constant 0 : index
    %c0_29 = arith.constant 0 : index
    %70 = vector.load %arg4[%c0_27, %c0_28, %c0_29] : memref<3x320x256xbf16, #tpu.memory_space<vmem>>, vector<1x320x256xbf16>
    %71 = vector.shape_cast %70 : vector<1x320x256xbf16> to vector<320x256xbf16>
    %cst_30 = arith.constant dense<0.000000e+00> : vector<16x256xf32>
    %72 = tpu.matmul %69, %71, %cst_30 {dimension_numbers = #tpu.dot_dimension_numbers<[1], [0], [0], [1], [0, 0, 1, 1], [], []>} : vector<16x320xbf16>, vector<320x256xbf16>, vector<16x256xf32> -> vector<16x256xf32>
    %73 = vector.extract_strided_slice %68 {offsets = [2, 0], sizes = [16, 320], strides = [1, 1]} : vector<20x320xbf16> to vector<16x320xbf16>
    %c1 = arith.constant 1 : index
    %c0_31 = arith.constant 0 : index
    %c0_32 = arith.constant 0 : index
    %74 = vector.load %arg4[%c1, %c0_31, %c0_32] : memref<3x320x256xbf16, #tpu.memory_space<vmem>>, vector<1x320x256xbf16>
    %75 = vector.shape_cast %74 : vector<1x320x256xbf16> to vector<320x256xbf16>
    %cst_33 = arith.constant dense<0.000000e+00> : vector<16x256xf32>
    %76 = tpu.matmul %73, %75, %cst_33 {dimension_numbers = #tpu.dot_dimension_numbers<[1], [0], [0], [1], [0, 0, 1, 1], [], []>} : vector<16x320xbf16>, vector<320x256xbf16>, vector<16x256xf32> -> vector<16x256xf32>
    %77 = arith.addf %72, %76 : vector<16x256xf32>
    %78 = vector.extract_strided_slice %68 {offsets = [4, 0], sizes = [16, 320], strides = [1, 1]} : vector<20x320xbf16> to vector<16x320xbf16>
    %c2_34 = arith.constant 2 : index
    %c0_35 = arith.constant 0 : index
    %c0_36 = arith.constant 0 : index
    %79 = vector.load %arg4[%c2_34, %c0_35, %c0_36] : memref<3x320x256xbf16, #tpu.memory_space<vmem>>, vector<1x320x256xbf16>
    %80 = vector.shape_cast %79 : vector<1x320x256xbf16> to vector<320x256xbf16>
    %cst_37 = arith.constant dense<0.000000e+00> : vector<16x256xf32>
    %81 = tpu.matmul %78, %80, %cst_37 {dimension_numbers = #tpu.dot_dimension_numbers<[1], [0], [0], [1], [0, 0, 1, 1], [], []>} : vector<16x320xbf16>, vector<320x256xbf16>, vector<16x256xf32> -> vector<16x256xf32>
    %82 = arith.addf %77, %81 : vector<16x256xf32>
    %c0_38 = arith.constant 0 : index
    %c0_39 = arith.constant 0 : index
    %83 = vector.load %arg5[%c0_38, %c0_39] : memref<2x32xf32, #tpu.memory_space<vmem>>, vector<2x32xf32>
    %cst_40 = arith.constant dense<0.000000e+00> : vector<256xf32>
    %84 = vector.multi_reduction <add>, %82, %cst_40 [0] : vector<16x256xf32> to vector<256xf32>
    %85 = vector.shape_cast %84 : vector<256xf32> to vector<1x256xf32>
    %86 = vector.extract_strided_slice %85 {offsets = [0, 0], sizes = [1, 16], strides = [1, 1]} : vector<1x256xf32> to vector<1x16xf32>
    %87 = vector.extract_strided_slice %85 {offsets = [0, 16], sizes = [1, 16], strides = [1, 1]} : vector<1x256xf32> to vector<1x16xf32>
    %88 = arith.addf %86, %87 : vector<1x16xf32>
    %89 = vector.extract_strided_slice %85 {offsets = [0, 32], sizes = [1, 16], strides = [1, 1]} : vector<1x256xf32> to vector<1x16xf32>
    %90 = arith.addf %88, %89 : vector<1x16xf32>
    %91 = vector.extract_strided_slice %85 {offsets = [0, 48], sizes = [1, 16], strides = [1, 1]} : vector<1x256xf32> to vector<1x16xf32>
    %92 = arith.addf %90, %91 : vector<1x16xf32>
    %93 = vector.extract_strided_slice %85 {offsets = [0, 64], sizes = [1, 16], strides = [1, 1]} : vector<1x256xf32> to vector<1x16xf32>
    %94 = arith.addf %92, %93 : vector<1x16xf32>
    %95 = vector.extract_strided_slice %85 {offsets = [0, 80], sizes = [1, 16], strides = [1, 1]} : vector<1x256xf32> to vector<1x16xf32>
    %96 = arith.addf %94, %95 : vector<1x16xf32>
    %97 = vector.extract_strided_slice %85 {offsets = [0, 96], sizes = [1, 16], strides = [1, 1]} : vector<1x256xf32> to vector<1x16xf32>
    %98 = arith.addf %96, %97 : vector<1x16xf32>
    %99 = vector.extract_strided_slice %85 {offsets = [0, 112], sizes = [1, 16], strides = [1, 1]} : vector<1x256xf32> to vector<1x16xf32>
    %100 = arith.addf %98, %99 : vector<1x16xf32>
    %cst_41 = arith.constant 1.280000e+02 : f32
    %101 = vector.broadcast %cst_41 : f32 to vector<1x16xf32>
    %102 = arith.divf %100, %101 : vector<1x16xf32>
    %103 = vector.extract_strided_slice %85 {offsets = [0, 128], sizes = [1, 16], strides = [1, 1]} : vector<1x256xf32> to vector<1x16xf32>
    %104 = vector.extract_strided_slice %85 {offsets = [0, 144], sizes = [1, 16], strides = [1, 1]} : vector<1x256xf32> to vector<1x16xf32>
    %105 = arith.addf %103, %104 : vector<1x16xf32>
    %106 = vector.extract_strided_slice %85 {offsets = [0, 160], sizes = [1, 16], strides = [1, 1]} : vector<1x256xf32> to vector<1x16xf32>
    %107 = arith.addf %105, %106 : vector<1x16xf32>
    %108 = vector.extract_strided_slice %85 {offsets = [0, 176], sizes = [1, 16], strides = [1, 1]} : vector<1x256xf32> to vector<1x16xf32>
    %109 = arith.addf %107, %108 : vector<1x16xf32>
    %110 = vector.extract_strided_slice %85 {offsets = [0, 192], sizes = [1, 16], strides = [1, 1]} : vector<1x256xf32> to vector<1x16xf32>
    %111 = arith.addf %109, %110 : vector<1x16xf32>
    %112 = vector.extract_strided_slice %85 {offsets = [0, 208], sizes = [1, 16], strides = [1, 1]} : vector<1x256xf32> to vector<1x16xf32>
    %113 = arith.addf %111, %112 : vector<1x16xf32>
    %114 = vector.extract_strided_slice %85 {offsets = [0, 224], sizes = [1, 16], strides = [1, 1]} : vector<1x256xf32> to vector<1x16xf32>
    %115 = arith.addf %113, %114 : vector<1x16xf32>
    %116 = vector.extract_strided_slice %85 {offsets = [0, 240], sizes = [1, 16], strides = [1, 1]} : vector<1x256xf32> to vector<1x16xf32>
    %117 = arith.addf %115, %116 : vector<1x16xf32>
    %cst_42 = arith.constant 1.280000e+02 : f32
    %118 = vector.broadcast %cst_42 : f32 to vector<1x16xf32>
    %119 = arith.divf %117, %118 : vector<1x16xf32>
    %120 = tpu.concatenate %102, %102, %102, %102, %102, %102, %102, %102 in 1 : vector<1x16xf32>, vector<1x16xf32>, vector<1x16xf32>, vector<1x16xf32>, vector<1x16xf32>, vector<1x16xf32>, vector<1x16xf32>, vector<1x16xf32> -> vector<1x128xf32>
    %121 = tpu.concatenate %119, %119, %119, %119, %119, %119, %119, %119 in 1 : vector<1x16xf32>, vector<1x16xf32>, vector<1x16xf32>, vector<1x16xf32>, vector<1x16xf32>, vector<1x16xf32>, vector<1x16xf32>, vector<1x16xf32> -> vector<1x128xf32>
    %122 = tpu.concatenate %120, %121 in 1 : vector<1x128xf32>, vector<1x128xf32> -> vector<1x256xf32>
    %123 = vector.broadcast %122 : vector<1x256xf32> to vector<16x256xf32>
    %124 = arith.subf %82, %123 : vector<16x256xf32>
    %125 = arith.mulf %124, %124 : vector<16x256xf32>
    %cst_43 = arith.constant dense<0.000000e+00> : vector<256xf32>
    %126 = vector.multi_reduction <add>, %125, %cst_43 [0] : vector<16x256xf32> to vector<256xf32>
    %127 = vector.shape_cast %126 : vector<256xf32> to vector<1x256xf32>
    %128 = vector.extract_strided_slice %127 {offsets = [0, 0], sizes = [1, 16], strides = [1, 1]} : vector<1x256xf32> to vector<1x16xf32>
    %129 = vector.extract_strided_slice %127 {offsets = [0, 16], sizes = [1, 16], strides = [1, 1]} : vector<1x256xf32> to vector<1x16xf32>
    %130 = arith.addf %128, %129 : vector<1x16xf32>
    %131 = vector.extract_strided_slice %127 {offsets = [0, 32], sizes = [1, 16], strides = [1, 1]} : vector<1x256xf32> to vector<1x16xf32>
    %132 = arith.addf %130, %131 : vector<1x16xf32>
    %133 = vector.extract_strided_slice %127 {offsets = [0, 48], sizes = [1, 16], strides = [1, 1]} : vector<1x256xf32> to vector<1x16xf32>
    %134 = arith.addf %132, %133 : vector<1x16xf32>
    %135 = vector.extract_strided_slice %127 {offsets = [0, 64], sizes = [1, 16], strides = [1, 1]} : vector<1x256xf32> to vector<1x16xf32>
    %136 = arith.addf %134, %135 : vector<1x16xf32>
    %137 = vector.extract_strided_slice %127 {offsets = [0, 80], sizes = [1, 16], strides = [1, 1]} : vector<1x256xf32> to vector<1x16xf32>
    %138 = arith.addf %136, %137 : vector<1x16xf32>
    %139 = vector.extract_strided_slice %127 {offsets = [0, 96], sizes = [1, 16], strides = [1, 1]} : vector<1x256xf32> to vector<1x16xf32>
    %140 = arith.addf %138, %139 : vector<1x16xf32>
    %141 = vector.extract_strided_slice %127 {offsets = [0, 112], sizes = [1, 16], strides = [1, 1]} : vector<1x256xf32> to vector<1x16xf32>
    %142 = arith.addf %140, %141 : vector<1x16xf32>
    %cst_44 = arith.constant 1.280000e+02 : f32
    %143 = vector.broadcast %cst_44 : f32 to vector<1x16xf32>
    %144 = arith.divf %142, %143 : vector<1x16xf32>
    %145 = vector.extract_strided_slice %127 {offsets = [0, 128], sizes = [1, 16], strides = [1, 1]} : vector<1x256xf32> to vector<1x16xf32>
    %146 = vector.extract_strided_slice %127 {offsets = [0, 144], sizes = [1, 16], strides = [1, 1]} : vector<1x256xf32> to vector<1x16xf32>
    %147 = arith.addf %145, %146 : vector<1x16xf32>
    %148 = vector.extract_strided_slice %127 {offsets = [0, 160], sizes = [1, 16], strides = [1, 1]} : vector<1x256xf32> to vector<1x16xf32>
    %149 = arith.addf %147, %148 : vector<1x16xf32>
    %150 = vector.extract_strided_slice %127 {offsets = [0, 176], sizes = [1, 16], strides = [1, 1]} : vector<1x256xf32> to vector<1x16xf32>
    %151 = arith.addf %149, %150 : vector<1x16xf32>
    %152 = vector.extract_strided_slice %127 {offsets = [0, 192], sizes = [1, 16], strides = [1, 1]} : vector<1x256xf32> to vector<1x16xf32>
    %153 = arith.addf %151, %152 : vector<1x16xf32>
    %154 = vector.extract_strided_slice %127 {offsets = [0, 208], sizes = [1, 16], strides = [1, 1]} : vector<1x256xf32> to vector<1x16xf32>
    %155 = arith.addf %153, %154 : vector<1x16xf32>
    %156 = vector.extract_strided_slice %127 {offsets = [0, 224], sizes = [1, 16], strides = [1, 1]} : vector<1x256xf32> to vector<1x16xf32>
    %157 = arith.addf %155, %156 : vector<1x16xf32>
    %158 = vector.extract_strided_slice %127 {offsets = [0, 240], sizes = [1, 16], strides = [1, 1]} : vector<1x256xf32> to vector<1x16xf32>
    %159 = arith.addf %157, %158 : vector<1x16xf32>
    %cst_45 = arith.constant 1.280000e+02 : f32
    %160 = vector.broadcast %cst_45 : f32 to vector<1x16xf32>
    %161 = arith.divf %159, %160 : vector<1x16xf32>
    %162 = vector.extract_strided_slice %83 {offsets = [0, 0], sizes = [1, 16], strides = [1, 1]} : vector<2x32xf32> to vector<1x16xf32>
    %cst_46 = arith.constant 9.99999974E-6 : f32
    %163 = vector.broadcast %cst_46 : f32 to vector<1x16xf32>
    %164 = arith.addf %144, %163 : vector<1x16xf32>
    %165 = math.rsqrt %164 : vector<1x16xf32>
    %166 = arith.mulf %162, %165 : vector<1x16xf32>
    %167 = vector.extract_strided_slice %83 {offsets = [0, 16], sizes = [1, 16], strides = [1, 1]} : vector<2x32xf32> to vector<1x16xf32>
    %cst_47 = arith.constant 9.99999974E-6 : f32
    %168 = vector.broadcast %cst_47 : f32 to vector<1x16xf32>
    %169 = arith.addf %161, %168 : vector<1x16xf32>
    %170 = math.rsqrt %169 : vector<1x16xf32>
    %171 = arith.mulf %167, %170 : vector<1x16xf32>
    %172 = tpu.concatenate %166, %166, %166, %166, %166, %166, %166, %166 in 1 : vector<1x16xf32>, vector<1x16xf32>, vector<1x16xf32>, vector<1x16xf32>, vector<1x16xf32>, vector<1x16xf32>, vector<1x16xf32>, vector<1x16xf32> -> vector<1x128xf32>
    %173 = tpu.concatenate %171, %171, %171, %171, %171, %171, %171, %171 in 1 : vector<1x16xf32>, vector<1x16xf32>, vector<1x16xf32>, vector<1x16xf32>, vector<1x16xf32>, vector<1x16xf32>, vector<1x16xf32>, vector<1x16xf32> -> vector<1x128xf32>
    %174 = tpu.concatenate %172, %173 in 1 : vector<1x128xf32>, vector<1x128xf32> -> vector<1x256xf32>
    %175 = vector.broadcast %174 : vector<1x256xf32> to vector<16x256xf32>
    %176 = arith.mulf %124, %175 : vector<16x256xf32>
    %177 = vector.extract_strided_slice %83 {offsets = [1, 0], sizes = [1, 16], strides = [1, 1]} : vector<2x32xf32> to vector<1x16xf32>
    %178 = vector.extract_strided_slice %83 {offsets = [1, 16], sizes = [1, 16], strides = [1, 1]} : vector<2x32xf32> to vector<1x16xf32>
    %179 = tpu.concatenate %177, %177, %177, %177, %177, %177, %177, %177 in 1 : vector<1x16xf32>, vector<1x16xf32>, vector<1x16xf32>, vector<1x16xf32>, vector<1x16xf32>, vector<1x16xf32>, vector<1x16xf32>, vector<1x16xf32> -> vector<1x128xf32>
    %180 = tpu.concatenate %178, %178, %178, %178, %178, %178, %178, %178 in 1 : vector<1x16xf32>, vector<1x16xf32>, vector<1x16xf32>, vector<1x16xf32>, vector<1x16xf32>, vector<1x16xf32>, vector<1x16xf32>, vector<1x16xf32> -> vector<1x128xf32>
    %181 = tpu.concatenate %179, %180 in 1 : vector<1x128xf32>, vector<1x128xf32> -> vector<1x256xf32>
    %182 = vector.broadcast %181 : vector<1x256xf32> to vector<16x256xf32>
    %183 = arith.addf %176, %182 : vector<16x256xf32>
    %184 = vector.extract_strided_slice %183 {offsets = [0, 0], sizes = [16, 128], strides = [1, 1]} : vector<16x256xf32> to vector<16x128xf32>
    %185 = vector.extract_strided_slice %183 {offsets = [0, 128], sizes = [16, 128], strides = [1, 1]} : vector<16x256xf32> to vector<16x128xf32>
    %cst_48 = arith.constant 5.000000e-01 : f32
    %186 = vector.broadcast %cst_48 : f32 to vector<16x128xf32>
    %187 = arith.mulf %186, %185 : vector<16x128xf32>
    %188 = math.tanh %187 : vector<16x128xf32>
    %cst_49 = arith.constant 1.000000e+00 : f32
    %189 = vector.broadcast %cst_49 : f32 to vector<16x128xf32>
    %190 = arith.addf %188, %189 : vector<16x128xf32>
    %cst_50 = arith.constant 5.000000e-01 : f32
    %191 = vector.broadcast %cst_50 : f32 to vector<16x128xf32>
    %192 = arith.mulf %191, %190 : vector<16x128xf32>
    %193 = arith.mulf %184, %192 : vector<16x128xf32>
    %cst_51 = arith.constant 0.000000e+00 : f32
    %194 = vector.broadcast %cst_51 : f32 to vector<36x288xf32>
    %c0_52 = arith.constant 0 : index
    %c0_53 = arith.constant 0 : index
    %195 = vector.load %arg10[%c0_52, %c0_53] : memref<36x288xf32, #tpu.memory_space<vmem>>, vector<36x288xf32>
    tpu.vector_store %arg10[%c0_52, %c0_53], %194 {strides = array<i32>} : memref<36x288xf32, #tpu.memory_space<vmem>>, vector<36x288xf32>,
    %cst_54 = arith.constant 0.000000e+00 : f32
    %196 = vector.broadcast %cst_54 : f32 to vector<2x16xf32>
    %197 = vector.extract_strided_slice %193 {offsets = [0, 0], sizes = [2, 16], strides = [1, 1]} : vector<16x128xf32> to vector<2x16xf32>
    %198 = vector.extract_strided_slice %193 {offsets = [0, 16], sizes = [2, 16], strides = [1, 1]} : vector<16x128xf32> to vector<2x16xf32>
    %199 = vector.extract_strided_slice %193 {offsets = [0, 32], sizes = [2, 16], strides = [1, 1]} : vector<16x128xf32> to vector<2x16xf32>
    %200 = vector.extract_strided_slice %193 {offsets = [0, 48], sizes = [2, 16], strides = [1, 1]} : vector<16x128xf32> to vector<2x16xf32>
    %201 = vector.extract_strided_slice %193 {offsets = [0, 64], sizes = [2, 16], strides = [1, 1]} : vector<16x128xf32> to vector<2x16xf32>
    %202 = vector.extract_strided_slice %193 {offsets = [0, 80], sizes = [2, 16], strides = [1, 1]} : vector<16x128xf32> to vector<2x16xf32>
    %203 = vector.extract_strided_slice %193 {offsets = [0, 96], sizes = [2, 16], strides = [1, 1]} : vector<16x128xf32> to vector<2x16xf32>
    %204 = vector.extract_strided_slice %193 {offsets = [0, 112], sizes = [2, 16], strides = [1, 1]} : vector<16x128xf32> to vector<2x16xf32>
    %205 = tpu.concatenate %196, %197, %197, %198, %198, %199, %199, %200, %200, %201, %201, %202, %202, %203, %203, %204 in 1 : vector<2x16xf32>, vector<2x16xf32>, vector<2x16xf32>, vector<2x16xf32>, vector<2x16xf32>, vector<2x16xf32>, vector<2x16xf32>, vector<2x16xf32>, vector<2x16xf32>, vector<2x16xf32>, vector<2x16xf32>, vector<2x16xf32>, vector<2x16xf32>, vector<2x16xf32>, vector<2x16xf32>, vector<2x16xf32> -> vector<2x256xf32>
    %206 = tpu.concatenate %204, %196 in 1 : vector<2x16xf32>, vector<2x16xf32> -> vector<2x32xf32>
    %207 = tpu.concatenate %205, %206 in 1 : vector<2x256xf32>, vector<2x32xf32> -> vector<2x288xf32>
    %c2_55 = arith.constant 2 : index
    %c0_56 = arith.constant 0 : index
    %208 = vector.load %arg10[%c2_55, %c0_56] : memref<36x288xf32, #tpu.memory_space<vmem>>, vector<2x288xf32>
    tpu.vector_store %arg10[%c2_55, %c0_56], %207 {strides = array<i32>} : memref<36x288xf32, #tpu.memory_space<vmem>>, vector<2x288xf32>,
    %c4_57 = arith.constant 4 : index
    %c0_58 = arith.constant 0 : index
    %209 = vector.load %arg10[%c4_57, %c0_58] : memref<36x288xf32, #tpu.memory_space<vmem>>, vector<2x288xf32>
    tpu.vector_store %arg10[%c4_57, %c0_58], %207 {strides = array<i32>} : memref<36x288xf32, #tpu.memory_space<vmem>>, vector<2x288xf32>,
    %210 = vector.extract_strided_slice %193 {offsets = [2, 0], sizes = [2, 16], strides = [1, 1]} : vector<16x128xf32> to vector<2x16xf32>
    %211 = vector.extract_strided_slice %193 {offsets = [2, 16], sizes = [2, 16], strides = [1, 1]} : vector<16x128xf32> to vector<2x16xf32>
    %212 = vector.extract_strided_slice %193 {offsets = [2, 32], sizes = [2, 16], strides = [1, 1]} : vector<16x128xf32> to vector<2x16xf32>
    %213 = vector.extract_strided_slice %193 {offsets = [2, 48], sizes = [2, 16], strides = [1, 1]} : vector<16x128xf32> to vector<2x16xf32>
    %214 = vector.extract_strided_slice %193 {offsets = [2, 64], sizes = [2, 16], strides = [1, 1]} : vector<16x128xf32> to vector<2x16xf32>
    %215 = vector.extract_strided_slice %193 {offsets = [2, 80], sizes = [2, 16], strides = [1, 1]} : vector<16x128xf32> to vector<2x16xf32>
    %216 = vector.extract_strided_slice %193 {offsets = [2, 96], sizes = [2, 16], strides = [1, 1]} : vector<16x128xf32> to vector<2x16xf32>
    %217 = vector.extract_strided_slice %193 {offsets = [2, 112], sizes = [2, 16], strides = [1, 1]} : vector<16x128xf32> to vector<2x16xf32>
    %218 = tpu.concatenate %196, %210, %210, %211, %211, %212, %212, %213, %213, %214, %214, %215, %215, %216, %216, %217 in 1 : vector<2x16xf32>, vector<2x16xf32>, vector<2x16xf32>, vector<2x16xf32>, vector<2x16xf32>, vector<2x16xf32>, vector<2x16xf32>, vector<2x16xf32>, vector<2x16xf32>, vector<2x16xf32>, vector<2x16xf32>, vector<2x16xf32>, vector<2x16xf32>, vector<2x16xf32>, vector<2x16xf32>, vector<2x16xf32> -> vector<2x256xf32>
    %219 = tpu.concatenate %217, %196 in 1 : vector<2x16xf32>, vector<2x16xf32> -> vector<2x32xf32>
    %220 = tpu.concatenate %218, %219 in 1 : vector<2x256xf32>, vector<2x32xf32> -> vector<2x288xf32>
    %c6_59 = arith.constant 6 : index
    %c0_60 = arith.constant 0 : index
    %221 = vector.load %arg10[%c6_59, %c0_60] : memref<36x288xf32, #tpu.memory_space<vmem>>, vector<2x288xf32>
    tpu.vector_store %arg10[%c6_59, %c0_60], %220 {strides = array<i32>} : memref<36x288xf32, #tpu.memory_space<vmem>>, vector<2x288xf32>,
    %c8_61 = arith.constant 8 : index
    %c0_62 = arith.constant 0 : index
    %222 = vector.load %arg10[%c8_61, %c0_62] : memref<36x288xf32, #tpu.memory_space<vmem>>, vector<2x288xf32>
    tpu.vector_store %arg10[%c8_61, %c0_62], %220 {strides = array<i32>} : memref<36x288xf32, #tpu.memory_space<vmem>>, vector<2x288xf32>,
    %223 = vector.extract_strided_slice %193 {offsets = [4, 0], sizes = [2, 16], strides = [1, 1]} : vector<16x128xf32> to vector<2x16xf32>
    %224 = vector.extract_strided_slice %193 {offsets = [4, 16], sizes = [2, 16], strides = [1, 1]} : vector<16x128xf32> to vector<2x16xf32>
    %225 = vector.extract_strided_slice %193 {offsets = [4, 32], sizes = [2, 16], strides = [1, 1]} : vector<16x128xf32> to vector<2x16xf32>
    %226 = vector.extract_strided_slice %193 {offsets = [4, 48], sizes = [2, 16], strides = [1, 1]} : vector<16x128xf32> to vector<2x16xf32>
    %227 = vector.extract_strided_slice %193 {offsets = [4, 64], sizes = [2, 16], strides = [1, 1]} : vector<16x128xf32> to vector<2x16xf32>
    %228 = vector.extract_strided_slice %193 {offsets = [4, 80], sizes = [2, 16], strides = [1, 1]} : vector<16x128xf32> to vector<2x16xf32>
    %229 = vector.extract_strided_slice %193 {offsets = [4, 96], sizes = [2, 16], strides = [1, 1]} : vector<16x128xf32> to vector<2x16xf32>
    %230 = vector.extract_strided_slice %193 {offsets = [4, 112], sizes = [2, 16], strides = [1, 1]} : vector<16x128xf32> to vector<2x16xf32>
    %231 = tpu.concatenate %196, %223, %223, %224, %224, %225, %225, %226, %226, %227, %227, %228, %228, %229, %229, %230 in 1 : vector<2x16xf32>, vector<2x16xf32>, vector<2x16xf32>, vector<2x16xf32>, vector<2x16xf32>, vector<2x16xf32>, vector<2x16xf32>, vector<2x16xf32>, vector<2x16xf32>, vector<2x16xf32>, vector<2x16xf32>, vector<2x16xf32>, vector<2x16xf32>, vector<2x16xf32>, vector<2x16xf32>, vector<2x16xf32> -> vector<2x256xf32>
    %232 = tpu.concatenate %230, %196 in 1 : vector<2x16xf32>, vector<2x16xf32> -> vector<2x32xf32>
    %233 = tpu.concatenate %231, %232 in 1 : vector<2x256xf32>, vector<2x32xf32> -> vector<2x288xf32>
    %c10_63 = arith.constant 10 : index
    %c0_64 = arith.constant 0 : index
    %234 = vector.load %arg10[%c10_63, %c0_64] : memref<36x288xf32, #tpu.memory_space<vmem>>, vector<2x288xf32>
    tpu.vector_store %arg10[%c10_63, %c0_64], %233 {strides = array<i32>} : memref<36x288xf32, #tpu.memory_space<vmem>>, vector<2x288xf32>,
    %c12_65 = arith.constant 12 : index
    %c0_66 = arith.constant 0 : index
    %235 = vector.load %arg10[%c12_65, %c0_66] : memref<36x288xf32, #tpu.memory_space<vmem>>, vector<2x288xf32>
    tpu.vector_store %arg10[%c12_65, %c0_66], %233 {strides = array<i32>} : memref<36x288xf32, #tpu.memory_space<vmem>>, vector<2x288xf32>,
    %236 = vector.extract_strided_slice %193 {offsets = [6, 0], sizes = [2, 16], strides = [1, 1]} : vector<16x128xf32> to vector<2x16xf32>
    %237 = vector.extract_strided_slice %193 {offsets = [6, 16], sizes = [2, 16], strides = [1, 1]} : vector<16x128xf32> to vector<2x16xf32>
    %238 = vector.extract_strided_slice %193 {offsets = [6, 32], sizes = [2, 16], strides = [1, 1]} : vector<16x128xf32> to vector<2x16xf32>
    %239 = vector.extract_strided_slice %193 {offsets = [6, 48], sizes = [2, 16], strides = [1, 1]} : vector<16x128xf32> to vector<2x16xf32>
    %240 = vector.extract_strided_slice %193 {offsets = [6, 64], sizes = [2, 16], strides = [1, 1]} : vector<16x128xf32> to vector<2x16xf32>
    %241 = vector.extract_strided_slice %193 {offsets = [6, 80], sizes = [2, 16], strides = [1, 1]} : vector<16x128xf32> to vector<2x16xf32>
    %242 = vector.extract_strided_slice %193 {offsets = [6, 96], sizes = [2, 16], strides = [1, 1]} : vector<16x128xf32> to vector<2x16xf32>
    %243 = vector.extract_strided_slice %193 {offsets = [6, 112], sizes = [2, 16], strides = [1, 1]} : vector<16x128xf32> to vector<2x16xf32>
    %244 = tpu.concatenate %196, %236, %236, %237, %237, %238, %238, %239, %239, %240, %240, %241, %241, %242, %242, %243 in 1 : vector<2x16xf32>, vector<2x16xf32>, vector<2x16xf32>, vector<2x16xf32>, vector<2x16xf32>, vector<2x16xf32>, vector<2x16xf32>, vector<2x16xf32>, vector<2x16xf32>, vector<2x16xf32>, vector<2x16xf32>, vector<2x16xf32>, vector<2x16xf32>, vector<2x16xf32>, vector<2x16xf32>, vector<2x16xf32> -> vector<2x256xf32>
    %245 = tpu.concatenate %243, %196 in 1 : vector<2x16xf32>, vector<2x16xf32> -> vector<2x32xf32>
    %246 = tpu.concatenate %244, %245 in 1 : vector<2x256xf32>, vector<2x32xf32> -> vector<2x288xf32>
    %c14_67 = arith.constant 14 : index
    %c0_68 = arith.constant 0 : index
    %247 = vector.load %arg10[%c14_67, %c0_68] : memref<36x288xf32, #tpu.memory_space<vmem>>, vector<2x288xf32>
    tpu.vector_store %arg10[%c14_67, %c0_68], %246 {strides = array<i32>} : memref<36x288xf32, #tpu.memory_space<vmem>>, vector<2x288xf32>,
    %c16_69 = arith.constant 16 : index
    %c0_70 = arith.constant 0 : index
    %248 = vector.load %arg10[%c16_69, %c0_70] : memref<36x288xf32, #tpu.memory_space<vmem>>, vector<2x288xf32>
    tpu.vector_store %arg10[%c16_69, %c0_70], %246 {strides = array<i32>} : memref<36x288xf32, #tpu.memory_space<vmem>>, vector<2x288xf32>,
    %249 = vector.extract_strided_slice %193 {offsets = [8, 0], sizes = [2, 16], strides = [1, 1]} : vector<16x128xf32> to vector<2x16xf32>
    %250 = vector.extract_strided_slice %193 {offsets = [8, 16], sizes = [2, 16], strides = [1, 1]} : vector<16x128xf32> to vector<2x16xf32>
    %251 = vector.extract_strided_slice %193 {offsets = [8, 32], sizes = [2, 16], strides = [1, 1]} : vector<16x128xf32> to vector<2x16xf32>
    %252 = vector.extract_strided_slice %193 {offsets = [8, 48], sizes = [2, 16], strides = [1, 1]} : vector<16x128xf32> to vector<2x16xf32>
    %253 = vector.extract_strided_slice %193 {offsets = [8, 64], sizes = [2, 16], strides = [1, 1]} : vector<16x128xf32> to vector<2x16xf32>
    %254 = vector.extract_strided_slice %193 {offsets = [8, 80], sizes = [2, 16], strides = [1, 1]} : vector<16x128xf32> to vector<2x16xf32>
    %255 = vector.extract_strided_slice %193 {offsets = [8, 96], sizes = [2, 16], strides = [1, 1]} : vector<16x128xf32> to vector<2x16xf32>
    %256 = vector.extract_strided_slice %193 {offsets = [8, 112], sizes = [2, 16], strides = [1, 1]} : vector<16x128xf32> to vector<2x16xf32>
    %257 = tpu.concatenate %196, %249, %249, %250, %250, %251, %251, %252, %252, %253, %253, %254, %254, %255, %255, %256 in 1 : vector<2x16xf32>, vector<2x16xf32>, vector<2x16xf32>, vector<2x16xf32>, vector<2x16xf32>, vector<2x16xf32>, vector<2x16xf32>, vector<2x16xf32>, vector<2x16xf32>, vector<2x16xf32>, vector<2x16xf32>, vector<2x16xf32>, vector<2x16xf32>, vector<2x16xf32>, vector<2x16xf32>, vector<2x16xf32> -> vector<2x256xf32>
    %258 = tpu.concatenate %256, %196 in 1 : vector<2x16xf32>, vector<2x16xf32> -> vector<2x32xf32>
    %259 = tpu.concatenate %257, %258 in 1 : vector<2x256xf32>, vector<2x32xf32> -> vector<2x288xf32>
    %c18 = arith.constant 18 : index
    %c0_71 = arith.constant 0 : index
    %260 = vector.load %arg10[%c18, %c0_71] : memref<36x288xf32, #tpu.memory_space<vmem>>, vector<2x288xf32>
    tpu.vector_store %arg10[%c18, %c0_71], %259 {strides = array<i32>} : memref<36x288xf32, #tpu.memory_space<vmem>>, vector<2x288xf32>,
    %c20 = arith.constant 20 : index
    %c0_72 = arith.constant 0 : index
    %261 = vector.load %arg10[%c20, %c0_72] : memref<36x288xf32, #tpu.memory_space<vmem>>, vector<2x288xf32>
    tpu.vector_store %arg10[%c20, %c0_72], %259 {strides = array<i32>} : memref<36x288xf32, #tpu.memory_space<vmem>>, vector<2x288xf32>,
    %262 = vector.extract_strided_slice %193 {offsets = [10, 0], sizes = [2, 16], strides = [1, 1]} : vector<16x128xf32> to vector<2x16xf32>
    %263 = vector.extract_strided_slice %193 {offsets = [10, 16], sizes = [2, 16], strides = [1, 1]} : vector<16x128xf32> to vector<2x16xf32>
    %264 = vector.extract_strided_slice %193 {offsets = [10, 32], sizes = [2, 16], strides = [1, 1]} : vector<16x128xf32> to vector<2x16xf32>
    %265 = vector.extract_strided_slice %193 {offsets = [10, 48], sizes = [2, 16], strides = [1, 1]} : vector<16x128xf32> to vector<2x16xf32>
    %266 = vector.extract_strided_slice %193 {offsets = [10, 64], sizes = [2, 16], strides = [1, 1]} : vector<16x128xf32> to vector<2x16xf32>
    %267 = vector.extract_strided_slice %193 {offsets = [10, 80], sizes = [2, 16], strides = [1, 1]} : vector<16x128xf32> to vector<2x16xf32>
    %268 = vector.extract_strided_slice %193 {offsets = [10, 96], sizes = [2, 16], strides = [1, 1]} : vector<16x128xf32> to vector<2x16xf32>
    %269 = vector.extract_strided_slice %193 {offsets = [10, 112], sizes = [2, 16], strides = [1, 1]} : vector<16x128xf32> to vector<2x16xf32>
    %270 = tpu.concatenate %196, %262, %262, %263, %263, %264, %264, %265, %265, %266, %266, %267, %267, %268, %268, %269 in 1 : vector<2x16xf32>, vector<2x16xf32>, vector<2x16xf32>, vector<2x16xf32>, vector<2x16xf32>, vector<2x16xf32>, vector<2x16xf32>, vector<2x16xf32>, vector<2x16xf32>, vector<2x16xf32>, vector<2x16xf32>, vector<2x16xf32>, vector<2x16xf32>, vector<2x16xf32>, vector<2x16xf32>, vector<2x16xf32> -> vector<2x256xf32>
    %271 = tpu.concatenate %269, %196 in 1 : vector<2x16xf32>, vector<2x16xf32> -> vector<2x32xf32>
    %272 = tpu.concatenate %270, %271 in 1 : vector<2x256xf32>, vector<2x32xf32> -> vector<2x288xf32>
    %c22 = arith.constant 22 : index
    %c0_73 = arith.constant 0 : index
    %273 = vector.load %arg10[%c22, %c0_73] : memref<36x288xf32, #tpu.memory_space<vmem>>, vector<2x288xf32>
    tpu.vector_store %arg10[%c22, %c0_73], %272 {strides = array<i32>} : memref<36x288xf32, #tpu.memory_space<vmem>>, vector<2x288xf32>,
    %c24 = arith.constant 24 : index
    %c0_74 = arith.constant 0 : index
    %274 = vector.load %arg10[%c24, %c0_74] : memref<36x288xf32, #tpu.memory_space<vmem>>, vector<2x288xf32>
    tpu.vector_store %arg10[%c24, %c0_74], %272 {strides = array<i32>} : memref<36x288xf32, #tpu.memory_space<vmem>>, vector<2x288xf32>,
    %275 = vector.extract_strided_slice %193 {offsets = [12, 0], sizes = [2, 16], strides = [1, 1]} : vector<16x128xf32> to vector<2x16xf32>
    %276 = vector.extract_strided_slice %193 {offsets = [12, 16], sizes = [2, 16], strides = [1, 1]} : vector<16x128xf32> to vector<2x16xf32>
    %277 = vector.extract_strided_slice %193 {offsets = [12, 32], sizes = [2, 16], strides = [1, 1]} : vector<16x128xf32> to vector<2x16xf32>
    %278 = vector.extract_strided_slice %193 {offsets = [12, 48], sizes = [2, 16], strides = [1, 1]} : vector<16x128xf32> to vector<2x16xf32>
    %279 = vector.extract_strided_slice %193 {offsets = [12, 64], sizes = [2, 16], strides = [1, 1]} : vector<16x128xf32> to vector<2x16xf32>
    %280 = vector.extract_strided_slice %193 {offsets = [12, 80], sizes = [2, 16], strides = [1, 1]} : vector<16x128xf32> to vector<2x16xf32>
    %281 = vector.extract_strided_slice %193 {offsets = [12, 96], sizes = [2, 16], strides = [1, 1]} : vector<16x128xf32> to vector<2x16xf32>
    %282 = vector.extract_strided_slice %193 {offsets = [12, 112], sizes = [2, 16], strides = [1, 1]} : vector<16x128xf32> to vector<2x16xf32>
    %283 = tpu.concatenate %196, %275, %275, %276, %276, %277, %277, %278, %278, %279, %279, %280, %280, %281, %281, %282 in 1 : vector<2x16xf32>, vector<2x16xf32>, vector<2x16xf32>, vector<2x16xf32>, vector<2x16xf32>, vector<2x16xf32>, vector<2x16xf32>, vector<2x16xf32>, vector<2x16xf32>, vector<2x16xf32>, vector<2x16xf32>, vector<2x16xf32>, vector<2x16xf32>, vector<2x16xf32>, vector<2x16xf32>, vector<2x16xf32> -> vector<2x256xf32>
    %284 = tpu.concatenate %282, %196 in 1 : vector<2x16xf32>, vector<2x16xf32> -> vector<2x32xf32>
    %285 = tpu.concatenate %283, %284 in 1 : vector<2x256xf32>, vector<2x32xf32> -> vector<2x288xf32>
    %c26 = arith.constant 26 : index
    %c0_75 = arith.constant 0 : index
    %286 = vector.load %arg10[%c26, %c0_75] : memref<36x288xf32, #tpu.memory_space<vmem>>, vector<2x288xf32>
    tpu.vector_store %arg10[%c26, %c0_75], %285 {strides = array<i32>} : memref<36x288xf32, #tpu.memory_space<vmem>>, vector<2x288xf32>,
    %c28 = arith.constant 28 : index
    %c0_76 = arith.constant 0 : index
    %287 = vector.load %arg10[%c28, %c0_76] : memref<36x288xf32, #tpu.memory_space<vmem>>, vector<2x288xf32>
    tpu.vector_store %arg10[%c28, %c0_76], %285 {strides = array<i32>} : memref<36x288xf32, #tpu.memory_space<vmem>>, vector<2x288xf32>,
    %288 = vector.extract_strided_slice %193 {offsets = [14, 0], sizes = [2, 16], strides = [1, 1]} : vector<16x128xf32> to vector<2x16xf32>
    %289 = vector.extract_strided_slice %193 {offsets = [14, 16], sizes = [2, 16], strides = [1, 1]} : vector<16x128xf32> to vector<2x16xf32>
    %290 = vector.extract_strided_slice %193 {offsets = [14, 32], sizes = [2, 16], strides = [1, 1]} : vector<16x128xf32> to vector<2x16xf32>
    %291 = vector.extract_strided_slice %193 {offsets = [14, 48], sizes = [2, 16], strides = [1, 1]} : vector<16x128xf32> to vector<2x16xf32>
    %292 = vector.extract_strided_slice %193 {offsets = [14, 64], sizes = [2, 16], strides = [1, 1]} : vector<16x128xf32> to vector<2x16xf32>
    %293 = vector.extract_strided_slice %193 {offsets = [14, 80], sizes = [2, 16], strides = [1, 1]} : vector<16x128xf32> to vector<2x16xf32>
    %294 = vector.extract_strided_slice %193 {offsets = [14, 96], sizes = [2, 16], strides = [1, 1]} : vector<16x128xf32> to vector<2x16xf32>
    %295 = vector.extract_strided_slice %193 {offsets = [14, 112], sizes = [2, 16], strides = [1, 1]} : vector<16x128xf32> to vector<2x16xf32>
    %296 = tpu.concatenate %196, %288, %288, %289, %289, %290, %290, %291, %291, %292, %292, %293, %293, %294, %294, %295 in 1 : vector<2x16xf32>, vector<2x16xf32>, vector<2x16xf32>, vector<2x16xf32>, vector<2x16xf32>, vector<2x16xf32>, vector<2x16xf32>, vector<2x16xf32>, vector<2x16xf32>, vector<2x16xf32>, vector<2x16xf32>, vector<2x16xf32>, vector<2x16xf32>, vector<2x16xf32>, vector<2x16xf32>, vector<2x16xf32> -> vector<2x256xf32>
    %297 = tpu.concatenate %295, %196 in 1 : vector<2x16xf32>, vector<2x16xf32> -> vector<2x32xf32>
    %298 = tpu.concatenate %296, %297 in 1 : vector<2x256xf32>, vector<2x32xf32> -> vector<2x288xf32>
    %c30 = arith.constant 30 : index
    %c0_77 = arith.constant 0 : index
    %299 = vector.load %arg10[%c30, %c0_77] : memref<36x288xf32, #tpu.memory_space<vmem>>, vector<2x288xf32>
    tpu.vector_store %arg10[%c30, %c0_77], %298 {strides = array<i32>} : memref<36x288xf32, #tpu.memory_space<vmem>>, vector<2x288xf32>,
    %c32 = arith.constant 32 : index
    %c0_78 = arith.constant 0 : index
    %300 = vector.load %arg10[%c32, %c0_78] : memref<36x288xf32, #tpu.memory_space<vmem>>, vector<2x288xf32>
    tpu.vector_store %arg10[%c32, %c0_78], %298 {strides = array<i32>} : memref<36x288xf32, #tpu.memory_space<vmem>>, vector<2x288xf32>,
    %c0_79 = arith.constant 0 : index
    %c0_80 = arith.constant 0 : index
    %301 = vector.load %arg10[%c0_79, %c0_80] : memref<36x288xf32, #tpu.memory_space<vmem>>, vector<36x288xf32>
    %302 = arith.truncf %301 : vector<36x288xf32> to vector<36x288xbf16>
    %303 = vector.extract_strided_slice %302 {offsets = [0, 0], sizes = [32, 288], strides = [1, 1]} : vector<36x288xbf16> to vector<32x288xbf16>
    %c0_81 = arith.constant 0 : index
    %c0_82 = arith.constant 0 : index
    %c0_83 = arith.constant 0 : index
    %304 = vector.load %arg6[%c0_81, %c0_82, %c0_83] : memref<3x288x256xbf16, #tpu.memory_space<vmem>>, vector<1x288x256xbf16>
    %305 = vector.shape_cast %304 : vector<1x288x256xbf16> to vector<288x256xbf16>
    %cst_84 = arith.constant dense<0.000000e+00> : vector<32x256xf32>
    %306 = tpu.matmul %303, %305, %cst_84 {dimension_numbers = #tpu.dot_dimension_numbers<[1], [0], [0], [1], [0, 0, 1, 1], [], []>} : vector<32x288xbf16>, vector<288x256xbf16>, vector<32x256xf32> -> vector<32x256xf32>
    %307 = vector.extract_strided_slice %302 {offsets = [2, 0], sizes = [32, 288], strides = [1, 1]} : vector<36x288xbf16> to vector<32x288xbf16>
    %c1_85 = arith.constant 1 : index
    %c0_86 = arith.constant 0 : index
    %c0_87 = arith.constant 0 : index
    %308 = vector.load %arg6[%c1_85, %c0_86, %c0_87] : memref<3x288x256xbf16, #tpu.memory_space<vmem>>, vector<1x288x256xbf16>
    %309 = vector.shape_cast %308 : vector<1x288x256xbf16> to vector<288x256xbf16>
    %cst_88 = arith.constant dense<0.000000e+00> : vector<32x256xf32>
    %310 = tpu.matmul %307, %309, %cst_88 {dimension_numbers = #tpu.dot_dimension_numbers<[1], [0], [0], [1], [0, 0, 1, 1], [], []>} : vector<32x288xbf16>, vector<288x256xbf16>, vector<32x256xf32> -> vector<32x256xf32>
    %311 = arith.addf %306, %310 : vector<32x256xf32>
    %312 = vector.extract_strided_slice %302 {offsets = [4, 0], sizes = [32, 288], strides = [1, 1]} : vector<36x288xbf16> to vector<32x288xbf16>
    %c2_89 = arith.constant 2 : index
    %c0_90 = arith.constant 0 : index
    %c0_91 = arith.constant 0 : index
    %313 = vector.load %arg6[%c2_89, %c0_90, %c0_91] : memref<3x288x256xbf16, #tpu.memory_space<vmem>>, vector<1x288x256xbf16>
    %314 = vector.shape_cast %313 : vector<1x288x256xbf16> to vector<288x256xbf16>
    %cst_92 = arith.constant dense<0.000000e+00> : vector<32x256xf32>
    %315 = tpu.matmul %312, %314, %cst_92 {dimension_numbers = #tpu.dot_dimension_numbers<[1], [0], [0], [1], [0, 0, 1, 1], [], []>} : vector<32x288xbf16>, vector<288x256xbf16>, vector<32x256xf32> -> vector<32x256xf32>
    %316 = arith.addf %311, %315 : vector<32x256xf32>
    %c0_93 = arith.constant 0 : index
    %c0_94 = arith.constant 0 : index
    %317 = vector.load %arg7[%c0_93, %c0_94] : memref<2x16xf32, #tpu.memory_space<vmem>>, vector<2x16xf32>
    %cst_95 = arith.constant dense<0.000000e+00> : vector<256xf32>
    %318 = vector.multi_reduction <add>, %316, %cst_95 [0] : vector<32x256xf32> to vector<256xf32>
    %319 = vector.shape_cast %318 : vector<256xf32> to vector<1x256xf32>
    %320 = vector.extract_strided_slice %319 {offsets = [0, 0], sizes = [1, 8], strides = [1, 1]} : vector<1x256xf32> to vector<1x8xf32>
    %321 = vector.extract_strided_slice %319 {offsets = [0, 8], sizes = [1, 8], strides = [1, 1]} : vector<1x256xf32> to vector<1x8xf32>
    %322 = arith.addf %320, %321 : vector<1x8xf32>
    %323 = vector.extract_strided_slice %319 {offsets = [0, 16], sizes = [1, 8], strides = [1, 1]} : vector<1x256xf32> to vector<1x8xf32>
    %324 = arith.addf %322, %323 : vector<1x8xf32>
    %325 = vector.extract_strided_slice %319 {offsets = [0, 24], sizes = [1, 8], strides = [1, 1]} : vector<1x256xf32> to vector<1x8xf32>
    %326 = arith.addf %324, %325 : vector<1x8xf32>
    %327 = vector.extract_strided_slice %319 {offsets = [0, 32], sizes = [1, 8], strides = [1, 1]} : vector<1x256xf32> to vector<1x8xf32>
    %328 = arith.addf %326, %327 : vector<1x8xf32>
    %329 = vector.extract_strided_slice %319 {offsets = [0, 40], sizes = [1, 8], strides = [1, 1]} : vector<1x256xf32> to vector<1x8xf32>
    %330 = arith.addf %328, %329 : vector<1x8xf32>
    %331 = vector.extract_strided_slice %319 {offsets = [0, 48], sizes = [1, 8], strides = [1, 1]} : vector<1x256xf32> to vector<1x8xf32>
    %332 = arith.addf %330, %331 : vector<1x8xf32>
    %333 = vector.extract_strided_slice %319 {offsets = [0, 56], sizes = [1, 8], strides = [1, 1]} : vector<1x256xf32> to vector<1x8xf32>
    %334 = arith.addf %332, %333 : vector<1x8xf32>
    %335 = vector.extract_strided_slice %319 {offsets = [0, 64], sizes = [1, 8], strides = [1, 1]} : vector<1x256xf32> to vector<1x8xf32>
    %336 = arith.addf %334, %335 : vector<1x8xf32>
    %337 = vector.extract_strided_slice %319 {offsets = [0, 72], sizes = [1, 8], strides = [1, 1]} : vector<1x256xf32> to vector<1x8xf32>
    %338 = arith.addf %336, %337 : vector<1x8xf32>
    %339 = vector.extract_strided_slice %319 {offsets = [0, 80], sizes = [1, 8], strides = [1, 1]} : vector<1x256xf32> to vector<1x8xf32>
    %340 = arith.addf %338, %339 : vector<1x8xf32>
    %341 = vector.extract_strided_slice %319 {offsets = [0, 88], sizes = [1, 8], strides = [1, 1]} : vector<1x256xf32> to vector<1x8xf32>
    %342 = arith.addf %340, %341 : vector<1x8xf32>
    %343 = vector.extract_strided_slice %319 {offsets = [0, 96], sizes = [1, 8], strides = [1, 1]} : vector<1x256xf32> to vector<1x8xf32>
    %344 = arith.addf %342, %343 : vector<1x8xf32>
    %345 = vector.extract_strided_slice %319 {offsets = [0, 104], sizes = [1, 8], strides = [1, 1]} : vector<1x256xf32> to vector<1x8xf32>
    %346 = arith.addf %344, %345 : vector<1x8xf32>
    %347 = vector.extract_strided_slice %319 {offsets = [0, 112], sizes = [1, 8], strides = [1, 1]} : vector<1x256xf32> to vector<1x8xf32>
    %348 = arith.addf %346, %347 : vector<1x8xf32>
    %349 = vector.extract_strided_slice %319 {offsets = [0, 120], sizes = [1, 8], strides = [1, 1]} : vector<1x256xf32> to vector<1x8xf32>
    %350 = arith.addf %348, %349 : vector<1x8xf32>
    %cst_96 = arith.constant 5.120000e+02 : f32
    %351 = vector.broadcast %cst_96 : f32 to vector<1x8xf32>
    %352 = arith.divf %350, %351 : vector<1x8xf32>
    %353 = vector.extract_strided_slice %319 {offsets = [0, 128], sizes = [1, 8], strides = [1, 1]} : vector<1x256xf32> to vector<1x8xf32>
    %354 = vector.extract_strided_slice %319 {offsets = [0, 136], sizes = [1, 8], strides = [1, 1]} : vector<1x256xf32> to vector<1x8xf32>
    %355 = arith.addf %353, %354 : vector<1x8xf32>
    %356 = vector.extract_strided_slice %319 {offsets = [0, 144], sizes = [1, 8], strides = [1, 1]} : vector<1x256xf32> to vector<1x8xf32>
    %357 = arith.addf %355, %356 : vector<1x8xf32>
    %358 = vector.extract_strided_slice %319 {offsets = [0, 152], sizes = [1, 8], strides = [1, 1]} : vector<1x256xf32> to vector<1x8xf32>
    %359 = arith.addf %357, %358 : vector<1x8xf32>
    %360 = vector.extract_strided_slice %319 {offsets = [0, 160], sizes = [1, 8], strides = [1, 1]} : vector<1x256xf32> to vector<1x8xf32>
    %361 = arith.addf %359, %360 : vector<1x8xf32>
    %362 = vector.extract_strided_slice %319 {offsets = [0, 168], sizes = [1, 8], strides = [1, 1]} : vector<1x256xf32> to vector<1x8xf32>
    %363 = arith.addf %361, %362 : vector<1x8xf32>
    %364 = vector.extract_strided_slice %319 {offsets = [0, 176], sizes = [1, 8], strides = [1, 1]} : vector<1x256xf32> to vector<1x8xf32>
    %365 = arith.addf %363, %364 : vector<1x8xf32>
    %366 = vector.extract_strided_slice %319 {offsets = [0, 184], sizes = [1, 8], strides = [1, 1]} : vector<1x256xf32> to vector<1x8xf32>
    %367 = arith.addf %365, %366 : vector<1x8xf32>
    %368 = vector.extract_strided_slice %319 {offsets = [0, 192], sizes = [1, 8], strides = [1, 1]} : vector<1x256xf32> to vector<1x8xf32>
    %369 = arith.addf %367, %368 : vector<1x8xf32>
    %370 = vector.extract_strided_slice %319 {offsets = [0, 200], sizes = [1, 8], strides = [1, 1]} : vector<1x256xf32> to vector<1x8xf32>
    %371 = arith.addf %369, %370 : vector<1x8xf32>
    %372 = vector.extract_strided_slice %319 {offsets = [0, 208], sizes = [1, 8], strides = [1, 1]} : vector<1x256xf32> to vector<1x8xf32>
    %373 = arith.addf %371, %372 : vector<1x8xf32>
    %374 = vector.extract_strided_slice %319 {offsets = [0, 216], sizes = [1, 8], strides = [1, 1]} : vector<1x256xf32> to vector<1x8xf32>
    %375 = arith.addf %373, %374 : vector<1x8xf32>
    %376 = vector.extract_strided_slice %319 {offsets = [0, 224], sizes = [1, 8], strides = [1, 1]} : vector<1x256xf32> to vector<1x8xf32>
    %377 = arith.addf %375, %376 : vector<1x8xf32>
    %378 = vector.extract_strided_slice %319 {offsets = [0, 232], sizes = [1, 8], strides = [1, 1]} : vector<1x256xf32> to vector<1x8xf32>
    %379 = arith.addf %377, %378 : vector<1x8xf32>
    %380 = vector.extract_strided_slice %319 {offsets = [0, 240], sizes = [1, 8], strides = [1, 1]} : vector<1x256xf32> to vector<1x8xf32>
    %381 = arith.addf %379, %380 : vector<1x8xf32>
    %382 = vector.extract_strided_slice %319 {offsets = [0, 248], sizes = [1, 8], strides = [1, 1]} : vector<1x256xf32> to vector<1x8xf32>
    %383 = arith.addf %381, %382 : vector<1x8xf32>
    %cst_97 = arith.constant 5.120000e+02 : f32
    %384 = vector.broadcast %cst_97 : f32 to vector<1x8xf32>
    %385 = arith.divf %383, %384 : vector<1x8xf32>
    %386 = tpu.concatenate %352, %352, %352, %352, %352, %352, %352, %352, %352, %352, %352, %352, %352, %352, %352, %352 in 1 : vector<1x8xf32>, vector<1x8xf32>, vector<1x8xf32>, vector<1x8xf32>, vector<1x8xf32>, vector<1x8xf32>, vector<1x8xf32>, vector<1x8xf32>, vector<1x8xf32>, vector<1x8xf32>, vector<1x8xf32>, vector<1x8xf32>, vector<1x8xf32>, vector<1x8xf32>, vector<1x8xf32>, vector<1x8xf32> -> vector<1x128xf32>
    %387 = tpu.concatenate %385, %385, %385, %385, %385, %385, %385, %385, %385, %385, %385, %385, %385, %385, %385, %385 in 1 : vector<1x8xf32>, vector<1x8xf32>, vector<1x8xf32>, vector<1x8xf32>, vector<1x8xf32>, vector<1x8xf32>, vector<1x8xf32>, vector<1x8xf32>, vector<1x8xf32>, vector<1x8xf32>, vector<1x8xf32>, vector<1x8xf32>, vector<1x8xf32>, vector<1x8xf32>, vector<1x8xf32>, vector<1x8xf32> -> vector<1x128xf32>
    %388 = tpu.concatenate %386, %387 in 1 : vector<1x128xf32>, vector<1x128xf32> -> vector<1x256xf32>
    %389 = vector.broadcast %388 : vector<1x256xf32> to vector<32x256xf32>
    %390 = arith.subf %316, %389 : vector<32x256xf32>
    %391 = arith.mulf %390, %390 : vector<32x256xf32>
    %cst_98 = arith.constant dense<0.000000e+00> : vector<256xf32>
    %392 = vector.multi_reduction <add>, %391, %cst_98 [0] : vector<32x256xf32> to vector<256xf32>
    %393 = vector.shape_cast %392 : vector<256xf32> to vector<1x256xf32>
    %394 = vector.extract_strided_slice %393 {offsets = [0, 0], sizes = [1, 8], strides = [1, 1]} : vector<1x256xf32> to vector<1x8xf32>
    %395 = vector.extract_strided_slice %393 {offsets = [0, 8], sizes = [1, 8], strides = [1, 1]} : vector<1x256xf32> to vector<1x8xf32>
    %396 = arith.addf %394, %395 : vector<1x8xf32>
    %397 = vector.extract_strided_slice %393 {offsets = [0, 16], sizes = [1, 8], strides = [1, 1]} : vector<1x256xf32> to vector<1x8xf32>
    %398 = arith.addf %396, %397 : vector<1x8xf32>
    %399 = vector.extract_strided_slice %393 {offsets = [0, 24], sizes = [1, 8], strides = [1, 1]} : vector<1x256xf32> to vector<1x8xf32>
    %400 = arith.addf %398, %399 : vector<1x8xf32>
    %401 = vector.extract_strided_slice %393 {offsets = [0, 32], sizes = [1, 8], strides = [1, 1]} : vector<1x256xf32> to vector<1x8xf32>
    %402 = arith.addf %400, %401 : vector<1x8xf32>
    %403 = vector.extract_strided_slice %393 {offsets = [0, 40], sizes = [1, 8], strides = [1, 1]} : vector<1x256xf32> to vector<1x8xf32>
    %404 = arith.addf %402, %403 : vector<1x8xf32>
    %405 = vector.extract_strided_slice %393 {offsets = [0, 48], sizes = [1, 8], strides = [1, 1]} : vector<1x256xf32> to vector<1x8xf32>
    %406 = arith.addf %404, %405 : vector<1x8xf32>
    %407 = vector.extract_strided_slice %393 {offsets = [0, 56], sizes = [1, 8], strides = [1, 1]} : vector<1x256xf32> to vector<1x8xf32>
    %408 = arith.addf %406, %407 : vector<1x8xf32>
    %409 = vector.extract_strided_slice %393 {offsets = [0, 64], sizes = [1, 8], strides = [1, 1]} : vector<1x256xf32> to vector<1x8xf32>
    %410 = arith.addf %408, %409 : vector<1x8xf32>
    %411 = vector.extract_strided_slice %393 {offsets = [0, 72], sizes = [1, 8], strides = [1, 1]} : vector<1x256xf32> to vector<1x8xf32>
    %412 = arith.addf %410, %411 : vector<1x8xf32>
    %413 = vector.extract_strided_slice %393 {offsets = [0, 80], sizes = [1, 8], strides = [1, 1]} : vector<1x256xf32> to vector<1x8xf32>
    %414 = arith.addf %412, %413 : vector<1x8xf32>
    %415 = vector.extract_strided_slice %393 {offsets = [0, 88], sizes = [1, 8], strides = [1, 1]} : vector<1x256xf32> to vector<1x8xf32>
    %416 = arith.addf %414, %415 : vector<1x8xf32>
    %417 = vector.extract_strided_slice %393 {offsets = [0, 96], sizes = [1, 8], strides = [1, 1]} : vector<1x256xf32> to vector<1x8xf32>
    %418 = arith.addf %416, %417 : vector<1x8xf32>
    %419 = vector.extract_strided_slice %393 {offsets = [0, 104], sizes = [1, 8], strides = [1, 1]} : vector<1x256xf32> to vector<1x8xf32>
    %420 = arith.addf %418, %419 : vector<1x8xf32>
    %421 = vector.extract_strided_slice %393 {offsets = [0, 112], sizes = [1, 8], strides = [1, 1]} : vector<1x256xf32> to vector<1x8xf32>
    %422 = arith.addf %420, %421 : vector<1x8xf32>
    %423 = vector.extract_strided_slice %393 {offsets = [0, 120], sizes = [1, 8], strides = [1, 1]} : vector<1x256xf32> to vector<1x8xf32>
    %424 = arith.addf %422, %423 : vector<1x8xf32>
    %cst_99 = arith.constant 5.120000e+02 : f32
    %425 = vector.broadcast %cst_99 : f32 to vector<1x8xf32>
    %426 = arith.divf %424, %425 : vector<1x8xf32>
    %427 = vector.extract_strided_slice %393 {offsets = [0, 128], sizes = [1, 8], strides = [1, 1]} : vector<1x256xf32> to vector<1x8xf32>
    %428 = vector.extract_strided_slice %393 {offsets = [0, 136], sizes = [1, 8], strides = [1, 1]} : vector<1x256xf32> to vector<1x8xf32>
    %429 = arith.addf %427, %428 : vector<1x8xf32>
    %430 = vector.extract_strided_slice %393 {offsets = [0, 144], sizes = [1, 8], strides = [1, 1]} : vector<1x256xf32> to vector<1x8xf32>
    %431 = arith.addf %429, %430 : vector<1x8xf32>
    %432 = vector.extract_strided_slice %393 {offsets = [0, 152], sizes = [1, 8], strides = [1, 1]} : vector<1x256xf32> to vector<1x8xf32>
    %433 = arith.addf %431, %432 : vector<1x8xf32>
    %434 = vector.extract_strided_slice %393 {offsets = [0, 160], sizes = [1, 8], strides = [1, 1]} : vector<1x256xf32> to vector<1x8xf32>
    %435 = arith.addf %433, %434 : vector<1x8xf32>
    %436 = vector.extract_strided_slice %393 {offsets = [0, 168], sizes = [1, 8], strides = [1, 1]} : vector<1x256xf32> to vector<1x8xf32>
    %437 = arith.addf %435, %436 : vector<1x8xf32>
    %438 = vector.extract_strided_slice %393 {offsets = [0, 176], sizes = [1, 8], strides = [1, 1]} : vector<1x256xf32> to vector<1x8xf32>
    %439 = arith.addf %437, %438 : vector<1x8xf32>
    %440 = vector.extract_strided_slice %393 {offsets = [0, 184], sizes = [1, 8], strides = [1, 1]} : vector<1x256xf32> to vector<1x8xf32>
    %441 = arith.addf %439, %440 : vector<1x8xf32>
    %442 = vector.extract_strided_slice %393 {offsets = [0, 192], sizes = [1, 8], strides = [1, 1]} : vector<1x256xf32> to vector<1x8xf32>
    %443 = arith.addf %441, %442 : vector<1x8xf32>
    %444 = vector.extract_strided_slice %393 {offsets = [0, 200], sizes = [1, 8], strides = [1, 1]} : vector<1x256xf32> to vector<1x8xf32>
    %445 = arith.addf %443, %444 : vector<1x8xf32>
    %446 = vector.extract_strided_slice %393 {offsets = [0, 208], sizes = [1, 8], strides = [1, 1]} : vector<1x256xf32> to vector<1x8xf32>
    %447 = arith.addf %445, %446 : vector<1x8xf32>
    %448 = vector.extract_strided_slice %393 {offsets = [0, 216], sizes = [1, 8], strides = [1, 1]} : vector<1x256xf32> to vector<1x8xf32>
    %449 = arith.addf %447, %448 : vector<1x8xf32>
    %450 = vector.extract_strided_slice %393 {offsets = [0, 224], sizes = [1, 8], strides = [1, 1]} : vector<1x256xf32> to vector<1x8xf32>
    %451 = arith.addf %449, %450 : vector<1x8xf32>
    %452 = vector.extract_strided_slice %393 {offsets = [0, 232], sizes = [1, 8], strides = [1, 1]} : vector<1x256xf32> to vector<1x8xf32>
    %453 = arith.addf %451, %452 : vector<1x8xf32>
    %454 = vector.extract_strided_slice %393 {offsets = [0, 240], sizes = [1, 8], strides = [1, 1]} : vector<1x256xf32> to vector<1x8xf32>
    %455 = arith.addf %453, %454 : vector<1x8xf32>
    %456 = vector.extract_strided_slice %393 {offsets = [0, 248], sizes = [1, 8], strides = [1, 1]} : vector<1x256xf32> to vector<1x8xf32>
    %457 = arith.addf %455, %456 : vector<1x8xf32>
    %cst_100 = arith.constant 5.120000e+02 : f32
    %458 = vector.broadcast %cst_100 : f32 to vector<1x8xf32>
    %459 = arith.divf %457, %458 : vector<1x8xf32>
    %460 = vector.extract_strided_slice %317 {offsets = [0, 0], sizes = [1, 8], strides = [1, 1]} : vector<2x16xf32> to vector<1x8xf32>
    %cst_101 = arith.constant 9.99999974E-6 : f32
    %461 = vector.broadcast %cst_101 : f32 to vector<1x8xf32>
    %462 = arith.addf %426, %461 : vector<1x8xf32>
    %463 = math.rsqrt %462 : vector<1x8xf32>
    %464 = arith.mulf %460, %463 : vector<1x8xf32>
    %465 = vector.extract_strided_slice %317 {offsets = [0, 8], sizes = [1, 8], strides = [1, 1]} : vector<2x16xf32> to vector<1x8xf32>
    %cst_102 = arith.constant 9.99999974E-6 : f32
    %466 = vector.broadcast %cst_102 : f32 to vector<1x8xf32>
    %467 = arith.addf %459, %466 : vector<1x8xf32>
    %468 = math.rsqrt %467 : vector<1x8xf32>
    %469 = arith.mulf %465, %468 : vector<1x8xf32>
    %470 = tpu.concatenate %464, %464, %464, %464, %464, %464, %464, %464, %464, %464, %464, %464, %464, %464, %464, %464 in 1 : vector<1x8xf32>, vector<1x8xf32>, vector<1x8xf32>, vector<1x8xf32>, vector<1x8xf32>, vector<1x8xf32>, vector<1x8xf32>, vector<1x8xf32>, vector<1x8xf32>, vector<1x8xf32>, vector<1x8xf32>, vector<1x8xf32>, vector<1x8xf32>, vector<1x8xf32>, vector<1x8xf32>, vector<1x8xf32> -> vector<1x128xf32>
    %471 = tpu.concatenate %469, %469, %469, %469, %469, %469, %469, %469, %469, %469, %469, %469, %469, %469, %469, %469 in 1 : vector<1x8xf32>, vector<1x8xf32>, vector<1x8xf32>, vector<1x8xf32>, vector<1x8xf32>, vector<1x8xf32>, vector<1x8xf32>, vector<1x8xf32>, vector<1x8xf32>, vector<1x8xf32>, vector<1x8xf32>, vector<1x8xf32>, vector<1x8xf32>, vector<1x8xf32>, vector<1x8xf32>, vector<1x8xf32> -> vector<1x128xf32>
    %472 = tpu.concatenate %470, %471 in 1 : vector<1x128xf32>, vector<1x128xf32> -> vector<1x256xf32>
    %473 = vector.broadcast %472 : vector<1x256xf32> to vector<32x256xf32>
    %474 = arith.mulf %390, %473 : vector<32x256xf32>
    %475 = vector.extract_strided_slice %317 {offsets = [1, 0], sizes = [1, 8], strides = [1, 1]} : vector<2x16xf32> to vector<1x8xf32>
    %476 = vector.extract_strided_slice %317 {offsets = [1, 8], sizes = [1, 8], strides = [1, 1]} : vector<2x16xf32> to vector<1x8xf32>
    %477 = tpu.concatenate %475, %475, %475, %475, %475, %475, %475, %475, %475, %475, %475, %475, %475, %475, %475, %475 in 1 : vector<1x8xf32>, vector<1x8xf32>, vector<1x8xf32>, vector<1x8xf32>, vector<1x8xf32>, vector<1x8xf32>, vector<1x8xf32>, vector<1x8xf32>, vector<1x8xf32>, vector<1x8xf32>, vector<1x8xf32>, vector<1x8xf32>, vector<1x8xf32>, vector<1x8xf32>, vector<1x8xf32>, vector<1x8xf32> -> vector<1x128xf32>
    %478 = tpu.concatenate %476, %476, %476, %476, %476, %476, %476, %476, %476, %476, %476, %476, %476, %476, %476, %476 in 1 : vector<1x8xf32>, vector<1x8xf32>, vector<1x8xf32>, vector<1x8xf32>, vector<1x8xf32>, vector<1x8xf32>, vector<1x8xf32>, vector<1x8xf32>, vector<1x8xf32>, vector<1x8xf32>, vector<1x8xf32>, vector<1x8xf32>, vector<1x8xf32>, vector<1x8xf32>, vector<1x8xf32>, vector<1x8xf32> -> vector<1x128xf32>
    %479 = tpu.concatenate %477, %478 in 1 : vector<1x128xf32>, vector<1x128xf32> -> vector<1x256xf32>
    %480 = vector.broadcast %479 : vector<1x256xf32> to vector<32x256xf32>
    %481 = arith.addf %474, %480 : vector<32x256xf32>
    %482 = vector.extract_strided_slice %481 {offsets = [0, 0], sizes = [32, 128], strides = [1, 1]} : vector<32x256xf32> to vector<32x128xf32>
    %483 = vector.extract_strided_slice %481 {offsets = [0, 128], sizes = [32, 128], strides = [1, 1]} : vector<32x256xf32> to vector<32x128xf32>
    %cst_103 = arith.constant 5.000000e-01 : f32
    %484 = vector.broadcast %cst_103 : f32 to vector<32x128xf32>
    %485 = arith.mulf %484, %483 : vector<32x128xf32>
    %486 = math.tanh %485 : vector<32x128xf32>
    %cst_104 = arith.constant 1.000000e+00 : f32
    %487 = vector.broadcast %cst_104 : f32 to vector<32x128xf32>
    %488 = arith.addf %486, %487 : vector<32x128xf32>
    %cst_105 = arith.constant 5.000000e-01 : f32
    %489 = vector.broadcast %cst_105 : f32 to vector<32x128xf32>
    %490 = arith.mulf %489, %488 : vector<32x128xf32>
    %491 = arith.mulf %482, %490 : vector<32x128xf32>
    %c0_106 = arith.constant 0 : index
    %c0_107 = arith.constant 0 : index
    %492 = vector.load %arg8[%c0_106, %c0_107] : memref<32x128xf32, #tpu.memory_space<vmem>>, vector<32x128xf32>
    tpu.vector_store %arg8[%c0_106, %c0_107], %491 {strides = array<i32>} : memref<32x128xf32, #tpu.memory_space<vmem>>, vector<32x128xf32>,
    return
  }
  func.func @transform_0(%arg0: i32) -> (i32, i32) {
    %c0_i32 = arith.constant 0 : i32
    %c0_i32_0 = arith.constant 0 : i32
    %c0_i32_1 = arith.constant 0 : i32
    return %c0_i32, %c0_i32_0 : i32, i32
  }
  func.func @transform_1(%arg0: i32) -> (i32, i32) {
    %c0_i32 = arith.constant 0 : i32
    %c0_i32_0 = arith.constant 0 : i32
    %c0_i32_1 = arith.constant 0 : i32
    return %c0_i32, %c0_i32_0 : i32, i32
  }
  func.func @transform_2(%arg0: i32) -> (i32, i32) {
    %c0_i32 = arith.constant 0 : i32
    %c0_i32_0 = arith.constant 0 : i32
    %c0_i32_1 = arith.constant 0 : i32
    return %c0_i32, %c0_i32_0 : i32, i32
  }
  func.func @transform_3(%arg0: i32) -> (i32, i32, i32) {
    %c0_i32 = arith.constant 0 : i32
    %c0_i32_0 = arith.constant 0 : i32
    %c0_i32_1 = arith.constant 0 : i32
    %c0_i32_2 = arith.constant 0 : i32
    return %c0_i32, %c0_i32_0, %c0_i32_1 : i32, i32, i32
  }
  func.func @transform_4(%arg0: i32) -> (i32, i32) {
    %c0_i32 = arith.constant 0 : i32
    %c0_i32_0 = arith.constant 0 : i32
    %c0_i32_1 = arith.constant 0 : i32
    return %c0_i32, %c0_i32_0 : i32, i32
  }
  func.func @transform_5(%arg0: i32) -> (i32, i32, i32) {
    %c0_i32 = arith.constant 0 : i32
    %c0_i32_0 = arith.constant 0 : i32
    %c0_i32_1 = arith.constant 0 : i32
    %c0_i32_2 = arith.constant 0 : i32
    return %c0_i32, %c0_i32_0, %c0_i32_1 : i32, i32, i32
  }
  func.func @transform_6(%arg0: i32) -> (i32, i32) {
    %c0_i32 = arith.constant 0 : i32
    %c0_i32_0 = arith.constant 0 : i32
    %c0_i32_1 = arith.constant 0 : i32
    return %c0_i32, %c0_i32_0 : i32, i32
  }
  func.func @transform_7(%arg0: i32) -> (i32, i32) {
    %c0_i32 = arith.constant 0 : i32
    %c0_i32_0 = arith.constant 0 : i32
    %c0_i32_1 = arith.constant 0 : i32
    return %c0_i32, %c0_i32_0 : i32, i32
  }
}

</mosaic_0001>

<bundles_post_ra>
// kernel: init_stage_g_forward.1
= control target key start
LH: loop header
LB: loop body
LE: loop exit
PB: predicated region body
PF: predicated region fallthrough
CT: control target
= control target key end

     0   :  { %12 = vsyncpa [#allocation5], 0  ;;  %s6908_s0 = inlined_call_operand.vmem [shape: f32[2,80], index: 0, kind: input, shape index: {}]   ;;  %s6909_s1 = inlined_call_operand.hbm [shape: bf16[80,1024], index: 1, kind: input, shape index: {}]   ;;  %s6910_s2 = inlined_call_operand.hbm [shape: f32[2,1024], index: 2, kind: input, shape index: {}]   ;;  %s6911_s3 = inlined_call_operand.hbm [shape: bf16[3,320,256], index: 3, kind: input, shape index: {}]   ;;  %s6912_s4 = inlined_call_operand.vmem [shape: f32[2,32], index: 4, kind: input, shape index: {}]   ;;  %s6913_s5 = inlined_call_operand.hbm [shape: bf16[3,288,256], index: 5, kind: input, shape index: {}]   ;;  %s6914_s6 = inlined_call_operand.vmem [shape: f32[2,16], index: 6, kind: input, shape index: {}]   ;;  %s6915_s7 = inlined_call_operand.vmem [shape: f32[32,128], index: 7, kind: output, shape index: {}]  }
   0x1   :  { %13 = vsyncpa [#allocation7], 0 }
   0x2   :  { %14 = vsyncpa [#allocation10], 0  ;;  %s5512_s24 = smov [#allocation6]   ;;  %s5513_s26 = smov [#allocation4]  }
   0x3   :  { %s35_s25 = sshll.u32 %s5512_s24, 4  ;;  %s22_s27 = sshll.u32 %s5513_s26, 4  ;;  %s36_s25 = int_to_ptr.vmem [resolvable:$true] %s35_s25  ;;  %s5576_s27 = int_to_ptr.vmem [resolvable:$true] %s22_s27 }
   0x4   :  { %s5418_s30 = scalar_lea.hbm %s6910_s2, 256 }
   0x5   :  { %p5419_p0 = scmp.ne.s32.totalorder %s6910_s2, %s5418_s30  ;;  %p5422_p1 = scmp.lt.u32.totalorder %s5418_s30, %s6910_s2 }
   0x7   :  { %p5424_p2 = pnand %p5422_p1, %p5419_p0 }
   0x9   :  { %5427 = shalt.err (!%p5424_p2)
}
   0xa   :  { %s5428_s12 = scalar_lea.vmem %s36_s25, 256  ;;  %p5433_p4 = scmp.lt.s32.totalorder %s36_s25, %s36_s25 }
   0xb   :  { %p5429_p3 = scmp.ne.s32.totalorder %s36_s25, %s5428_s12  ;;  %p5434_p5 = scmp.lt.s32.totalorder %s5428_s12, %s5428_s12 }
   0xd   :  { %p5435_p6 = por %p5434_p5, %p5433_p4 }
   0xf   :  { %p5436_p7 = pnand %p5435_p6, %p5429_p3 }
  0x11   :  { %5439 = shalt.err (!%p5436_p7)
}
  0x12   :  { %38 = dma.hbm_to_vmem [thread:$0]  %s6910_s2, 256, %s36_s25, [#allocation7]  }
  0x13   :  { %s5440_s17 = scalar_lea.hbm %s6909_s1, 5120 }
  0x14   :  { %p5441_p8 = scmp.ne.s32.totalorder %s6909_s1, %s5440_s17  ;;  %p5444_p9 = scmp.lt.u32.totalorder %s5440_s17, %s6909_s1 }
  0x16   :  { %p5446_p10 = pnand %p5444_p9, %p5441_p8 }
  0x18   :  { %5449 = shalt.err (!%p5446_p10)
}
  0x19   :  { %s5450_s22 = scalar_lea.vmem %s5576_s27, 5120  ;;  %p5455_p12 = scmp.lt.s32.totalorder %s5576_s27, %s5576_s27 }
  0x1a   :  { %p5451_p11 = scmp.ne.s32.totalorder %s5576_s27, %s5450_s22  ;;  %p5456_p13 = scmp.lt.s32.totalorder %s5450_s22, %s5450_s22 }
  0x1c   :  { %p5457_p0 = por %p5456_p13, %p5455_p12 }
  0x1e   :  { %p5458_p1 = pnand %p5457_p0, %p5451_p11 }
  0x20   :  { %5461 = shalt.err (!%p5458_p1)
}
  0x21   :  { %s5514_s2 = smov 512   ;;  %s5515_s23 = smov 32  }
  0x22   :  { %28 = dma.hbm_to_vmem [thread:$0]  %s6909_s1, 5120, %s5576_s27, [#allocation5], %s5514_s2, %s5514_s2, %s5515_s23  }
  0x23   :  { %s5516_s26 = smov [#allocation8]   ;;  %s5462_s8 = scalar_lea.hbm %s6911_s3, 15360 }
  0x24   :  { %s44_s28 = sshll.u32 %s5516_s26, 4  ;;  %p5463_p2 = scmp.ne.s32.totalorder %s6911_s3, %s5462_s8  ;;  %s45_s28 = int_to_ptr.vmem [resolvable:$true] %s44_s28 }
  0x25   :  { %p5466_p3 = scmp.lt.u32.totalorder %s5462_s8, %s6911_s3 }
  0x27   :  { %p5468_p4 = pnand %p5466_p3, %p5463_p2 }
  0x29   :  { %5471 = shalt.err (!%p5468_p4)
}
  0x2a   :  { %s5472_s13 = scalar_lea.vmem %s45_s28, 15360  ;;  %p5477_p6 = scmp.lt.s32.totalorder %s45_s28, %s45_s28 }
  0x2b   :  { %p5473_p5 = scmp.ne.s32.totalorder %s45_s28, %s5472_s13  ;;  %p5478_p7 = scmp.lt.s32.totalorder %s5472_s13, %s5472_s13 }
  0x2d   :  { %p5479_p8 = por %p5478_p7, %p5477_p6 }
  0x2f   :  { %p5480_p9 = pnand %p5479_p8, %p5473_p5 }
  0x31   :  { %5483 = shalt.err (!%p5480_p9)
}
  0x32   :  { %s5517_s1 = smov 128   ;;  %s5518_s27 = smov 8  }
  0x33   :  { %50 = dma.hbm_to_vmem [thread:$0]  %s6911_s3, 15360, %s45_s28, [#allocation7], %s5517_s1, %s5517_s1, %s5518_s27  }
  0x34   :  { %s5519_s16 = smov [#allocation9]   ;;  %s5484_s20 = scalar_lea.hbm %s6913_s5, 13824 }
  0x35   :  { %s58_s17 = sshll.u32 %s5519_s16, 4  ;;  %p5485_p10 = scmp.ne.s32.totalorder %s6913_s5, %s5484_s20  ;;  %s59_s17 = int_to_ptr.vmem [resolvable:$true] %s58_s17 }
  0x36   :  { %p5488_p11 = scmp.lt.u32.totalorder %s5484_s20, %s6913_s5 }
  0x38   :  { %p5490_p12 = pnand %p5488_p11, %p5485_p10 }
  0x3a   :  { %5493 = shalt.err (!%p5490_p12)
}
  0x3b   :  { %s5494_s25 = scalar_lea.vmem %s59_s17, 13824  ;;  %p5499_p0 = scmp.lt.s32.totalorder %s59_s17, %s59_s17 }
  0x3c   :  { %p5495_p13 = scmp.ne.s32.totalorder %s59_s17, %s5494_s25  ;;  %p5500_p1 = scmp.lt.s32.totalorder %s5494_s25, %s5494_s25 }
  0x3e   :  { %p5501_p2 = por %p5500_p1, %p5499_p0 }
  0x40   :  { %p5502_p3 = pnand %p5501_p2, %p5495_p13 }
  0x42   :  { %5505 = shalt.err (!%p5502_p3)
}
  0x43   :  { %64 = dma.hbm_to_vmem [thread:$0]  %s6913_s5, 13824, %s59_s17, [#allocation10], %s5517_s1, %s5517_s1, %s5518_s27  }
  0x44   :  { %5506 = dma.done.wait [#allocation5], 5120  }
  0x45   :  { %5507 = vsyncadd [#allocation5], 4294962176 }
  0x46   :  { %5508 = dma.done.wait [#allocation7], 15616  }
  0x47   :  { %5509 = vsyncadd [#allocation7], 4294951680 }
  0x48   :  { %5510 = dma.done.wait [#allocation10], 13824  }
  0x49   :  { %5511 = vsyncadd [#allocation10], 4294953472  ;;  %v5520_v0 = vmov 0   ;;  %v82_v1 = vld [vmem:[#allocation4] sm:$0xff]  ;;  %v83_v3 = vld [vmem:[#allocation4 + $0x8] sm:$0xff]  ;;  %vm322_vm0 = vcmask 654336  }
  0x4a   :  { %358 = vmatprep.mubr.bf16.mxu0 %v5520_v0  ;;  %399 = vmatprep.mubr.bf16.mxu1 %v5520_v0  ;;  %v86_v2 = vld [vmem:[#allocation4 + $0x20] sm:$0xff]  ;;  %v87_v5 = vld [vmem:[#allocation4 + $0x28] sm:$0xff]  ;;  %v84_v36 = vld [vmem:[#allocation4 + $0x10] sm:$0xff]  ;;  %vm492_vm1 = vcmask 1041408   ;;  %vm886_vm2 = vcmask 523264   ;;  %vm905_vm3 = vcmask 261120  }
  0x4b   :  { %v4667_v4 = vcombine.high %v82_v1, %v86_v2  ;;  %v4666_v6 = vcombine.low %v82_v1, %v86_v2  ;;  %v90_v7 = vld [vmem:[#allocation4 + $0x40] sm:$0xff]  ;;  %v4669_v9 = vcombine.high %v83_v3, %v87_v5  ;;  %v4668_v10 = vcombine.low %v83_v3, %v87_v5  ;;  %v91_v12 = vld [vmem:[#allocation4 + $0x48] sm:$0xff]  ;;  %v88_v37 = vld [vmem:[#allocation4 + $0x30] sm:$0xff]  ;;  %s5524_s29 = smov 64   ;;  %s5525_s30 = smov 112  }
  0x4c   :  { %v94_v8 = vld [vmem:[#allocation4 + $0x60] sm:$0xff]  ;;  %v95_v13 = vld [vmem:[#allocation4 + $0x68] sm:$0xff]  ;;  %v85_v40 = vld [vmem:[#allocation4 + $0x18] sm:$0xff]  ;;  %v4671_v48 = vcombine.high %v84_v36, %v88_v37  ;;  %v4670_v53 = vcombine.low %v84_v36, %v88_v37  ;;  %vm893_vm4 = vcmask 519168   ;;  %vm967_vm5 = vcmask 517120   ;;  %s5526_s8 = smov 80  }
  0x4d   :  { %v4675_v11 = vcombine.high %v90_v7, %v94_v8  ;;  %v98_v14 = vld [vmem:[#allocation4 + $0x80] sm:$0xff]  ;;  %326 = vmatprep.subr.bf16.mxu0 %v4667_v4  ;;  %v4677_v15 = vcombine.high %v91_v12, %v95_v13  ;;  %v99_v17 = vld [vmem:[#allocation4 + $0x88] sm:$0xff]  ;;  %367 = vmatprep.subr.bf16.mxu1 %v4669_v9  ;;  %v4674_v19 = vcombine.low %v90_v7, %v94_v8  ;;  %v89_v41 = vld [vmem:[#allocation4 + $0x38] sm:$0xff]  ;;  %vm963_vm6 = vcmask 523270   ;;  %s5527_s9 = smov 48   ;;  %s5528_s10 = smov 16  }
  0x4e   :  { %v102_v16 = vld [vmem:[#allocation4 + $0xa0] sm:$0xff]  ;;  %v103_v18 = vld [vmem:[#allocation4 + $0xa8] sm:$0xff]  ;;  %327 = vmatpush1.bf16.msra.mxu0 %v4666_v6  ;;  %368 = vmatpush1.bf16.msra.mxu1 %v4668_v10  ;;  %v4676_v20 = vcombine.low %v91_v12, %v95_v13  ;;  %v92_v45 = vld [vmem:[#allocation4 + $0x50] sm:$0xff]  ;;  %v4673_v51 = vcombine.high %v85_v40, %v89_v41  ;;  %v4672_v56 = vcombine.low %v85_v40, %v89_v41  ;;  %vm924_vm7 = vcmask 519170   ;;  %s5530_s13 = smov 104   ;;  %s5531_s1 = smov 88  }
  0x4f   :  { %328 = vmatprep.subr.bf16.mxu0 %v4675_v11  ;;  %v4683_v21 = vcombine.high %v98_v14, %v102_v16  ;;  %369 = vmatprep.subr.bf16.mxu1 %v4677_v15  ;;  %v4685_v22 = vcombine.high %v99_v17, %v103_v18  ;;  %v106_v23 = vld [vmem:[#allocation4 + $0xc0] sm:$0xff]  ;;  %v107_v25 = vld [vmem:[#allocation4 + $0xc8] sm:$0xff]  ;;  %v4682_v27 = vcombine.low %v98_v14, %v102_v16  ;;  %v96_v46 = vld [vmem:[#allocation4 + $0x70] sm:$0xff]  ;;  %vm934_vm8 = vcmask 521220   ;;  %s5532_s14 = smov 72   ;;  %s5533_s15 = smov 56  }
  0x50   :  { %v110_v24 = vld [vmem:[#allocation4 + $0xe0] sm:$0xff]  ;;  %v111_v26 = vld [vmem:[#allocation4 + $0xe8] sm:$0xff]  ;;  %v4684_v28 = vcombine.low %v99_v17, %v103_v18  ;;  %v93_v49 = vld [vmem:[#allocation4 + $0x58] sm:$0xff]  ;;  %v4679_v57 = vcombine.high %v92_v45, %v96_v46  ;;  %v4678_v61 = vcombine.low %v92_v45, %v96_v46  ;;  %vm908_vm9 = vcmask 785408   ;;  %s5534_s16 = smov 40   ;;  %s5535_s17 = smov 24  }
  0x51   :  { %v4691_v29 = vcombine.high %v106_v23, %v110_v24  ;;  %v4693_v30 = vcombine.high %v107_v25, %v111_v26  ;;  %v114_v31 = vld [vmem:[#allocation4 + $0x100] sm:$0xff]  ;;  %v115_v33 = vld [vmem:[#allocation4 + $0x108] sm:$0xff]  ;;  %v4690_v35 = vcombine.low %v106_v23, %v110_v24  ;;  %v4692_v38 = vcombine.low %v107_v25, %v111_v26  ;;  %v97_v50 = vld [vmem:[#allocation4 + $0x78] sm:$0xff] }
  0x52   :  { %329 = vmatpush1.bf16.msra.mxu0 %v4674_v19  ;;  %370 = vmatpush1.bf16.msra.mxu1 %v4676_v20  ;;  %v118_v32 = vld [vmem:[#allocation4 + $0x120] sm:$0xff]  ;;  %v119_v34 = vld [vmem:[#allocation4 + $0x128] sm:$0xff]  ;;  %v100_v54 = vld [vmem:[#allocation4 + $0x90] sm:$0xff]  ;;  %v4681_v60 = vcombine.high %v93_v49, %v97_v50  ;;  %v4680_v1 = vcombine.low %v93_v49, %v97_v50  ;;  %vm1139_vm10 = vcmask 1046528   ;;  %vm1770_vm11 = vcmask 1045504  }
  0x53   :  { %330 = vmatprep.subr.bf16.mxu0 %v4683_v21  ;;  %371 = vmatprep.subr.bf16.mxu1 %v4685_v22  ;;  %v4699_v39 = vcombine.high %v114_v31, %v118_v32  ;;  %v4701_v42 = vcombine.high %v115_v33, %v119_v34  ;;  %v80_v43 = vld [vmem:[%s6908_s0] sm:$0x3]  ;;  %v4698_v44 = vcombine.low %v114_v31, %v118_v32  ;;  %v104_v55 = vld [vmem:[#allocation4 + $0xb0] sm:$0xff]  ;;  %v101_v58 = vld [vmem:[#allocation4 + $0x98] sm:$0xff]  ;;  %s5523_s0 = smov 96   ;;  %vm2173_vm12 = vcmask 130048  }
  0x54   :  { %v4700_v47 = vcombine.low %v115_v33, %v119_v34  ;;  %v81_v52 = vpack.c.bf16 %v80_v43, %v80_v43  ;;  %v105_v59 = vld [vmem:[#allocation4 + $0xb8] sm:$0xff]  ;;  %v108_v62 = vld [vmem:[#allocation4 + $0xd0] sm:$0xff]  ;;  %v4687_v2 = vcombine.high %v100_v54, %v104_v55  ;;  %v4686_v6 = vcombine.low %v100_v54, %v104_v55 }
  0x55   :  { %v112_v63 = vld [vmem:[#allocation4 + $0xf0] sm:$0xff]  ;;  %v109_v3 = vld [vmem:[#allocation4 + $0xd8] sm:$0xff]  ;;  %v4689_v5 = vcombine.high %v101_v58, %v105_v59  ;;  %v4688_v9 = vcombine.low %v101_v58, %v105_v59  ;;  %v5521_v34 = vmov 0.0   ;;  %vm2176_vm13 = vcmask 392192  }
  0x56   :  { %331 = vmatpush1.bf16.msra.mxu0 %v4682_v27  ;;  %372 = vmatpush1.bf16.msra.mxu1 %v4684_v28  ;;  %v113_v4 = vld [vmem:[#allocation4 + $0xf8] sm:$0xff]  ;;  %v116_v7 = vld [vmem:[#allocation4 + $0x110] sm:$0xff]  ;;  %v4695_v10 = vcombine.high %v108_v62, %v112_v63  ;;  %v4694_v14 = vcombine.low %v108_v62, %v112_v63  ;;  %884 = vst [vmem:[#allocation2] sm:$0xff] %v5521_v34  ;;  %885 = vst [vmem:[#allocation2 + $0x8] sm:$0xff] %v5521_v34  ;;  %vm2181_vm14 = vcmask 916480   ;;  %vm2454_vm15 = vcmask 257024  }
  0x57   :  { %332 = vmatprep.subr.bf16.mxu0 %v4691_v29  ;;  %373 = vmatprep.subr.bf16.mxu1 %v4693_v30  ;;  %v120_v8 = vld [vmem:[#allocation4 + $0x130] sm:$0xff]  ;;  %v117_v11 = vld [vmem:[#allocation4 + $0x118] sm:$0xff]  ;;  %v4697_v13 = vcombine.high %v109_v3, %v113_v4  ;;  %v4696_v15 = vcombine.low %v109_v3, %v113_v4  ;;  %888 = vst [vmem:[#allocation2 + $0x18] sm:$0xff] %v5521_v34  ;;  %889 = vst [vmem:[#allocation2 + $0x20] sm:$0xff] %v5521_v34 }
  0x58   :  { %v121_v12 = vld [vmem:[#allocation4 + $0x138] sm:$0xff]  ;;  %v4703_v16 = vcombine.high %v116_v7, %v120_v8  ;;  %v4702_v18 = vcombine.low %v116_v7, %v120_v8  ;;  %891 = vst [vmem:[#allocation2 + $0x30] sm:$0xf] %v5521_v34  ;;  %892 = vst [vmem:[#allocation2 + $0x38] sm:$0xf] %v5521_v34 }
  0x59   :  { %v4705_v17 = vcombine.high %v117_v11, %v121_v12  ;;  %v4704_v19 = vcombine.low %v117_v11, %v121_v12  ;;  %2440 = vst [vmem:[#allocation3] sm:$0xff] %v5521_v34  ;;  %2441 = vst [vmem:[#allocation3 + $0x8] sm:$0xff] %v5521_v34  ;;  %v5039_v50 = vld [vmem:[#allocation8 + $0x164] ss:$8 sps:$4 sm:$0xff]   ;;  %v5040_v4 = vld [vmem:[#allocation8 + $0x170] ss:$8 sps:$4 sm:$0xff]  }
  0x5a   :  { %333 = vmatpush1.bf16.msra.mxu0 %v4690_v35  ;;  %374 = vmatpush1.bf16.msra.mxu1 %v4692_v38  ;;  %2443 = vst [vmem:[#allocation3 + $0x18] sm:$0xff] %v5521_v34  ;;  %2444 = vst [vmem:[#allocation3 + $0x20] sm:$0xff] %v5521_v34  ;;  %v5031_v38 = vld [vmem:[#allocation8 + $0x140] ss:$8 sps:$4 sm:$0xff]   ;;  %v5045_v7 = vld [vmem:[#allocation8 + $0x184] ss:$8 sps:$4 sm:$0xff]  }
  0x5b   :  { %334 = vmatprep.subr.bf16.mxu0 %v4699_v39  ;;  %375 = vmatprep.subr.bf16.mxu1 %v4701_v42  ;;  %2446 = vst [vmem:[#allocation3 + $0x30] sm:$0xff] %v5521_v34  ;;  %2447 = vst [vmem:[#allocation3 + $0x38] sm:$0xff] %v5521_v34  ;;  %v5033_v39 = vld [vmem:[#allocation8 + $0x144] ss:$8 sps:$4 sm:$0xff]   ;;  %v5036_v42 = vld [vmem:[#allocation8 + $0x154] ss:$8 sps:$4 sm:$0xff]  }
  0x5c   :  { %2449 = vst [vmem:[#allocation3 + $0x48] sm:$0xff] %v5521_v34  ;;  %2450 = vst [vmem:[#allocation3 + $0x50] sm:$0xff] %v5521_v34 }
  0x5d   :  { %2452 = vst [vmem:[#allocation3 + $0x60] sm:$0xf] %v5521_v34  ;;  %2453 = vst [vmem:[#allocation3 + $0x68] sm:$0xf] %v5521_v34 }
  0x5e   :  { %335 = vmatpush1.bf16.msra.mxu0 %v4698_v44  ;;  %376 = vmatpush1.bf16.msra.mxu1 %v4700_v47  ;;  %887 = vst.msk [vmem:[#allocation2 + $0x10] sm:$0xff] %vm886_vm2, %v5521_v34  ;;  %890 = vst.msk [vmem:[#allocation2 + $0x28] sm:$0xff] %vm886_vm2, %v5521_v34  ;;  %v5034_v47 = vld [vmem:[#allocation8 + $0x150] ss:$8 sps:$4 sm:$0xff]  }
  0x5f   :  { %408 = vmatprep.subr.bf16.mxu0 %v4671_v48  ;;  %449 = vmatprep.subr.bf16.mxu1 %v4673_v51  ;;  %2442 = vst.msk [vmem:[#allocation3 + $0x10] sm:$0xff] %vm905_vm3, %v5521_v34  ;;  %2445 = vst.msk [vmem:[#allocation3 + $0x28] sm:$0xff] %vm905_vm3, %v5521_v34 }
  0x60   :  { %2448 = vst.msk [vmem:[#allocation3 + $0x40] sm:$0xff] %vm905_vm3, %v5521_v34  ;;  %2451 = vst.msk [vmem:[#allocation3 + $0x58] sm:$0xff] %vm905_vm3, %v5521_v34 }
  0x61   :  { %4706 = vmatmul.mubr.msk.bf16.vlgmr.msra.gmra.mrb[0].mxu0 %vm322_vm0, %v81_v52  ;;  %4707 = vmatmul.mubr.msk.bf16.vlgmr.msra.gmra.mrb[0].mxu1 %vm322_vm0, %v81_v52  ;;  %894 = vst.msk [vmem:[#allocation2 + $0x40] sm:$0xf] %vm893_vm4, %v5521_v34  ;;  %v5072_v34 = vld [vmem:[#allocation8 + $0x214] ss:$8 sps:$4 sm:$0xff]   ;;  %vm2513_vm4 = vcmask 259076  }
  0x62   :  { %409 = vmatpush1.bf16.msra.mxu0 %v4670_v53  ;;  %450 = vmatpush1.bf16.msra.mxu1 %v4672_v56 }
  0x63   :  { %410 = vmatprep.subr.bf16.mxu0 %v4679_v57  ;;  %451 = vmatprep.subr.bf16.mxu1 %v4681_v60  ;;  %v5037_v57 = vld [vmem:[#allocation8 + $0x160] ss:$8 sps:$4 sm:$0xff]   ;;  %v5042_v60 = vld [vmem:[#allocation8 + $0x174] ss:$8 sps:$4 sm:$0xff]  }
  0x64   :  { %440 = vmatprep.mubr.bf16.mxu0 %v5520_v0  ;;  %481 = vmatprep.mubr.bf16.mxu1 %v5520_v0 }
  0x66   :  { %411 = vmatpush1.bf16.msra.mxu0 %v4678_v61  ;;  %452 = vmatpush1.bf16.msra.mxu1 %v4680_v1 }
  0x67   :  { %412 = vmatprep.subr.bf16.mxu0 %v4687_v2  ;;  %453 = vmatprep.subr.bf16.mxu1 %v4689_v5 }
  0x6a   :  { %413 = vmatpush1.bf16.msra.mxu0 %v4686_v6  ;;  %454 = vmatpush1.bf16.msra.mxu1 %v4688_v9 }
  0x6b   :  { %414 = vmatprep.subr.bf16.mxu0 %v4695_v10  ;;  %455 = vmatprep.subr.bf16.mxu1 %v4697_v13 }
  0x6e   :  { %415 = vmatpush1.bf16.msra.mxu0 %v4694_v14  ;;  %456 = vmatpush1.bf16.msra.mxu1 %v4696_v15  ;;  %v5043_v14 = vld [vmem:[#allocation8 + $0x180] ss:$8 sps:$4 sm:$0xff]  }
  0x6f   :  { %416 = vmatprep.subr.bf16.mxu0 %v4703_v16  ;;  %457 = vmatprep.subr.bf16.mxu1 %v4705_v17 }
  0x72   :  { %417 = vmatpush1.bf16.msra.mxu0 %v4702_v18  ;;  %458 = vmatpush1.bf16.msra.mxu1 %v4704_v19  ;;  %v5048_v18 = vld [vmem:[#allocation8 + $0x194] ss:$8 sps:$4 sm:$0xff]  }
  0x73   :  { %1354 = vmatprep.subr.bf16.mxu0 %v5033_v39 }
  0x75   :  { %4708 = vmatmul.mubr.msk.bf16.vlgmr.msra.gmra.mrb[4].mxu0 %vm322_vm0, %v81_v52  ;;  %4709 = vmatmul.mubr.msk.bf16.vlgmr.msra.gmra.mrb[4].mxu1 %vm322_vm0, %v81_v52 }
  0x76   :  { %1355 = vmatpush1.bf16.msra.mxu0 %v5031_v38 }
  0x77   :  { %1356 = vmatprep.subr.bf16.mxu0 %v5036_v42 }
  0x7a   :  { %1357 = vmatpush1.bf16.msra.mxu0 %v5034_v47 }
  0x7b   :  { %1358 = vmatprep.subr.bf16.mxu0 %v5039_v50 }
  0x7e   :  { %1359 = vmatpush1.bf16.msra.mxu0 %v5037_v57  ;;  %v5049_v57 = vld [vmem:[#allocation8 + $0x1a0] ss:$8 sps:$4 sm:$0xff]  }
  0x7f   :  { %1360 = vmatprep.subr.bf16.mxu0 %v5042_v60 }
  0x82   :  { %1361 = vmatpush1.bf16.msra.mxu0 %v5040_v4 }
  0x83   :  { %1362 = vmatprep.subr.bf16.mxu0 %v5045_v7 }
  0x86   :  { %1363 = vmatpush1.bf16.msra.mxu0 %v5043_v14 }
  0x87   :  { %1364 = vmatprep.subr.bf16.mxu0 %v5048_v18 }
 0x134   :  { %v5645_v20 = vpop.f32.mrb[0].mxu0  ;;  %v5649_v22 = vpop.f32.mrb[0].mxu1 }
 0x135   :  { %v493_v21 = vsel %vm492_vm1, %v5645_v20, 0.0  ;;  %v5651_v23 = vpop.f32.mrb[1].mxu0  ;;  %v507_v25 = vsel %vm492_vm1, %v5649_v22, 0.0  ;;  %v5657_v27 = vpop.f32.mrb[1].mxu1 }
 0x136   :  { %v494_v24 = vrot.slane %v493_v21, 4  ;;  %v500_v26 = vsel %vm492_vm1, %v5651_v23, 0.0  ;;  %v364_v28 = vpop.f32.mrb[2].mxu0  ;;  %v508_v29 = vrot.slane %v507_v25, 4  ;;  %v514_v31 = vsel %vm492_vm1, %v5657_v27, 0.0  ;;  %v405_v32 = vpop.f32.mrb[2].mxu1 }
 0x137   :  { %v501_v30 = vrot.slane %v500_v26, 4  ;;  %v365_v33 = vpop.f32.mrb[3].mxu0  ;;  %v515_v36 = vrot.slane %v514_v31, 4  ;;  %v406_v37 = vpop.f32.mrb[3].mxu1 }
 0x138   :  { %v495_v35 = vadd.f32 %v494_v24, %v493_v21  ;;  %v509_v40 = vadd.f32 %v508_v29, %v507_v25  ;;  %v5046_v25 = vld [vmem:[#allocation8 + $0x190] ss:$8 sps:$4 sm:$0xff]  }
 0x139   :  { %v502_v41 = vadd.f32 %v501_v30, %v500_v26  ;;  %v516_v44 = vadd.f32 %v515_v36, %v514_v31  ;;  %1365 = vmatpush1.bf16.msra.mxu0 %v5046_v25 }
 0x13a   :  { %v496_v43 = vrot.slane %v495_v35, 2  ;;  %v510_v45 = vrot.slane %v509_v40, 2 }
 0x13b   :  { %v503_v46 = vrot.slane %v502_v41, 2  ;;  %v517_v49 = vrot.slane %v516_v44, 2 }
 0x13c   :  { %v497_v48 = vadd.f32 %v496_v43, %v495_v35  ;;  %v511_v51 = vadd.f32 %v510_v45, %v509_v40 }
 0x13d   :  { %v504_v52 = vadd.f32 %v503_v46, %v502_v41  ;;  %v518_v54 = vadd.f32 %v517_v49, %v516_v44  ;;  %v5051_v44 = vld [vmem:[#allocation8 + $0x1a4] ss:$8 sps:$4 sm:$0xff]  }
 0x13e   :  { %v498_v53 = vrot.slane %v497_v48, 1  ;;  %v512_v55 = vrot.slane %v511_v51, 1  ;;  %1366 = vmatprep.subr.bf16.mxu0 %v5051_v44 }
 0x13f   :  { %v505_v56 = vrot.slane %v504_v52, 1  ;;  %v519_v59 = vrot.slane %v518_v54, 1  ;;  %1367 = vmatpush1.bf16.msra.mxu0 %v5049_v57 }
 0x140   :  { %v499_v58 = vadd.f32 %v498_v53, %v497_v48  ;;  %v513_v61 = vadd.f32 %v512_v55, %v511_v51 }
 0x141   :  { %v506_v62 = vadd.f32 %v505_v56, %v504_v52  ;;  %v520_v1 = vadd.f32 %v519_v59, %v518_v54 }
 0x142   :  { %v550_v63 = vmul.f32 0.5, %v499_v58  ;;  %v552_v2 = vmul.f32 0.5, %v513_v61 }
 0x143   :  { %v551_v3 = vmul.f32 0.5, %v506_v62  ;;  %v553_v6 = vmul.f32 0.5, %v520_v1 }
 0x144   :  { %v5690_v5 = vsub.f32 %v5645_v20, %v550_v63  ;;  %v5693_v8 = vsub.f32 %v5649_v22, %v552_v2 }
 0x145   :  { %v5696_v9 = vsub.f32 %v5651_v23, %v551_v3  ;;  %v5701_v11 = vsub.f32 %v5657_v27, %v553_v6 }
 0x146   :  { %v566_v10 = vmul.f32 %v5690_v5, %v5690_v5  ;;  %v568_v12 = vmul.f32 %v5693_v8, %v5693_v8 }
 0x147   :  { %v567_v13 = vmul.f32 %v5696_v9, %v5696_v9  ;;  %v569_v16 = vmul.f32 %v5701_v11, %v5701_v11 }
 0x148   :  { %v574_v15 = vsel %vm492_vm1, %v566_v10, 0.0  ;;  %v5710_v17 = vpop.f32.mrb[4].mxu0  ;;  %v588_v20 = vsel %vm492_vm1, %v568_v12, 0.0  ;;  %v5716_v23 = vpop.f32.mrb[4].mxu1 }
 0x149   :  { %v575_v19 = vrot.slane %v574_v15, 4  ;;  %v581_v21 = vsel %vm492_vm1, %v567_v13, 0.0  ;;  %v521_v22 = vsel %vm492_vm1, %v5710_v17, 0.0  ;;  %v5718_v24 = vpop.f32.mrb[5].mxu0  ;;  %v589_v26 = vrot.slane %v588_v20, 4  ;;  %v5721_v30 = vpop.f32.mrb[5].mxu1 }
 0x14a   :  { %v582_v27 = vrot.slane %v581_v21, 4  ;;  %v595_v28 = vsel %vm492_vm1, %v569_v16, 0.0  ;;  %v522_v29 = vrot.slane %v521_v22, 4  ;;  %v446_v31 = vpop.f32.mrb[6].mxu0  ;;  %v535_v35 = vsel %vm492_vm1, %v5716_v23, 0.0  ;;  %v487_v37 = vpop.f32.mrb[6].mxu1 }
 0x14b   :  { %v576_v32 = vadd.f32 %v575_v19, %v574_v15  ;;  %v596_v33 = vrot.slane %v595_v28, 4  ;;  %v528_v36 = vsel %vm492_vm1, %v5718_v24, 0.0  ;;  %v447_v38 = vpop.f32.mrb[7].mxu0  ;;  %v590_v39 = vadd.f32 %v589_v26, %v588_v20  ;;  %v488_v43 = vpop.f32.mrb[7].mxu1 }
 0x14c   :  { %v583_v40 = vadd.f32 %v582_v27, %v581_v21  ;;  %v523_v41 = vadd.f32 %v522_v29, %v521_v22  ;;  %v536_v42 = vrot.slane %v535_v35, 4  ;;  %v529_v47 = vrot.slane %v528_v36, 4 }
 0x14d   :  { %v577_v45 = vrot.slane %v576_v32, 2  ;;  %v597_v46 = vadd.f32 %v596_v33, %v595_v28  ;;  %v542_v48 = vsel %vm492_vm1, %v5721_v30, 0.0  ;;  %v591_v49 = vrot.slane %v590_v39, 2 }
 0x14e   :  { %v584_v50 = vrot.slane %v583_v40, 2  ;;  %v524_v51 = vrot.slane %v523_v41, 2  ;;  %v537_v52 = vadd.f32 %v536_v42, %v535_v35  ;;  %v530_v55 = vadd.f32 %v529_v47, %v528_v36 }
 0x14f   :  { %v578_v53 = vadd.f32 %v577_v45, %v576_v32  ;;  %v598_v54 = vrot.slane %v597_v46, 2  ;;  %v543_v56 = vrot.slane %v542_v48, 4  ;;  %v592_v58 = vadd.f32 %v591_v49, %v590_v39 }
 0x150   :  { %v585_v59 = vadd.f32 %v584_v50, %v583_v40  ;;  %v525_v60 = vadd.f32 %v524_v51, %v523_v41  ;;  %v538_v61 = vrot.slane %v537_v52, 2  ;;  %v531_v1 = vrot.slane %v530_v55, 2 }
 0x151   :  { %v579_v62 = vrot.slane %v578_v53, 1  ;;  %v599_v63 = vadd.f32 %v598_v54, %v597_v46  ;;  %v544_v2 = vadd.f32 %v543_v56, %v542_v48  ;;  %v593_v3 = vrot.slane %v592_v58, 1 }
 0x152   :  { %v586_v4 = vrot.slane %v585_v59, 1  ;;  %v526_v6 = vrot.slane %v525_v60, 1  ;;  %v539_v7 = vadd.f32 %v538_v61, %v537_v52  ;;  %v532_v13 = vadd.f32 %v531_v1, %v530_v55 }
 0x153   :  { %v580_v10 = vadd.f32 %v579_v62, %v578_v53  ;;  %v600_v12 = vrot.slane %v599_v63, 1  ;;  %v545_v14 = vrot.slane %v544_v2, 2  ;;  %v594_v15 = vadd.f32 %v593_v3, %v592_v58 }
 0x154   :  { %v587_v16 = vadd.f32 %v586_v4, %v585_v59  ;;  %v527_v18 = vadd.f32 %v526_v6, %v525_v60  ;;  %v540_v19 = vrot.slane %v539_v7, 1  ;;  %v533_v22 = vrot.slane %v532_v13, 1 }
 0x155   :  { %v630_v20 = vmul.f32 0.5, %v580_v10  ;;  %v601_v21 = vadd.f32 %v600_v12, %v599_v63  ;;  %v546_v25 = vadd.f32 %v545_v14, %v544_v2  ;;  %v632_v26 = vmul.f32 0.5, %v594_v15 }
 0x156   :  { %v631_v27 = vmul.f32 0.5, %v587_v16  ;;  %v554_v28 = vmul.f32 0.5, %v527_v18  ;;  %v541_v29 = vadd.f32 %v540_v19, %v539_v7  ;;  %v534_v33 = vadd.f32 %v533_v22, %v532_v13 }
 0x157   :  { %v638_v31 = vadd.f32 1e-05, %v630_v20  ;;  %v633_v32 = vmul.f32 0.5, %v601_v21  ;;  %v547_v35 = vrot.slane %v546_v25, 1  ;;  %v640_v36 = vadd.f32 1e-05, %v632_v26 }
 0x158   :  { %v639_v37 = vadd.f32 1e-05, %v631_v27  ;;  %v5730_v38 = vsub.f32 %v5710_v17, %v554_v28  ;;  %v556_v39 = vmul.f32 0.5, %v541_v29  ;;  %v555_v41 = vmul.f32 0.5, %v534_v33 }
 0x159   :  { %5373 = vrsqrt.f32 %v638_v31  ;;  %v641_v40 = vadd.f32 1e-05, %v633_v32  ;;  %v548_v42 = vadd.f32 %v547_v35, %v546_v25  ;;  %v5522_v45 = vmov 1983009808   ;;  %v5756_v32 = vld [vmem:[#allocation6] sm:$0xff] }
 0x15a   :  { %5375 = vrsqrt.f32 %v640_v36  ;;  %v570_v43 = vmul.f32 %v5730_v38, %v5730_v38  ;;  %v5735_v44 = vsub.f32 %v5716_v23, %v556_v39  ;;  %v665_v46 = vunpack.c.l.s4 %v5522_v45 }
 0x15b   :  { %5377 = vrsqrt.f32 %v639_v37  ;;  %v5738_v47 = vsub.f32 %v5718_v24, %v555_v41  ;;  %v557_v17 = vmul.f32 0.5, %v548_v42  ;;  %v667_v48 = vlaneseq }
 0x15c   :  { %5379 = vrsqrt.f32 %v641_v40  ;;  %v602_v49 = vsel %vm492_vm1, %v570_v43, 0.0  ;;  %v572_v50 = vmul.f32 %v5735_v44, %v5735_v44  ;;  %v666_v57 = vunpack.c.0.s8 %v665_v46 }
 0x15d   :  { %v603_v51 = vrot.slane %v602_v49, 4  ;;  %v571_v52 = vmul.f32 %v5738_v47, %v5738_v47  ;;  %v5746_v23 = vsub.f32 %v5721_v30, %v557_v17  ;;  %v5752_v58 = vshrl.u32 %v667_v48, 7 }
 0x15e   :  { %v616_v53 = vsel %vm492_vm1, %v572_v50, 0.0 }
 0x15f   :  { %v604_v54 = vadd.f32 %v603_v51, %v602_v49  ;;  %v617_v24 = vrot.slane %v616_v53, 4  ;;  %v609_v55 = vsel %vm492_vm1, %v571_v52, 0.0  ;;  %v573_v56 = vmul.f32 %v5746_v23, %v5746_v23 }
 0x160   :  { %v610_v59 = vrot.slane %v609_v55, 4  ;;  %v669_v6 = vsub.s32 %v666_v57, %v5752_v58  ;;  %v5759_v33 = vsub.s32 0, %v5752_v58  ;;  %v716_v35 = vsub.s32 6, %v5752_v58 }
 0x161   :  { %v605_v60 = vrot.slane %v604_v54, 2  ;;  %v618_v61 = vadd.f32 %v617_v24, %v616_v53  ;;  %v623_v62 = vsel %vm492_vm1, %v573_v56, 0.0  ;;  %v708_v42 = vsub.s32 2, %v5752_v58 }
 0x162   :  { %v611_v63 = vadd.f32 %v610_v59, %v609_v55  ;;  %v624_v30 = vrot.slane %v623_v62, 4  ;;  %v712_v46 = vsub.s32 4, %v5752_v58  ;;  %vm2503_vm1 = vcmask 257026  }
 0x163   :  { %v5374_v1 = vpop.eup %5373  ;;  %v606_v2 = vadd.f32 %v605_v60, %v604_v54  ;;  %v619_v3 = vrot.slane %v618_v61, 2 }
 0x164   :  { %v5376_v4 = vpop.eup %5375  ;;  %v612_v7 = vrot.slane %v611_v63, 2  ;;  %v625_v10 = vadd.f32 %v624_v30, %v623_v62 }
 0x165   :  { %v5378_v12 = vpop.eup %5377  ;;  %v607_v13 = vrot.slane %v606_v2, 1  ;;  %v620_v14 = vadd.f32 %v619_v3, %v618_v61 }
 0x166   :  { %v5380_v15 = vpop.eup %5379  ;;  %v662_v16 = vcombine.low %v5374_v1, %v5378_v12  ;;  %v613_v18 = vadd.f32 %v612_v7, %v611_v63  ;;  %v626_v19 = vrot.slane %v625_v10, 2 }
 0x167   :  { %v663_v20 = vcombine.low %v5376_v4, %v5380_v15  ;;  %v608_v21 = vadd.f32 %v607_v13, %v606_v2  ;;  %v621_v22 = vrot.slane %v620_v14, 1  ;;  %v491_v13 = vld [vmem:[#allocation6 + $0x8] sm:$0xff] }
 0x168   :  { %v670_v25 = vrot.slane %v662_v16, %v669_v6  ;;  %v614_v26 = vrot.slane %v613_v18, 1  ;;  %v627_v27 = vadd.f32 %v626_v19, %v625_v10 }
 0x169   :  { %v677_v28 = vrot.slane %v663_v20, %v669_v6  ;;  %v634_v29 = vmul.f32 0.5, %v608_v21  ;;  %v622_v31 = vadd.f32 %v621_v22, %v620_v14  ;;  %v794_v14 = vsub.s32 5, %v5752_v58 }
 0x16a   :  { %v615_v36 = vadd.f32 %v614_v26, %v613_v18  ;;  %v628_v37 = vrot.slane %v627_v27, 1 }
 0x16b   :  { %v678_v39 = vcombine.low %v670_v25, %v677_v28  ;;  %v642_v40 = vadd.f32 1e-05, %v634_v29  ;;  %v636_v41 = vmul.f32 0.5, %v622_v31  ;;  %v811_v19 = vrot.slane %v491_v13, %v794_v14 }
 0x16c   :  { %v635_v43 = vmul.f32 0.5, %v615_v36  ;;  %v629_v45 = vadd.f32 %v628_v37, %v627_v27 }
 0x16d   :  { %v698_v17 = vmul.f32 %v678_v39, %v5756_v32  ;;  %v644_v48 = vadd.f32 1e-05, %v636_v41  ;;  %5381 = vrsqrt.f32 %v642_v40 }
 0x16e   :  { %v643_v49 = vadd.f32 1e-05, %v635_v43  ;;  %v637_v50 = vmul.f32 0.5, %v629_v45 }
 0x16f   :  { %v717_v51 = vrot.slane %v698_v17, %v716_v35  ;;  %5383 = vrsqrt.f32 %v644_v48  ;;  %v709_v52 = vrot.slane %v698_v17, %v708_v42  ;;  %v705_v53 = vrot.slane %v698_v17, %v5759_v33 }
 0x170   :  { %5385 = vrsqrt.f32 %v643_v49  ;;  %v645_v54 = vadd.f32 1e-05, %v637_v50  ;;  %v713_v24 = vrot.slane %v698_v17, %v712_v46 }
 0x171   :  { %v757_v55 = vrot.slane %v717_v51, %v5759_v33  ;;  %v749_v56 = vrot.slane %v709_v52, %v5759_v33  ;;  %v745_v57 = vrot.slane %v705_v53, %v5759_v33  ;;  %v5054_v51 = vld [vmem:[#allocation8 + $0x1b4] ss:$8 sps:$4 sm:$0xff]   ;;  %v795_v52 = vrot.slane %v5756_v32, %v794_v14  ;;  %v5058_v14 = vld [vmem:[#allocation8 + $0x1d0] ss:$8 sps:$4 sm:$0xff]  }
 0x172   :  { %5387 = vrsqrt.f32 %v645_v54  ;;  %v753_v59 = vrot.slane %v713_v24, %v5759_v33  ;;  %1368 = vmatprep.subr.bf16.mxu0 %v5054_v51  ;;  %v5057_v54 = vld [vmem:[#allocation8 + $0x1c4] ss:$8 sps:$4 sm:$0xff]  }
 0x173   :  { %v5771_v60 = vmul.f32 %v757_v55, %v5701_v11  ;;  %v5774_v61 = vmul.f32 %v749_v56, %v5696_v9  ;;  %v5777_v62 = vmul.f32 %v745_v57, %v5690_v5  ;;  %v5783_v11 = vsub.s32 1, %v5752_v58  ;;  %v5055_v56 = vld [vmem:[#allocation8 + $0x1c0] ss:$8 sps:$4 sm:$0xff]  }
 0x174   :  { %v5780_v63 = vmul.f32 %v753_v59, %v5693_v8  ;;  %v798_v9 = vsub.s32 7, %v5752_v58  ;;  %v790_v5 = vsub.s32 3, %v5752_v58 }
 0x175   :  { %v803_v18 = vrot.slane %v491_v13, %v5783_v11  ;;  %v851_v58 = vrot.slane %v811_v19, %v5783_v11 }
 0x176   :  { %v815_v15 = vrot.slane %v491_v13, %v798_v9  ;;  %v807_v16 = vrot.slane %v491_v13, %v790_v5 }
 0x177   :  { %v5382_v30 = vpop.eup %5381  ;;  %v843_v28 = vrot.slane %v803_v18, %v5783_v11 }
 0x178   :  { %v855_v26 = vrot.slane %v815_v15, %v5783_v11  ;;  %v847_v27 = vrot.slane %v807_v16, %v5783_v11 }
 0x179   :  { %v5384_v1 = vpop.eup %5383 }
 0x17a   :  { %v5386_v2 = vpop.eup %5385 }
 0x17b   :  { %v679_v3 = vcombine.low %v5382_v30, %v5386_v2 }
 0x17c   :  { %v5388_v4 = vpop.eup %5387 }
 0x17d   :  { %v680_v7 = vcombine.low %v5384_v1, %v5388_v4  ;;  %v687_v10 = vrot.slane %v679_v3, %v669_v6  ;;  %v835_v3 = vrot.slane %v795_v52, %v5783_v11 }
 0x17f   :  { %v694_v12 = vrot.slane %v680_v7, %v669_v6  ;;  %v858_v19 = vadd.f32 %v835_v3, %v5780_v63  ;;  %v5066_v63 = vld [vmem:[#allocation8 + $0x1f4] ss:$8 sps:$4 sm:$0xff]  }
 0x181   :  { %v695_v8 = vcombine.low %v687_v10, %v694_v12  ;;  %v5060_v12 = vld [vmem:[#allocation8 + $0x1d4] ss:$8 sps:$4 sm:$0xff]  }
 0x183   :  { %v699_v20 = vmul.f32 %v695_v8, %v491_v13 }
 0x185   :  { %v721_v21 = vrot.slane %v699_v20, %v5759_v33  ;;  %v733_v6 = vrot.slane %v699_v20, %v716_v35  ;;  %v725_v22 = vrot.slane %v699_v20, %v708_v42  ;;  %v729_v25 = vrot.slane %v699_v20, %v712_v46 }
 0x187   :  { %v773_v29 = vrot.slane %v733_v6, %v5759_v33  ;;  %v765_v31 = vrot.slane %v725_v22, %v5759_v33  ;;  %v761_v36 = vrot.slane %v721_v21, %v5759_v33  ;;  %v769_v37 = vrot.slane %v729_v25, %v5759_v33  ;;  %v5063_v21 = vld [vmem:[#allocation8 + $0x1e4] ss:$8 sps:$4 sm:$0xff]   ;;  %v5064_v6 = vld [vmem:[#allocation8 + $0x1f0] ss:$8 sps:$4 sm:$0xff]   ;;  %v5067_v25 = vld [vmem:[#allocation8 + $0x200] ss:$8 sps:$4 sm:$0xff]  }
 0x188   :  { %v5069_v22 = vld [vmem:[#allocation8 + $0x204] ss:$8 sps:$4 sm:$0xff]  }
 0x189   :  { %v781_v35 = vmul.f32 %v773_v29, %v5746_v23  ;;  %v779_v39 = vmul.f32 %v765_v31, %v5738_v47  ;;  %v778_v40 = vmul.f32 %v761_v36, %v5730_v38  ;;  %v780_v41 = vmul.f32 %v769_v37, %v5735_v44  ;;  %v5052_v38 = vld [vmem:[#allocation8 + $0x1b0] ss:$8 sps:$4 sm:$0xff]   ;;  %v5081_v31 = vld [vmem:[#allocation8 + $0x244] ss:$8 sps:$4 sm:$0xff]  }
 0x18a   :  { %v799_v23 = vrot.slane %v5756_v32, %v798_v9  ;;  %v791_v47 = vrot.slane %v5756_v32, %v790_v5  ;;  %v787_v44 = vrot.slane %v5756_v32, %v5783_v11  ;;  %1369 = vmatpush1.bf16.msra.mxu0 %v5052_v38  ;;  %v5076_v29 = vld [vmem:[#allocation8 + $0x230] ss:$8 sps:$4 sm:$0xff]  }
 0x18b   :  { %v863_v42 = vadd.f32 %v855_v26, %v781_v35  ;;  %v861_v43 = vadd.f32 %v847_v27, %v779_v39  ;;  %v860_v45 = vadd.f32 %v843_v28, %v778_v40  ;;  %v862_v46 = vadd.f32 %v851_v58, %v780_v41  ;;  %1370 = vmatprep.subr.bf16.mxu0 %v5057_v54  ;;  %v5070_v26 = vld [vmem:[#allocation8 + $0x210] ss:$8 sps:$4 sm:$0xff]   ;;  %v5075_v27 = vld [vmem:[#allocation8 + $0x224] ss:$8 sps:$4 sm:$0xff]   ;;  %v5073_v28 = vld [vmem:[#allocation8 + $0x220] ss:$8 sps:$4 sm:$0xff]  }
 0x18c   :  { %v839_v53 = vrot.slane %v799_v23, %v5783_v11  ;;  %v831_v55 = vrot.slane %v791_v47, %v5783_v11  ;;  %v827_v30 = vrot.slane %v787_v44, %v5783_v11  ;;  %v5078_v58 = vld [vmem:[#allocation8 + $0x234] ss:$8 sps:$4 sm:$0xff]  }
 0x18d   :  { %v867_v17 = vmul.f32 0.5, %v863_v42  ;;  %v865_v48 = vmul.f32 0.5, %v861_v43  ;;  %v864_v49 = vmul.f32 0.5, %v860_v45  ;;  %v866_v50 = vmul.f32 0.5, %v862_v46 }
 0x18e   :  { %1371 = vmatpush1.bf16.msra.mxu0 %v5055_v56  ;;  %v859_v32 = vadd.f32 %v839_v53, %v5771_v60  ;;  %v857_v9 = vadd.f32 %v831_v55, %v5774_v61  ;;  %v856_v8 = vadd.f32 %v827_v30, %v5777_v62  ;;  %v5061_v62 = vld [vmem:[#allocation8 + $0x1e0] ss:$8 sps:$4 sm:$0xff]  }
 0x18f   :  { %5389 = vtanh.f32 %v867_v17  ;;  %1372 = vmatprep.subr.bf16.mxu0 %v5060_v12 }
 0x190   :  { %5391 = vtanh.f32 %v865_v48 }
 0x191   :  { %5393 = vtanh.f32 %v864_v49 }
 0x192   :  { %5395 = vtanh.f32 %v866_v50  ;;  %1373 = vmatpush1.bf16.msra.mxu0 %v5058_v14 }
 0x193   :  { %1374 = vmatprep.subr.bf16.mxu0 %v5063_v21 }
 0x196   :  { %1375 = vmatpush1.bf16.msra.mxu0 %v5061_v62 }
 0x197   :  { %1376 = vmatprep.subr.bf16.mxu0 %v5066_v63 }
 0x199   :  { %v5390_v24 = vpop.eup %5389 }
 0x19a   :  { %v5392_v57 = vpop.eup %5391  ;;  %v875_v59 = vadd.f32 1.0, %v5390_v24  ;;  %1377 = vmatpush1.bf16.msra.mxu0 %v5064_v6 }
 0x19b   :  { %v5394_v1 = vpop.eup %5393  ;;  %v873_v2 = vadd.f32 1.0, %v5392_v57  ;;  %1378 = vmatprep.subr.bf16.mxu0 %v5069_v22 }
 0x19c   :  { %v5396_v4 = vpop.eup %5395  ;;  %v879_v7 = vmul.f32 0.5, %v875_v59  ;;  %v872_v10 = vadd.f32 1.0, %v5394_v1 }
 0x19d   :  { %v877_v13 = vmul.f32 0.5, %v873_v2  ;;  %v874_v5 = vadd.f32 1.0, %v5396_v4 }
 0x19e   :  { %v876_v15 = vmul.f32 0.5, %v872_v10  ;;  %v5814_v16 = vmul.f32 %v879_v7, %v859_v32  ;;  %1379 = vmatpush1.bf16.msra.mxu0 %v5067_v25 }
 0x19f   :  { %v5816_v18 = vmul.f32 %v877_v13, %v857_v9  ;;  %v878_v20 = vmul.f32 0.5, %v874_v5  ;;  %1380 = vmatprep.subr.bf16.mxu0 %v5072_v34 }
 0x1a0   :  { %v5819_v60 = vmul.f32 %v876_v15, %v856_v8 }
 0x1a1   :  { %937 = vrot.lane.b32.xlu1 %v5816_v18, %s5515_s23  ;;  %v5823_v61 = vmul.f32 %v878_v20, %v858_v19 }
 0x1a2   :  { %896 = vrot.lane.b32.xlu0 %v5819_v60, %s5515_s23  ;;  %1381 = vmatpush1.bf16.msra.mxu0 %v5070_v26 }
 0x1a3   :  { %1382 = vmatprep.subr.bf16.mxu0 %v5075_v27 }
 0x1a5   :  { %943 = vrot.lane.b32.xlu1 %v5816_v18, %s5523_s0 }
 0x1a6   :  { %902 = vrot.lane.b32.xlu0 %v5819_v60, %s5523_s0  ;;  %1383 = vmatpush1.bf16.msra.mxu0 %v5073_v28 }
 0x1a7   :  { %1384 = vmatprep.subr.bf16.mxu0 %v5078_v58 }
 0x1a9   :  { %976 = vrot.lane.b32.xlu1 %v5823_v61, %s5523_s0 }
 0x1aa   :  { %970 = vrot.lane.b32.xlu0 %v5823_v61, %s5515_s23  ;;  %1385 = vmatpush1.bf16.msra.mxu0 %v5076_v29 }
 0x1ab   :  { %1397 = vmatprep.subr.bf16.mxu0 %v5081_v31 }
 0x1ad   :  { %1013 = vrot.lane.b32.xlu1 %v5814_v16, %s5523_s0 }
 0x1ae   :  { %1007 = vrot.lane.b32.xlu0 %v5814_v16, %s5515_s23 }
 0x1b1   :  { %940 = vrot.lane.b32.xlu1 %v5816_v18, %s5524_s29 }
 0x1b2   :  { %899 = vrot.lane.b32.xlu0 %v5819_v60, %s5524_s29 }
 0x1b5   :  { %1010 = vrot.lane.b32.xlu1 %v5814_v16, %s5524_s29 }
 0x1b6   :  { %973 = vrot.lane.b32.xlu0 %v5823_v61, %s5524_s29 }
 0x213   :  { %v938_v36 = vpop.permute.xlu1 %937 }
 0x214   :  { %v951_v37 = vsel %vm905_vm3, %v938_v36, 0.0  ;;  %v897_v35 = vpop.permute.xlu0 %896  ;;  %v946_v32 = vsel %vm905_vm3, 0.0, %v938_v36 }
 0x215   :  { %v957_v39 = vrot.slane %v951_v37, 2  ;;  %968 = vst.msk [vmem:[#allocation2 + $0x28] sm:$0x3] %vm967_vm5, %v951_v37  ;;  %v912_v40 = vsel %vm905_vm3, %v897_v35, 0.0  ;;  %v906_v10 = vsel %vm905_vm3, 0.0, %v897_v35 }
 0x216   :  { %v918_v41 = vrot.slane %v912_v40, 6  ;;  %v928_v42 = vrot.slane %v912_v40, 4 }
 0x217   :  { %964 = vst.msk [vmem:[#allocation2 + $0x10] sm:$0xc0] %vm963_vm6, %v957_v39  ;;  %v944_v43 = vpop.permute.xlu1 %943 }
 0x218   :  { %925 = vst.msk [vmem:[#allocation2 + $0x10] sm:$0xc] %vm924_vm7, %v918_v41  ;;  %v949_v45 = vsel %vm886_vm2, %v944_v43, %v5816_v18  ;;  %v903_v46 = vpop.permute.xlu0 %902 }
 0x219   :  { %935 = vst.msk [vmem:[#allocation2 + $0x10] sm:$0x30] %vm934_vm8, %v928_v42  ;;  %v950_v17 = vsel %vm908_vm9, %v949_v45, %v5816_v18  ;;  %v910_v48 = vsel %vm886_vm2, %v903_v46, %v5819_v60  ;;  %v5079_v46 = vld [vmem:[#allocation8 + $0x240] ss:$8 sps:$4 sm:$0xff]  }
 0x21a   :  { %v956_v49 = vrot.slane %v950_v17, 2  ;;  %966 = vst [vmem:[#allocation2 + $0x20] sm:$0x3] %v950_v17  ;;  %v911_v50 = vsel %vm908_vm9, %v910_v48, %v5819_v60 }
 0x21b   :  { %v917_v23 = vrot.slane %v911_v50, 6  ;;  %v927_v51 = vrot.slane %v911_v50, 4  ;;  %v977_v47 = vpop.permute.xlu1 %976 }
 0x21c   :  { %962 = vst [vmem:[#allocation2 + $0x8] sm:$0xc0] %v956_v49  ;;  %v982_v38 = vsel %vm886_vm2, %v977_v47, %v5823_v61  ;;  %v971_v44 = vpop.permute.xlu0 %970  ;;  %v5084_v49 = vld [vmem:[#allocation8 + $0x254] ss:$8 sps:$4 sm:$0xff]  }
 0x21d   :  { %923 = vst [vmem:[#allocation2 + $0x8] sm:$0xc] %v917_v23  ;;  %933 = vst [vmem:[#allocation2 + $0x8] sm:$0x30] %v927_v51  ;;  %v983_v52 = vsel %vm908_vm9, %v982_v38, %v5823_v61  ;;  %v984_v53 = vsel %vm905_vm3, %v971_v44, 0.0  ;;  %v979_v20 = vsel %vm905_vm3, 0.0, %v971_v44 }
 0x21e   :  { %v989_v54 = vrot.slane %v983_v52, 6  ;;  %v998_v24 = vrot.slane %v983_v52, 4  ;;  %v990_v55 = vrot.slane %v984_v53, 6  ;;  %v999_v56 = vrot.slane %v984_v53, 4  ;;  %v5082_v23 = vld [vmem:[#allocation8 + $0x250] ss:$8 sps:$4 sm:$0xff]  }
 0x21f   :  { %v1014_v57 = vpop.permute.xlu1 %1013  ;;  %v5087_v51 = vld [vmem:[#allocation8 + $0x264] ss:$8 sps:$4 sm:$0xff]   ;;  %v5085_v38 = vld [vmem:[#allocation8 + $0x260] ss:$8 sps:$4 sm:$0xff]   ;;  %v5090_v44 = vld [vmem:[#allocation8 + $0x274] ss:$8 sps:$4 sm:$0xff]  }
 0x220   :  { %995 = vst [vmem:[#allocation2 + $0x20] sm:$0xc] %v989_v54  ;;  %1004 = vst [vmem:[#allocation2 + $0x20] sm:$0x30] %v998_v24  ;;  %v1019_v59 = vsel %vm886_vm2, %v1014_v57, %v5814_v16  ;;  %v1008_v30 = vpop.permute.xlu0 %1007  ;;  %v1039_v52 = vld [vmem:[#allocation2 + $0x10] sm:$0xff] }
 0x221   :  { %996 = vst.msk [vmem:[#allocation2 + $0x28] sm:$0xc] %vm924_vm7, %v990_v55  ;;  %v1020_v1 = vsel %vm908_vm9, %v1019_v59, %v5814_v16  ;;  %v1021_v2 = vsel %vm905_vm3, %v1008_v30, 0.0  ;;  %v1016_v15 = vsel %vm905_vm3, 0.0, %v1008_v30  ;;  %v5088_v24 = vld [vmem:[#allocation8 + $0x270] ss:$8 sps:$4 sm:$0xff]  }
 0x222   :  { %1005 = vst.msk [vmem:[#allocation2 + $0x28] sm:$0x30] %vm934_vm8, %v999_v56  ;;  %v1026_v3 = vrot.slane %v1020_v1, 2  ;;  %1035 = vst [vmem:[#allocation2 + $0x38] sm:$0x3] %v1020_v1  ;;  %v1027_v4 = vrot.slane %v1021_v2, 2 }
 0x223   :  { %1036 = vst.msk [vmem:[#allocation2 + $0x40] sm:$0x3] %vm967_vm5, %v1021_v2  ;;  %v941_v7 = vpop.permute.xlu1 %940  ;;  %v5093_v56 = vld [vmem:[#allocation8 + $0x4] ss:$8 sps:$4 sm:$0xff]   ;;  %v5091_v30 = vld [vmem:[#allocation8] ss:$8 sps:$4 sm:$0xff]  }
 0x224   :  { %1032 = vst [vmem:[#allocation2 + $0x20] sm:$0xc0] %v1026_v3  ;;  %1033 = vst.msk [vmem:[#allocation2 + $0x28] sm:$0xc0] %vm963_vm6, %v1027_v4  ;;  %v947_v12 = vsel %vm886_vm2, %v946_v32, %v941_v7  ;;  %v900_v9 = vpop.permute.xlu0 %899  ;;  %v1038_v27 = vld [vmem:[#allocation2 + $0x8] sm:$0xff]  ;;  %vm2567_vm5 = vcmask 254976  }
 0x225   :  { %v948_v13 = vsel %vm908_vm9, %v947_v12, %v941_v7  ;;  %v907_v5 = vsel %vm886_vm2, %v906_v10, %v900_v9  ;;  %v5096_v1 = vld [vmem:[#allocation8 + $0x14] ss:$8 sps:$4 sm:$0xff]   ;;  %v5094_v3 = vld [vmem:[#allocation8 + $0x10] ss:$8 sps:$4 sm:$0xff]   ;;  %v5099_v4 = vld [vmem:[#allocation8 + $0x24] ss:$8 sps:$4 sm:$0xff]  }
 0x226   :  { %v955_v14 = vrot.slane %v948_v13, 2  ;;  %965 = vst [vmem:[#allocation2 + $0x18] sm:$0x3] %v948_v13  ;;  %v909_v8 = vsel %vm908_vm9, %v907_v5, %v900_v9  ;;  %v5097_v32 = vld [vmem:[#allocation8 + $0x20] ss:$8 sps:$4 sm:$0xff]   ;;  %vm2563_vm6 = vcmask 261126  }
 0x227   :  { %v916_v16 = vrot.slane %v909_v8, 6  ;;  %v926_v18 = vrot.slane %v909_v8, 4  ;;  %v1011_v19 = vpop.permute.xlu1 %1010  ;;  %v5102_v7 = vld [vmem:[#allocation8 + $0x34] ss:$8 sps:$4 sm:$0xff]   ;;  %v5100_v10 = vld [vmem:[#allocation8 + $0x30] ss:$8 sps:$4 sm:$0xff]  }
 0x228   :  { %961 = vst [vmem:[#allocation2] sm:$0xc0] %v955_v14  ;;  %v1017_v60 = vsel %vm886_vm2, %v1016_v15, %v1011_v19  ;;  %v974_v21 = vpop.permute.xlu0 %973  ;;  %v5105_v12 = vld [vmem:[#allocation8 + $0x44] ss:$8 sps:$4 sm:$0xff]   ;;  %v5103_v9 = vld [vmem:[#allocation8 + $0x40] ss:$8 sps:$4 sm:$0xff]  }
 0x229   :  { %922 = vst [vmem:[#allocation2] sm:$0xc] %v916_v16  ;;  %932 = vst [vmem:[#allocation2] sm:$0x30] %v926_v18  ;;  %v1018_v61 = vsel %vm908_vm9, %v1017_v60, %v1011_v19  ;;  %v980_v62 = vsel %vm886_vm2, %v979_v20, %v974_v21  ;;  %v1044_v63 = vld [vmem:[#allocation2 + $0x38] sm:$0xf] }
 0x22a   :  { %v1025_v6 = vrot.slane %v1018_v61, 2  ;;  %1034 = vst [vmem:[#allocation2 + $0x30] sm:$0x3] %v1018_v61  ;;  %v981_v22 = vsel %vm908_vm9, %v980_v62, %v974_v21  ;;  %v1050_v25 = vpack.c.bf16 %v1044_v63, %v1044_v63  ;;  %v1045_v53 = vld [vmem:[#allocation2 + $0x40] sm:$0xf]  ;;  %vm4145_vm7 = vcmask 64512  }
 0x22b   :  { %v988_v34 = vrot.slane %v981_v22, 6  ;;  %v997_v26 = vrot.slane %v981_v22, 4  ;;  %v1041_v28 = vld [vmem:[#allocation2 + $0x20] sm:$0xff]  ;;  %v1042_v47 = vld [vmem:[#allocation2 + $0x28] sm:$0xff]  ;;  %v5902_v55 = vpack.c.bf16 %v1045_v53, %v1045_v53  ;;  %v5111_v14 = vld [vmem:[#allocation8 + $0x64] ss:$8 sps:$4 sm:$0xff]  }
 0x22c   :  { %1031 = vst [vmem:[#allocation2 + $0x18] sm:$0xc0] %v1025_v6  ;;  %v1047_v58 = vpack.c.bf16 %v1041_v28, %v1038_v27  ;;  %v1144_v31 = vrot.slane %v1050_v25, 1  ;;  %v1775_v37 = vrot.slane %v1050_v25, 2  ;;  %v5900_v54 = vpack.c.bf16 %v1042_v47, %v1039_v52  ;;  %v5108_v13 = vld [vmem:[#allocation8 + $0x54] ss:$8 sps:$4 sm:$0xff]  }
 0x22d   :  { %994 = vst [vmem:[#allocation2 + $0x18] sm:$0xc] %v988_v34  ;;  %1003 = vst [vmem:[#allocation2 + $0x18] sm:$0x30] %v997_v26  ;;  %v1147_v59 = vrot.slane %v5902_v55, 1  ;;  %vm4148_vm8 = vcmask 195584  }
 0x22e   :  { %v1143_v29 = vrot.slane %v1047_v58, 1  ;;  %v1774_v36 = vrot.slane %v1047_v58, 2  ;;  %v1146_v57 = vrot.slane %v5900_v54, 1  ;;  %v5106_v5 = vld [vmem:[#allocation8 + $0x50] ss:$8 sps:$4 sm:$0xff]  }
 0x22f   :  { %v5109_v8 = vld [vmem:[#allocation8 + $0x60] ss:$8 sps:$4 sm:$0xff]   ;;  %v5114_v15 = vld [vmem:[#allocation8 + $0x74] ss:$8 sps:$4 sm:$0xff]   ;;  %v5112_v16 = vld [vmem:[#allocation8 + $0x70] ss:$8 sps:$4 sm:$0xff]  }
 0x230   :  { %v1145_v35 = vsel %vm1139_vm10, %v1143_v29, %v1144_v31  ;;  %v5890_v39 = vsel %vm1770_vm11, %v1774_v36, %v1775_v37  ;;  %v1037_v42 = vld [vmem:[#allocation2] sm:$0xff]  ;;  %v1148_v2 = vsel %vm1139_vm10, %v1146_v57, %v1147_v59  ;;  %v5117_v18 = vld [vmem:[#allocation8 + $0x84] ss:$8 sps:$4 sm:$0xff]   ;;  %v5115_v19 = vld [vmem:[#allocation8 + $0x80] ss:$8 sps:$4 sm:$0xff]  }
 0x231   :  { %1386 = vmatprep.mubr.bf16.mxu0 %v1145_v35  ;;  %v1043_v40 = vld [vmem:[#allocation2 + $0x30] sm:$0xf]  ;;  %v5120_v20 = vld [vmem:[#allocation8 + $0x94] ss:$8 sps:$4 sm:$0xff]   ;;  %v5118_v60 = vld [vmem:[#allocation8 + $0x90] ss:$8 sps:$4 sm:$0xff]  }
 0x232   :  { %v5892_v41 = vpack.c.bf16 %v1043_v40, %v1043_v40  ;;  %v5123_v21 = vld [vmem:[#allocation8 + $0xa4] ss:$8 sps:$4 sm:$0xff]   ;;  %v5121_v61 = vld [vmem:[#allocation8 + $0xa0] ss:$8 sps:$4 sm:$0xff]   ;;  %v5126_v62 = vld [vmem:[#allocation8 + $0xb4] ss:$8 sps:$4 sm:$0xff]  }
 0x233   :  { %v5124_v63 = vld [vmem:[#allocation8 + $0xb0] ss:$8 sps:$4 sm:$0xff]   ;;  %v5129_v6 = vld [vmem:[#allocation8 + $0xc4] ss:$8 sps:$4 sm:$0xff]   ;;  %v5127_v22 = vld [vmem:[#allocation8 + $0xc0] ss:$8 sps:$4 sm:$0xff]  }
 0x234   :  { %v1040_v43 = vld [vmem:[#allocation2 + $0x18] sm:$0xff]  ;;  %v1141_v48 = vrot.slane %v5892_v41, 1  ;;  %v5132_v25 = vld [vmem:[#allocation8 + $0xd4] ss:$8 sps:$4 sm:$0xff]   ;;  %v5130_v34 = vld [vmem:[#allocation8 + $0xd0] ss:$8 sps:$4 sm:$0xff]  }
 0x235   :  { %v5894_v45 = vpack.c.bf16 %v1040_v43, %v1037_v42  ;;  %v5135_v26 = vld [vmem:[#allocation8 + $0xe4] ss:$8 sps:$4 sm:$0xff]   ;;  %v5133_v27 = vld [vmem:[#allocation8 + $0xe0] ss:$8 sps:$4 sm:$0xff]   ;;  %v5138_v28 = vld [vmem:[#allocation8 + $0xf4] ss:$8 sps:$4 sm:$0xff]  }
 0x236   :  { %v5141_v29 = vld [vmem:[#allocation8 + $0x104] ss:$8 sps:$4 sm:$0xff]   ;;  %v5139_v31 = vld [vmem:[#allocation8 + $0x100] ss:$8 sps:$4 sm:$0xff]   ;;  %v5144_v36 = vld [vmem:[#allocation8 + $0x114] ss:$8 sps:$4 sm:$0xff]  }
 0x237   :  { %v1140_v17 = vrot.slane %v5894_v45, 1  ;;  %v5142_v37 = vld [vmem:[#allocation8 + $0x110] ss:$8 sps:$4 sm:$0xff]   ;;  %v5147_v35 = vld [vmem:[#allocation8 + $0x124] ss:$8 sps:$4 sm:$0xff]  }
 0x238   :  { %v5145_v40 = vld [vmem:[#allocation8 + $0x120] ss:$8 sps:$4 sm:$0xff]   ;;  %v5150_v42 = vld [vmem:[#allocation8 + $0x134] ss:$8 sps:$4 sm:$0xff]   ;;  %v5148_v43 = vld [vmem:[#allocation8 + $0x130] ss:$8 sps:$4 sm:$0xff]  }
 0x239   :  { %v1142_v50 = vsel %vm1139_vm10, %v1140_v17, %v1141_v48  ;;  %v5151_v17 = vld [vmem:[#allocation8 + $0x280] ss:$8 sps:$4 sm:$0xff]   ;;  %v5156_v48 = vld [vmem:[#allocation8 + $0x294] ss:$8 sps:$4 sm:$0xff]   ;;  %v5160_v47 = vld [vmem:[#allocation8 + $0x2b0] ss:$8 sps:$4 sm:$0xff]  }
 0x23a   :  { %1387 = vmatmul.mubr.bf16.vlgmr.msra.gmra.mrb[8].mxu0 %v1142_v50  ;;  %v5159_v50 = vld [vmem:[#allocation8 + $0x2a4] ss:$8 sps:$4 sm:$0xff]   ;;  %v5168_v52 = vld [vmem:[#allocation8 + $0x2d4] ss:$8 sps:$4 sm:$0xff]   ;;  %v5166_v53 = vld [vmem:[#allocation8 + $0x2d0] ss:$8 sps:$4 sm:$0xff]  }
 0x23b   :  { %1398 = vmatpush1.bf16.msra.mxu0 %v5079_v46  ;;  %1429 = vmatprep.mubr.bf16.mxu0 %v5520_v0  ;;  %v5153_v46 = vld [vmem:[#allocation8 + $0x284] ss:$8 sps:$4 sm:$0xff]   ;;  %v5172_v57 = vld [vmem:[#allocation8 + $0x2f0] ss:$8 sps:$4 sm:$0xff]  }
 0x23c   :  { %1399 = vmatprep.subr.bf16.mxu0 %v5084_v49  ;;  %v5154_v49 = vld [vmem:[#allocation8 + $0x290] ss:$8 sps:$4 sm:$0xff]   ;;  %v5177_v59 = vld [vmem:[#allocation8 + $0x304] ss:$8 sps:$4 sm:$0xff]  }
 0x23f   :  { %1400 = vmatpush1.bf16.msra.mxu0 %v5082_v23  ;;  %v5157_v23 = vld [vmem:[#allocation8 + $0x2a0] ss:$8 sps:$4 sm:$0xff]  }
 0x240   :  { %1401 = vmatprep.subr.bf16.mxu0 %v5087_v51  ;;  %v5162_v51 = vld [vmem:[#allocation8 + $0x2b4] ss:$8 sps:$4 sm:$0xff]  }
 0x243   :  { %1402 = vmatpush1.bf16.msra.mxu0 %v5085_v38  ;;  %v5165_v38 = vld [vmem:[#allocation8 + $0x2c4] ss:$8 sps:$4 sm:$0xff]  }
 0x244   :  { %1403 = vmatprep.subr.bf16.mxu0 %v5090_v44  ;;  %v5163_v44 = vld [vmem:[#allocation8 + $0x2c0] ss:$8 sps:$4 sm:$0xff]  }
 0x247   :  { %1404 = vmatpush1.bf16.msra.mxu0 %v5088_v24  ;;  %v5171_v24 = vld [vmem:[#allocation8 + $0x2e4] ss:$8 sps:$4 sm:$0xff]  }
 0x248   :  { %1643 = vmatprep.subr.bf16.mxu0 %v5093_v56  ;;  %v5174_v56 = vld [vmem:[#allocation8 + $0x2f4] ss:$8 sps:$4 sm:$0xff]  }
 0x24a   :  { %4750 = vmatmul.mubr.msk.bf16.vlgmr.msra.gmra.mrb[8].mxu0 %vm886_vm2, %v1148_v2  ;;  %v5178_v2 = vld [vmem:[#allocation8 + $0x310] ss:$8 sps:$4 sm:$0xff]  }
 0x24b   :  { %1644 = vmatpush1.bf16.msra.mxu0 %v5091_v30  ;;  %1675 = vmatprep.mubr.bf16.mxu0 %v1047_v58  ;;  %v5136_v58 = vld [vmem:[#allocation8 + $0xf0] ss:$8 sps:$4 sm:$0xff]   ;;  %v5175_v30 = vld [vmem:[#allocation8 + $0x300] ss:$8 sps:$4 sm:$0xff]  }
 0x24c   :  { %1645 = vmatprep.subr.bf16.mxu0 %v5096_v1  ;;  %v5180_v1 = vld [vmem:[#allocation8 + $0x314] ss:$8 sps:$4 sm:$0xff]  }
 0x24f   :  { %1646 = vmatpush1.bf16.msra.mxu0 %v5094_v3  ;;  %v5183_v3 = vld [vmem:[#allocation8 + $0x324] ss:$8 sps:$4 sm:$0xff]  }
 0x250   :  { %1647 = vmatprep.subr.bf16.mxu0 %v5099_v4  ;;  %v5181_v4 = vld [vmem:[#allocation8 + $0x320] ss:$8 sps:$4 sm:$0xff]  }
 0x253   :  { %1648 = vmatpush1.bf16.msra.mxu0 %v5097_v32  ;;  %v5186_v32 = vld [vmem:[#allocation8 + $0x334] ss:$8 sps:$4 sm:$0xff]  }
 0x254   :  { %1649 = vmatprep.subr.bf16.mxu0 %v5102_v7  ;;  %v5184_v7 = vld [vmem:[#allocation8 + $0x330] ss:$8 sps:$4 sm:$0xff]  }
 0x257   :  { %1650 = vmatpush1.bf16.msra.mxu0 %v5100_v10  ;;  %v5189_v10 = vld [vmem:[#allocation8 + $0x344] ss:$8 sps:$4 sm:$0xff]  }
 0x258   :  { %1651 = vmatprep.subr.bf16.mxu0 %v5105_v12  ;;  %v5187_v12 = vld [vmem:[#allocation8 + $0x340] ss:$8 sps:$4 sm:$0xff]  }
 0x25b   :  { %1652 = vmatpush1.bf16.msra.mxu0 %v5103_v9  ;;  %v5192_v9 = vld [vmem:[#allocation8 + $0x354] ss:$8 sps:$4 sm:$0xff]  }
 0x25c   :  { %1653 = vmatprep.subr.bf16.mxu0 %v5108_v13  ;;  %v5190_v13 = vld [vmem:[#allocation8 + $0x350] ss:$8 sps:$4 sm:$0xff]  }
 0x25f   :  { %1654 = vmatpush1.bf16.msra.mxu0 %v5106_v5  ;;  %v5195_v5 = vld [vmem:[#allocation8 + $0x364] ss:$8 sps:$4 sm:$0xff]  }
 0x260   :  { %1655 = vmatprep.subr.bf16.mxu0 %v5111_v14  ;;  %v5193_v14 = vld [vmem:[#allocation8 + $0x360] ss:$8 sps:$4 sm:$0xff]  }
 0x263   :  { %1656 = vmatpush1.bf16.msra.mxu0 %v5109_v8  ;;  %v5198_v8 = vld [vmem:[#allocation8 + $0x374] ss:$8 sps:$4 sm:$0xff]  }
 0x264   :  { %1657 = vmatprep.subr.bf16.mxu0 %v5114_v15  ;;  %v5196_v15 = vld [vmem:[#allocation8 + $0x370] ss:$8 sps:$4 sm:$0xff]  }
 0x267   :  { %1658 = vmatpush1.bf16.msra.mxu0 %v5112_v16  ;;  %v5201_v16 = vld [vmem:[#allocation8 + $0x384] ss:$8 sps:$4 sm:$0xff]  }
 0x268   :  { %1659 = vmatprep.subr.bf16.mxu0 %v5117_v18  ;;  %v1771_v18 = vrot.slane %v5894_v45, 2 }
 0x26b   :  { %1660 = vmatpush1.bf16.msra.mxu0 %v5115_v19  ;;  %v1772_v19 = vrot.slane %v5892_v41, 2  ;;  %v1777_v41 = vrot.slane %v5900_v54, 2 }
 0x26c   :  { %1661 = vmatprep.subr.bf16.mxu0 %v5120_v20  ;;  %v5199_v20 = vld [vmem:[#allocation8 + $0x380] ss:$8 sps:$4 sm:$0xff]  }
 0x26f   :  { %1662 = vmatpush1.bf16.msra.mxu0 %v5118_v60  ;;  %v5204_v60 = vld [vmem:[#allocation8 + $0x394] ss:$8 sps:$4 sm:$0xff]  }
 0x270   :  { %1663 = vmatprep.subr.bf16.mxu0 %v5123_v21  ;;  %v1773_v21 = vsel %vm1770_vm11, %v1771_v18, %v1772_v19 }
 0x273   :  { %1664 = vmatpush1.bf16.msra.mxu0 %v5121_v61  ;;  %v5202_v61 = vld [vmem:[#allocation8 + $0x390] ss:$8 sps:$4 sm:$0xff]  }
 0x274   :  { %1665 = vmatprep.subr.bf16.mxu0 %v5126_v62  ;;  %v5207_v62 = vld [vmem:[#allocation8 + $0x3a4] ss:$8 sps:$4 sm:$0xff]  }
 0x277   :  { %1666 = vmatpush1.bf16.msra.mxu0 %v5124_v63  ;;  %v5205_v63 = vld [vmem:[#allocation8 + $0x3a0] ss:$8 sps:$4 sm:$0xff]  }
 0x278   :  { %1667 = vmatprep.subr.bf16.mxu0 %v5129_v6  ;;  %v5210_v6 = vld [vmem:[#allocation8 + $0x3b4] ss:$8 sps:$4 sm:$0xff]  }
 0x27b   :  { %1668 = vmatpush1.bf16.msra.mxu0 %v5127_v22  ;;  %v1778_v22 = vrot.slane %v5902_v55, 2 }
 0x27c   :  { %1669 = vmatprep.subr.bf16.mxu0 %v5132_v25 }
 0x27d   :  { %v1779_v25 = vsel %vm1770_vm11, %v1777_v41, %v1778_v22 }
 0x27f   :  { %1670 = vmatpush1.bf16.msra.mxu0 %v5130_v34 }
 0x280   :  { %1671 = vmatprep.subr.bf16.mxu0 %v5135_v26 }
 0x283   :  { %1672 = vmatpush1.bf16.msra.mxu0 %v5133_v27 }
 0x284   :  { %1673 = vmatprep.subr.bf16.mxu0 %v5138_v28 }
 0x287   :  { %1674 = vmatpush1.bf16.msra.mxu0 %v5136_v58 }
 0x288   :  { %1686 = vmatprep.subr.bf16.mxu0 %v5141_v29 }
 0x28a   :  { %1676 = vmatmul.mubr.bf16.vlgmr.msra.gmra.mrb[8].mxu0 %v5894_v45  ;;  %v5208_v45 = vld [vmem:[#allocation8 + $0x3b0] ss:$8 sps:$4 sm:$0xff]  }
 0x28b   :  { %1687 = vmatpush1.bf16.msra.mxu0 %v5139_v31  ;;  %1718 = vmatprep.mubr.bf16.mxu0 %v5520_v0 }
 0x28c   :  { %1688 = vmatprep.subr.bf16.mxu0 %v5144_v36 }
 0x28f   :  { %1689 = vmatpush1.bf16.msra.mxu0 %v5142_v37 }
 0x290   :  { %1690 = vmatprep.subr.bf16.mxu0 %v5147_v35 }
 0x293   :  { %1691 = vmatpush1.bf16.msra.mxu0 %v5145_v40 }
 0x294   :  { %1692 = vmatprep.subr.bf16.mxu0 %v5150_v42 }
 0x297   :  { %1693 = vmatpush1.bf16.msra.mxu0 %v5148_v43 }
 0x298   :  { %1985 = vmatprep.subr.bf16.mxu0 %v5153_v46 }
 0x29a   :  { %4791 = vmatmul.mubr.msk.bf16.vlgmr.msra.gmra.mrb[8].mxu0 %vm886_vm2, %v5900_v54 }
 0x29b   :  { %1986 = vmatpush1.bf16.msra.mxu0 %v5151_v17  ;;  %2017 = vmatprep.mubr.bf16.mxu0 %v5890_v39  ;;  %v5169_v39 = vld [vmem:[#allocation8 + $0x2e0] ss:$8 sps:$4 sm:$0xff]  }
 0x29c   :  { %1987 = vmatprep.subr.bf16.mxu0 %v5156_v48 }
 0x29f   :  { %1988 = vmatpush1.bf16.msra.mxu0 %v5154_v49 }
 0x2a0   :  { %1989 = vmatprep.subr.bf16.mxu0 %v5159_v50 }
 0x2a3   :  { %1990 = vmatpush1.bf16.msra.mxu0 %v5157_v23 }
 0x2a4   :  { %1991 = vmatprep.subr.bf16.mxu0 %v5162_v51 }
 0x2a7   :  { %1992 = vmatpush1.bf16.msra.mxu0 %v5160_v47 }
 0x2a8   :  { %1993 = vmatprep.subr.bf16.mxu0 %v5165_v38 }
 0x2ab   :  { %1994 = vmatpush1.bf16.msra.mxu0 %v5163_v44 }
 0x2ac   :  { %1995 = vmatprep.subr.bf16.mxu0 %v5168_v52 }
 0x2af   :  { %1996 = vmatpush1.bf16.msra.mxu0 %v5166_v53 }
 0x2b0   :  { %1997 = vmatprep.subr.bf16.mxu0 %v5171_v24 }
 0x2b3   :  { %1998 = vmatpush1.bf16.msra.mxu0 %v5169_v39 }
 0x2b4   :  { %1999 = vmatprep.subr.bf16.mxu0 %v5174_v56 }
 0x2b7   :  { %2000 = vmatpush1.bf16.msra.mxu0 %v5172_v57 }
 0x2b8   :  { %2001 = vmatprep.subr.bf16.mxu0 %v5177_v59 }
 0x2bb   :  { %2002 = vmatpush1.bf16.msra.mxu0 %v5175_v30 }
 0x2bc   :  { %2003 = vmatprep.subr.bf16.mxu0 %v5180_v1 }
 0x2bf   :  { %2004 = vmatpush1.bf16.msra.mxu0 %v5178_v2 }
 0x2c0   :  { %2005 = vmatprep.subr.bf16.mxu0 %v5183_v3 }
 0x2c3   :  { %2006 = vmatpush1.bf16.msra.mxu0 %v5181_v4 }
 0x2c4   :  { %2007 = vmatprep.subr.bf16.mxu0 %v5186_v32 }
 0x2c7   :  { %2008 = vmatpush1.bf16.msra.mxu0 %v5184_v7 }
 0x2c8   :  { %2009 = vmatprep.subr.bf16.mxu0 %v5189_v10 }
 0x2cb   :  { %2010 = vmatpush1.bf16.msra.mxu0 %v5187_v12 }
 0x2cc   :  { %2011 = vmatprep.subr.bf16.mxu0 %v5192_v9 }
 0x2cf   :  { %2012 = vmatpush1.bf16.msra.mxu0 %v5190_v13 }
 0x2d0   :  { %2013 = vmatprep.subr.bf16.mxu0 %v5195_v5 }
 0x2d3   :  { %2014 = vmatpush1.bf16.msra.mxu0 %v5193_v14 }
 0x2d4   :  { %2015 = vmatprep.subr.bf16.mxu0 %v5198_v8 }
 0x2d7   :  { %2016 = vmatpush1.bf16.msra.mxu0 %v5196_v15 }
 0x2d8   :  { %2028 = vmatprep.subr.bf16.mxu0 %v5201_v16 }
 0x2da   :  { %2018 = vmatmul.mubr.bf16.vlgmr.msra.gmra.mrb[8].mxu0 %v1773_v21 }
 0x2db   :  { %2029 = vmatpush1.bf16.msra.mxu0 %v5199_v20  ;;  %2060 = vmatprep.mubr.bf16.mxu0 %v5520_v0 }
 0x2dc   :  { %2030 = vmatprep.subr.bf16.mxu0 %v5204_v60 }
 0x2df   :  { %2031 = vmatpush1.bf16.msra.mxu0 %v5202_v61 }
 0x2e0   :  { %2032 = vmatprep.subr.bf16.mxu0 %v5207_v62 }
 0x2e3   :  { %2033 = vmatpush1.bf16.msra.mxu0 %v5205_v63 }
 0x2e4   :  { %2034 = vmatprep.subr.bf16.mxu0 %v5210_v6 }
 0x2e7   :  { %2035 = vmatpush1.bf16.msra.mxu0 %v5208_v45 }
 0x2ea   :  { %4832 = vmatmul.mubr.msk.bf16.vlgmr.msra.gmra.mrb[8].mxu0 %vm886_vm2, %v1779_v25 }
 0x3bd   :  { %v5921_v34 = vpop.f32.mrb[8].mxu0 }
 0x3be   :  { %v5923_v26 = vpop.f32.mrb[9].mxu0 }
 0x3bf   :  { %v5925_v27 = vpop.f32.mrb[10].mxu0 }
 0x3c0   :  { %v2076_v28 = vadd.f32 %v5925_v27, %v5921_v34  ;;  %v5929_v58 = vpop.f32.mrb[11].mxu0 }
 0x3c1   :  { %v2083_v54 = vadd.f32 %v5929_v58, %v5923_v26 }
 0x3c2   :  { %v2077_v55 = vrot.slane %v2076_v28, 4 }
 0x3c3   :  { %v2084_v29 = vrot.slane %v2083_v54, 4 }
 0x3c4   :  { %v2078_v37 = vadd.f32 %v2077_v55, %v2076_v28 }
 0x3c5   :  { %v2085_v31 = vadd.f32 %v2084_v29, %v2083_v54 }
 0x3c6   :  { %v2079_v42 = vrot.slane %v2078_v37, 2 }
 0x3c7   :  { %v2086_v36 = vrot.slane %v2085_v31, 2 }
 0x3c8   :  { %v2080_v46 = vadd.f32 %v2079_v42, %v2078_v37 }
 0x3c9   :  { %v2087_v35 = vadd.f32 %v2086_v36, %v2085_v31 }
 0x3ca   :  { %v2081_v17 = vrot.slane %v2080_v46, 1 }
 0x3cb   :  { %v2088_v40 = vrot.slane %v2087_v35, 1 }
 0x3cc   :  { %v2082_v48 = vadd.f32 %v2081_v17, %v2080_v46 }
 0x3cd   :  { %v2089_v43 = vadd.f32 %v2088_v40, %v2087_v35 }
 0x3cf   :  { %2126 = vrot.lane.b32.xlu1 %v2089_v43, %s5523_s0  ;;  %2122 = vrot.lane.b32.xlu0 %v2089_v43, %s5525_s30 }
 0x3d3   :  { %2134 = vrot.lane.b32.xlu1 %v2089_v43, %s5524_s29  ;;  %2130 = vrot.lane.b32.xlu0 %v2089_v43, %s5526_s8 }
 0x3d7   :  { %2142 = vrot.lane.b32.xlu1 %v2089_v43, %s5515_s23  ;;  %2138 = vrot.lane.b32.xlu0 %v2089_v43, %s5527_s9 }
 0x3db   :  { %2095 = vrot.lane.b32.xlu1 %v2082_v48, %s5523_s0  ;;  %2146 = vrot.lane.b32.xlu0 %v2089_v43, %s5528_s10 }
 0x3df   :  { %2091 = vrot.lane.b32.xlu0 %v2082_v48, %s5525_s30 }
 0x3e3   :  { %2099 = vrot.lane.b32.xlu0 %v2082_v48, %s5526_s8 }
 0x441   :  { %v2127_v49 = vpop.permute.xlu1 %2126  ;;  %v2123_v50 = vpop.permute.xlu0 %2122 }
 0x442   :  { %v2125_v23 = vadd.f32 %v2123_v50, %v2089_v43 }
 0x444   :  { %v2129_v51 = vadd.f32 %v2127_v49, %v2125_v23 }
 0x445   :  { %v2135_v47 = vpop.permute.xlu1 %2134  ;;  %v2131_v38 = vpop.permute.xlu0 %2130 }
 0x446   :  { %v2133_v44 = vadd.f32 %v2131_v38, %v2129_v51 }
 0x448   :  { %v2137_v52 = vadd.f32 %v2135_v47, %v2133_v44 }
 0x449   :  { %v2139_v53 = vpop.permute.xlu0 %2138  ;;  %v2143_v39 = vpop.permute.xlu1 %2142 }
 0x44a   :  { %v2141_v24 = vadd.f32 %v2139_v53, %v2137_v52 }
 0x44c   :  { %v2145_v56 = vadd.f32 %v2143_v39, %v2141_v24 }
 0x44d   :  { %v2147_v57 = vpop.permute.xlu0 %2146  ;;  %v2096_v2 = vpop.permute.xlu1 %2095 }
 0x44e   :  { %v2149_v59 = vadd.f32 %v2147_v57, %v2145_v56 }
 0x450   :  { %v2150_v30 = vmul.f32 0.0078125, %v2149_v59 }
 0x451   :  { %v2092_v1 = vpop.permute.xlu0 %2091 }
 0x452   :  { %2190 = vrot.lane.b32.xlu0 %v2150_v30, %s5527_s9  ;;  %2184 = vrot.lane.b32.xlu1 %v2150_v30, %s5528_s10  ;;  %v2094_v5 = vadd.f32 %v2092_v1, %v2082_v48 }
 0x454   :  { %v2098_v16 = vadd.f32 %v2096_v2, %v2094_v5 }
 0x455   :  { %v2100_v3 = vpop.permute.xlu0 %2099 }
 0x456   :  { %2193 = vrot.lane.b32.xlu0 %v2150_v30, %s5524_s29  ;;  %2187 = vrot.lane.b32.xlu1 %v2150_v30, %s5515_s23  ;;  %v2102_v21 = vadd.f32 %v2100_v3, %v2098_v16 }
 0x45a   :  { %2202 = vrot.lane.b32.xlu0 %v2150_v30, %s5525_s30  ;;  %2196 = vrot.lane.b32.xlu1 %v2150_v30, %s5526_s8 }
 0x45e   :  { %2107 = vrot.lane.b32.xlu0 %v2082_v48, %s5527_s9  ;;  %2199 = vrot.lane.b32.xlu1 %v2150_v30, %s5523_s0 }
 0x462   :  { %2115 = vrot.lane.b32.xlu0 %v2082_v48, %s5528_s10  ;;  %2103 = vrot.lane.b32.xlu1 %v2082_v48, %s5524_s29 }
 0x466   :  { %2111 = vrot.lane.b32.xlu1 %v2082_v48, %s5515_s23 }
 0x4c4   :  { %v2185_v4 = vpop.permute.xlu1 %2184  ;;  %v2191_v32 = vpop.permute.xlu0 %2190 }
 0x4c5   :  { %v2205_v7 = vsel %vm2173_vm12, %v2150_v30, %v2185_v4 }
 0x4c8   :  { %v2188_v10 = vpop.permute.xlu1 %2187  ;;  %v2194_v12 = vpop.permute.xlu0 %2193 }
 0x4c9   :  { %v2206_v9 = vsel %vm905_vm3, %v2205_v7, %v2188_v10 }
 0x4ca   :  { %v2207_v13 = vsel %vm2176_vm13, %v2206_v9, %v2191_v32 }
 0x4cb   :  { %v2208_v8 = vsel %vm886_vm2, %v2207_v13, %v2194_v12 }
 0x4cc   :  { %v2197_v14 = vpop.permute.xlu1 %2196  ;;  %v2203_v15 = vpop.permute.xlu0 %2202 }
 0x4cd   :  { %v2209_v18 = vsel %vm322_vm0, %v2208_v8, %v2197_v14 }
 0x4d0   :  { %v2200_v19 = vpop.permute.xlu1 %2199  ;;  %v2108_v62 = vpop.permute.xlu0 %2107 }
 0x4d1   :  { %v2210_v20 = vsel %vm908_vm9, %v2209_v18, %v2200_v19 }
 0x4d2   :  { %v2211_v60 = vsel %vm2181_vm14, %v2210_v20, %v2203_v15 }
 0x4d3   :  { %v2219_v61 = vrot.slane %v2211_v60, %v5759_v33 }
 0x4d4   :  { %v2104_v63 = vpop.permute.xlu1 %2103  ;;  %v2116_v31 = vpop.permute.xlu0 %2115 }
 0x4d5   :  { %v5963_v6 = vsub.f32 %v5923_v26, %v2219_v61  ;;  %v5966_v45 = vsub.f32 %v5929_v58, %v2219_v61  ;;  %v2106_v41 = vadd.f32 %v2104_v63, %v2102_v21 }
 0x4d7   :  { %v2225_v22 = vmul.f32 %v5963_v6, %v5963_v6  ;;  %v2227_v25 = vmul.f32 %v5966_v45, %v5966_v45  ;;  %v2110_v28 = vadd.f32 %v2108_v62, %v2106_v41  ;;  %v6015_v41 = vld [vmem:[%s6912_s4] sm:$0x3]  ;;  %s5529_s4 = smov 120  }
 0x4d8   :  { %v2112_v54 = vpop.permute.xlu1 %2111 }
 0x4d9   :  { %v2235_v29 = vadd.f32 %v2227_v25, %v2225_v22  ;;  %v2114_v55 = vadd.f32 %v2112_v54, %v2110_v28 }
 0x4db   :  { %v2236_v36 = vrot.slane %v2235_v29, 4  ;;  %v2118_v37 = vadd.f32 %v2116_v31, %v2114_v55 }
 0x4dd   :  { %v2237_v35 = vadd.f32 %v2236_v36, %v2235_v29  ;;  %v2120_v26 = vmul.f32 0.0078125, %v2118_v37 }
 0x4df   :  { %v2238_v40 = vrot.slane %v2237_v35, 2  ;;  %2155 = vrot.lane.b32.xlu0 %v2120_v26, %s5515_s23  ;;  %2152 = vrot.lane.b32.xlu1 %v2120_v26, %s5528_s10 }
 0x4e1   :  { %v2239_v58 = vadd.f32 %v2238_v40, %v2237_v35 }
 0x4e3   :  { %2161 = vrot.lane.b32.xlu0 %v2120_v26, %s5524_s29  ;;  %2158 = vrot.lane.b32.xlu1 %v2120_v26, %s5527_s9  ;;  %v2240_v42 = vrot.slane %v2239_v58, 1 }
 0x4e5   :  { %v2241_v43 = vadd.f32 %v2240_v42, %v2239_v58 }
 0x4e7   :  { %2167 = vrot.lane.b32.xlu0 %v2120_v26, %s5523_s0  ;;  %2164 = vrot.lane.b32.xlu1 %v2120_v26, %s5526_s8 }
 0x4eb   :  { %2273 = vrot.lane.b32.xlu0 %v2241_v43, %s5525_s30  ;;  %2170 = vrot.lane.b32.xlu1 %v2120_v26, %s5525_s30 }
 0x4ef   :  { %2281 = vrot.lane.b32.xlu0 %v2241_v43, %s5526_s8  ;;  %2277 = vrot.lane.b32.xlu1 %v2241_v43, %s5523_s0 }
 0x4f3   :  { %2289 = vrot.lane.b32.xlu0 %v2241_v43, %s5527_s9  ;;  %2285 = vrot.lane.b32.xlu1 %v2241_v43, %s5524_s29 }
 0x4f7   :  { %2297 = vrot.lane.b32.xlu0 %v2241_v43, %s5528_s10  ;;  %2293 = vrot.lane.b32.xlu1 %v2241_v43, %s5515_s23 }
 0x551   :  { %v2156_v46 = vpop.permute.xlu0 %2155  ;;  %v2153_v17 = vpop.permute.xlu1 %2152 }
 0x552   :  { %v2174_v48 = vsel %vm2173_vm12, %v2120_v26, %v2153_v17 }
 0x553   :  { %v2175_v50 = vsel %vm905_vm3, %v2174_v48, %v2156_v46 }
 0x555   :  { %v2162_v49 = vpop.permute.xlu0 %2161  ;;  %v2159_v23 = vpop.permute.xlu1 %2158 }
 0x556   :  { %v2177_v51 = vsel %vm2176_vm13, %v2175_v50, %v2159_v23 }
 0x557   :  { %v2178_v38 = vsel %vm886_vm2, %v2177_v51, %v2162_v49 }
 0x559   :  { %v2168_v47 = vpop.permute.xlu0 %2167  ;;  %v2165_v44 = vpop.permute.xlu1 %2164 }
 0x55a   :  { %v2179_v52 = vsel %vm322_vm0, %v2178_v38, %v2165_v44 }
 0x55b   :  { %v2180_v24 = vsel %vm908_vm9, %v2179_v52, %v2168_v47 }
 0x55d   :  { %v2274_v53 = vpop.permute.xlu0 %2273  ;;  %v2171_v39 = vpop.permute.xlu1 %2170 }
 0x55e   :  { %v2182_v56 = vsel %vm2181_vm14, %v2180_v24, %v2171_v39  ;;  %v2276_v59 = vadd.f32 %v2274_v53, %v2241_v43 }
 0x55f   :  { %v2215_v57 = vrot.slane %v2182_v56, %v5759_v33 }
 0x561   :  { %v5995_v30 = vsub.f32 %v5921_v34, %v2215_v57  ;;  %v5998_v1 = vsub.f32 %v5925_v27, %v2215_v57  ;;  %v2282_v2 = vpop.permute.xlu0 %2281  ;;  %v2278_v3 = vpop.permute.xlu1 %2277 }
 0x562   :  { %v2280_v4 = vadd.f32 %v2278_v3, %v2276_v59 }
 0x563   :  { %v2224_v32 = vmul.f32 %v5995_v30, %v5995_v30  ;;  %v2226_v7 = vmul.f32 %v5998_v1, %v5998_v1 }
 0x564   :  { %v2284_v10 = vadd.f32 %v2282_v2, %v2280_v4 }
 0x565   :  { %v2228_v12 = vadd.f32 %v2226_v7, %v2224_v32  ;;  %v2290_v9 = vpop.permute.xlu0 %2289  ;;  %v2286_v13 = vpop.permute.xlu1 %2285 }
 0x566   :  { %v2288_v5 = vadd.f32 %v2286_v13, %v2284_v10 }
 0x567   :  { %v2229_v14 = vrot.slane %v2228_v12, 4 }
 0x568   :  { %v2292_v34 = vadd.f32 %v2290_v9, %v2288_v5 }
 0x569   :  { %v2230_v8 = vadd.f32 %v2229_v14, %v2228_v12  ;;  %v2294_v15 = vpop.permute.xlu1 %2293  ;;  %v2298_v18 = vpop.permute.xlu0 %2297 }
 0x56a   :  { %v2296_v27 = vadd.f32 %v2294_v15, %v2292_v34 }
 0x56b   :  { %v2231_v16 = vrot.slane %v2230_v8, 2 }
 0x56c   :  { %v2300_v19 = vadd.f32 %v2298_v18, %v2296_v27 }
 0x56d   :  { %v2232_v20 = vadd.f32 %v2231_v16, %v2230_v8 }
 0x56e   :  { %v2301_v60 = vmul.f32 0.0078125, %v2300_v19 }
 0x56f   :  { %v2233_v21 = vrot.slane %v2232_v20, 1 }
 0x570   :  { %v2305_v61 = vadd.f32 1e-05, %v2301_v60 }
 0x571   :  { %v2234_v62 = vadd.f32 %v2233_v21, %v2232_v20 }
 0x572   :  { %5397 = vrsqrt.f32 %v2305_v61 }
 0x573   :  { %2247 = vrot.lane.b32.xlu0 %v2234_v62, %s5523_s0  ;;  %2243 = vrot.lane.b32.xlu1 %v2234_v62, %s5525_s30 }
 0x577   :  { %2255 = vrot.lane.b32.xlu0 %v2234_v62, %s5524_s29  ;;  %2251 = vrot.lane.b32.xlu1 %v2234_v62, %s5526_s8 }
 0x57b   :  { %2263 = vrot.lane.b32.xlu0 %v2234_v62, %s5515_s23  ;;  %2259 = vrot.lane.b32.xlu1 %v2234_v62, %s5527_s9 }
 0x57c   :  { %v5398_v63 = vpop.eup %5397 }
 0x57f   :  { %2267 = vrot.lane.b32.xlu1 %v2234_v62, %s5528_s10  ;;  %2308 = vrot.lane.b32.xlu0 %v5398_v63, %s5528_s10 }
 0x583   :  { %2401 = vrot.lane.b32.xlu0 %v6015_v41, %s5525_s30  ;;  %2395 = vrot.lane.b32.xlu1 %v6015_v41, %s5526_s8 }
 0x587   :  { %2383 = vrot.lane.b32.xlu0 %v6015_v41, %s5528_s10 }
 0x58b   :  { %2386 = vrot.lane.b32.xlu0 %v6015_v41, %s5515_s23 }
 0x58f   :  { %2389 = vrot.lane.b32.xlu0 %v6015_v41, %s5527_s9 }
 0x593   :  { %2392 = vrot.lane.b32.xlu0 %v6015_v41, %s5524_s29 }
 0x597   :  { %2398 = vrot.lane.b32.xlu0 %v6015_v41, %s5523_s0 }
 0x5e5   :  { %v2248_v22 = vpop.permute.xlu0 %2247  ;;  %v2244_v25 = vpop.permute.xlu1 %2243 }
 0x5e6   :  { %v2246_v28 = vadd.f32 %v2244_v25, %v2234_v62 }
 0x5e8   :  { %v2250_v54 = vadd.f32 %v2248_v22, %v2246_v28 }
 0x5e9   :  { %v2256_v29 = vpop.permute.xlu0 %2255  ;;  %v2252_v55 = vpop.permute.xlu1 %2251 }
 0x5ea   :  { %v2254_v31 = vadd.f32 %v2252_v55, %v2250_v54 }
 0x5ec   :  { %v2258_v36 = vadd.f32 %v2256_v29, %v2254_v31 }
 0x5ed   :  { %v2260_v37 = vpop.permute.xlu1 %2259  ;;  %v2264_v26 = vpop.permute.xlu0 %2263 }
 0x5ee   :  { %v2262_v35 = vadd.f32 %v2260_v37, %v2258_v36 }
 0x5f0   :  { %v2266_v40 = vadd.f32 %v2264_v26, %v2262_v35 }
 0x5f1   :  { %v2268_v58 = vpop.permute.xlu1 %2267  ;;  %v2309_v49 = vpop.permute.xlu0 %2308 }
 0x5f2   :  { %v2270_v42 = vadd.f32 %v2268_v58, %v2266_v40  ;;  %v2311_v50 = vmul.f32 %v2309_v49, %v6015_v41 }
 0x5f4   :  { %v2271_v43 = vmul.f32 0.0078125, %v2270_v42 }
 0x5f5   :  { %v2402_v23 = vpop.permute.xlu0 %2401  ;;  %v2396_v38 = vpop.permute.xlu1 %2395 }
 0x5f6   :  { %v2302_v46 = vadd.f32 1e-05, %v2271_v43  ;;  %v2411_v3 = vsel %vm2173_vm12, %v2402_v23, %v6015_v41 }
 0x5f8   :  { %5399 = vrsqrt.f32 %v2302_v46 }
 0x5f9   :  { %v2384_v51 = vpop.permute.xlu0 %2383 }
 0x5fa   :  { %v2412_v7 = vsel %vm905_vm3, %v2411_v3, %v2384_v51  ;;  %v2404_v60 = vsel %vm2173_vm12, %v6015_v41, %v2384_v51 }
 0x5fd   :  { %v2387_v47 = vpop.permute.xlu0 %2386 }
 0x5fe   :  { %v2413_v12 = vsel %vm2176_vm13, %v2412_v7, %v2387_v47  ;;  %v2405_v28 = vsel %vm905_vm3, %v2404_v60, %v2387_v47  ;;  %v5417_v47 = vld [vmem:[#allocation3] sm:$0xff] }
 0x5ff   :  { %2455 = vst.msk [vmem:[#allocation3 + $0x70] sm:$0xf] %vm2454_vm15, %v5417_v47  ;;  %v5234_v60 = vld [vmem:[#allocation9 + $0x194] ss:$8 sps:$4 sm:$0xff]   ;;  %vm4157_vm15 = vcmask 588800  }
 0x601   :  { %v2390_v44 = vpop.permute.xlu0 %2389 }
 0x602   :  { %v5400_v17 = vpop.eup %5399  ;;  %v2414_v13 = vsel %vm886_vm2, %v2413_v12, %v2390_v44  ;;  %v2406_v36 = vsel %vm2176_vm13, %v2405_v28, %v2390_v44  ;;  %v5211_v12 = vld [vmem:[#allocation9 + $0x120] ss:$8 sps:$4 sm:$0xff]  }
 0x603   :  { %v2304_v48 = vmul.f32 %v5400_v17, %v6015_v41  ;;  %v5241_v28 = vld [vmem:[#allocation9 + $0x1c0] ss:$8 sps:$4 sm:$0xff]  }
 0x605   :  { %2316 = vrot.lane.b32.xlu0 %v2304_v48, %s5515_s23  ;;  %2313 = vrot.lane.b32.xlu1 %v2304_v48, %s5528_s10  ;;  %v2393_v53 = vpop.permute.xlu0 %2392 }
 0x606   :  { %v2415_v34 = vsel %vm322_vm0, %v2414_v13, %v2393_v53  ;;  %v2407_v43 = vsel %vm886_vm2, %v2406_v36, %v2393_v53  ;;  %v5214_v13 = vld [vmem:[#allocation9 + $0x130] ss:$8 sps:$4 sm:$0xff]   ;;  %v5252_v36 = vld [vmem:[#allocation9 + $0x1f4] ss:$8 sps:$4 sm:$0xff]  }
 0x607   :  { %v2416_v18 = vsel %vm908_vm9, %v2415_v34, %v2396_v38  ;;  %v5222_v34 = vld [vmem:[#allocation9 + $0x154] ss:$8 sps:$4 sm:$0xff]  }
 0x609   :  { %2322 = vrot.lane.b32.xlu0 %v2304_v48, %s5524_s29  ;;  %2319 = vrot.lane.b32.xlu1 %v2304_v48, %s5527_s9  ;;  %v2399_v56 = vpop.permute.xlu0 %2398 }
 0x60a   :  { %v2417_v63 = vsel %vm2181_vm14, %v2416_v18, %v2399_v56  ;;  %v5226_v18 = vld [vmem:[#allocation9 + $0x170] ss:$8 sps:$4 sm:$0xff]  }
 0x60b   :  { %v2425_v29 = vrot.slane %v2417_v63, %v5783_v11  ;;  %v5240_v63 = vld [vmem:[#allocation9 + $0x1b4] ss:$8 sps:$4 sm:$0xff]  }
 0x60d   :  { %2328 = vrot.lane.b32.xlu0 %v2304_v48, %s5523_s0  ;;  %2325 = vrot.lane.b32.xlu1 %v2304_v48, %s5526_s8 }
 0x611   :  { %2345 = vrot.lane.b32.xlu0 %v2311_v50, %s5528_s10  ;;  %2331 = vrot.lane.b32.xlu1 %v2304_v48, %s5525_s30 }
 0x615   :  { %2342 = vrot.lane.b32.xlu1 %v2311_v50, %s5525_s30 }
 0x619   :  { %2348 = vrot.lane.b32.xlu1 %v2311_v50, %s5515_s23 }
 0x61d   :  { %2351 = vrot.lane.b32.xlu1 %v2311_v50, %s5527_s9 }
 0x621   :  { %2354 = vrot.lane.b32.xlu1 %v2311_v50, %s5524_s29 }
 0x625   :  { %2357 = vrot.lane.b32.xlu1 %v2311_v50, %s5526_s8 }
 0x629   :  { %2360 = vrot.lane.b32.xlu1 %v2311_v50, %s5523_s0 }
 0x677   :  { %v2314_v52 = vpop.permute.xlu1 %2313  ;;  %v2317_v59 = vpop.permute.xlu0 %2316 }
 0x678   :  { %v2334_v21 = vsel %vm2173_vm12, %v2304_v48, %v2314_v52 }
 0x679   :  { %v2335_v54 = vsel %vm905_vm3, %v2334_v21, %v2317_v59  ;;  %v5232_v21 = vld [vmem:[#allocation9 + $0x190] ss:$8 sps:$4 sm:$0xff]  }
 0x67b   :  { %v2320_v24 = vpop.permute.xlu1 %2319  ;;  %v2323_v4 = vpop.permute.xlu0 %2322 }
 0x67c   :  { %v2336_v55 = vsel %vm2176_vm13, %v2335_v54, %v2320_v24  ;;  %v5246_v54 = vld [vmem:[#allocation9 + $0x1d4] ss:$8 sps:$4 sm:$0xff]  }
 0x67d   :  { %v2337_v26 = vsel %vm886_vm2, %v2336_v55, %v2323_v4  ;;  %v5249_v55 = vld [vmem:[#allocation9 + $0x1e4] ss:$8 sps:$4 sm:$0xff]  }
 0x67f   :  { %v2326_v39 = vpop.permute.xlu1 %2325  ;;  %v2329_v9 = vpop.permute.xlu0 %2328 }
 0x680   :  { %v2338_v40 = vsel %vm322_vm0, %v2337_v26, %v2326_v39  ;;  %v5258_v26 = vld [vmem:[#allocation9 + $0x214] ss:$8 sps:$4 sm:$0xff]  }
 0x681   :  { %v2339_v46 = vsel %vm908_vm9, %v2338_v40, %v2329_v9  ;;  %v5216_v9 = vld [vmem:[#allocation9 + $0x134] ss:$8 sps:$4 sm:$0xff]   ;;  %v5256_v40 = vld [vmem:[#allocation9 + $0x210] ss:$8 sps:$4 sm:$0xff]  }
 0x683   :  { %v2332_v57 = vpop.permute.xlu1 %2331  ;;  %v2346_v8 = vpop.permute.xlu0 %2345 }
 0x687   :  { %v2343_v2 = vpop.permute.xlu1 %2342 }
 0x688   :  { %v2363_v14 = vsel %vm2173_vm12, %v2343_v2, %v2311_v50 }
 0x689   :  { %v2364_v15 = vsel %vm905_vm3, %v2363_v14, %v2346_v8  ;;  %v5217_v14 = vld [vmem:[#allocation9 + $0x140] ss:$8 sps:$4 sm:$0xff]   ;;  %v5220_v8 = vld [vmem:[#allocation9 + $0x150] ss:$8 sps:$4 sm:$0xff]  }
 0x68b   :  { %v2349_v32 = vpop.permute.xlu1 %2348 }
 0x68c   :  { %v2365_v16 = vsel %vm2176_vm13, %v2364_v15, %v2349_v32  ;;  %v5225_v15 = vld [vmem:[#allocation9 + $0x164] ss:$8 sps:$4 sm:$0xff]  }
 0x68f   :  { %v2352_v10 = vpop.permute.xlu1 %2351 }
 0x690   :  { %v2366_v19 = vsel %vm886_vm2, %v2365_v16, %v2352_v10  ;;  %v5213_v10 = vld [vmem:[#allocation9 + $0x124] ss:$8 sps:$4 sm:$0xff]   ;;  %v5228_v16 = vld [vmem:[#allocation9 + $0x174] ss:$8 sps:$4 sm:$0xff]  }
 0x691   :  { %3201 = vmatprep.subr.bf16.mxu1 %v5213_v10 }
 0x692   :  { %3202 = vmatpush1.bf16.msra.mxu1 %v5211_v12 }
 0x693   :  { %v2355_v5 = vpop.permute.xlu1 %2354  ;;  %3203 = vmatprep.subr.bf16.mxu1 %v5216_v9 }
 0x694   :  { %v2367_v20 = vsel %vm322_vm0, %v2366_v19, %v2355_v5  ;;  %v5219_v5 = vld [vmem:[#allocation9 + $0x144] ss:$8 sps:$4 sm:$0xff]  }
 0x695   :  { %v5231_v19 = vld [vmem:[#allocation9 + $0x184] ss:$8 sps:$4 sm:$0xff]  }
 0x696   :  { %3204 = vmatpush1.bf16.msra.mxu1 %v5214_v13 }
 0x697   :  { %v2358_v27 = vpop.permute.xlu1 %2357  ;;  %3205 = vmatprep.subr.bf16.mxu1 %v5219_v5 }
 0x698   :  { %v2368_v61 = vsel %vm908_vm9, %v2367_v20, %v2358_v27  ;;  %v5223_v27 = vld [vmem:[#allocation9 + $0x160] ss:$8 sps:$4 sm:$0xff]  }
 0x699   :  { %v5229_v20 = vld [vmem:[#allocation9 + $0x180] ss:$8 sps:$4 sm:$0xff]  }
 0x69a   :  { %3206 = vmatpush1.bf16.msra.mxu1 %v5217_v14 }
 0x69b   :  { %v2361_v62 = vpop.permute.xlu1 %2360  ;;  %3207 = vmatprep.subr.bf16.mxu1 %v5222_v34 }
 0x69c   :  { %v2369_v22 = vsel %vm2181_vm14, %v2368_v61, %v2361_v62  ;;  %v5237_v61 = vld [vmem:[#allocation9 + $0x1a4] ss:$8 sps:$4 sm:$0xff]   ;;  %v5235_v62 = vld [vmem:[#allocation9 + $0x1a0] ss:$8 sps:$4 sm:$0xff]  }
 0x69d   :  { %v2377_v25 = vrot.slane %v2369_v22, %v5759_v33  ;;  %v5238_v22 = vld [vmem:[#allocation9 + $0x1b0] ss:$8 sps:$4 sm:$0xff]  }
 0x69e   :  { %3208 = vmatpush1.bf16.msra.mxu1 %v5220_v8 }
 0x69f   :  { %v2379_v41 = vmul.f32 %v2377_v25, %v5963_v6  ;;  %v2381_v31 = vmul.f32 %v2377_v25, %v5966_v45  ;;  %v2408_v6 = vsel %vm322_vm0, %v2407_v43, %v2396_v38  ;;  %v2340_v45 = vsel %vm2181_vm14, %v2339_v46, %v2332_v57  ;;  %3209 = vmatprep.subr.bf16.mxu1 %v5225_v15  ;;  %v5243_v25 = vld [vmem:[#allocation9 + $0x1c4] ss:$8 sps:$4 sm:$0xff]  }
 0x6a0   :  { %v2409_v17 = vsel %vm908_vm9, %v2408_v6, %v2399_v56  ;;  %v2373_v48 = vrot.slane %v2340_v45, %v5759_v33 }
 0x6a1   :  { %v2427_v37 = vadd.f32 %v2425_v29, %v2379_v41  ;;  %v2429_v35 = vadd.f32 %v2425_v29, %v2381_v31  ;;  %v2410_v49 = vsel %vm2181_vm14, %v2409_v17, %v2402_v23  ;;  %v5244_v29 = vld [vmem:[#allocation9 + $0x1d0] ss:$8 sps:$4 sm:$0xff]   ;;  %v5247_v41 = vld [vmem:[#allocation9 + $0x1e0] ss:$8 sps:$4 sm:$0xff]  }
 0x6a2   :  { %v2378_v50 = vmul.f32 %v2373_v48, %v5995_v30  ;;  %v2421_v52 = vrot.slane %v2410_v49, %v5783_v11  ;;  %v2380_v38 = vmul.f32 %v2373_v48, %v5998_v1  ;;  %3210 = vmatpush1.bf16.msra.mxu1 %v5223_v27  ;;  %v5250_v31 = vld [vmem:[#allocation9 + $0x1f0] ss:$8 sps:$4 sm:$0xff]  }
 0x6a3   :  { %v2430_v58 = vmul.f32 0.5, %v2427_v37  ;;  %v2431_v42 = vmul.f32 0.5, %v2429_v35  ;;  %3211 = vmatprep.subr.bf16.mxu1 %v5228_v16  ;;  %v5255_v37 = vld [vmem:[#allocation9 + $0x204] ss:$8 sps:$4 sm:$0xff]   ;;  %v5253_v35 = vld [vmem:[#allocation9 + $0x200] ss:$8 sps:$4 sm:$0xff]  }
 0x6a4   :  { %v2426_v39 = vadd.f32 %v2421_v52, %v2378_v50  ;;  %v2428_v2 = vadd.f32 %v2421_v52, %v2380_v38 }
 0x6a5   :  { %5401 = vtanh.f32 %v2430_v58  ;;  %v5261_v58 = vld [vmem:[#allocation9 + $0x224] ss:$8 sps:$4 sm:$0xff]  }
 0x6a6   :  { %5403 = vtanh.f32 %v2431_v42  ;;  %3212 = vmatpush1.bf16.msra.mxu1 %v5226_v18 }
 0x6a7   :  { %3213 = vmatprep.subr.bf16.mxu1 %v5231_v19 }
 0x6aa   :  { %3214 = vmatpush1.bf16.msra.mxu1 %v5229_v20 }
 0x6ab   :  { %3215 = vmatprep.subr.bf16.mxu1 %v5234_v60 }
 0x6ae   :  { %3216 = vmatpush1.bf16.msra.mxu1 %v5232_v21 }
 0x6af   :  { %v5402_v51 = vpop.eup %5401  ;;  %3217 = vmatprep.subr.bf16.mxu1 %v5237_v61 }
 0x6b0   :  { %v5404_v44 = vpop.eup %5403  ;;  %v2434_v53 = vadd.f32 1.0, %v5402_v51 }
 0x6b1   :  { %v2435_v24 = vadd.f32 1.0, %v5404_v44 }
 0x6b2   :  { %v2436_v57 = vmul.f32 0.5, %v2434_v53  ;;  %3218 = vmatpush1.bf16.msra.mxu1 %v5235_v62 }
 0x6b3   :  { %v2437_v56 = vmul.f32 0.5, %v2435_v24  ;;  %3219 = vmatprep.subr.bf16.mxu1 %v5240_v63 }
 0x6b4   :  { %v6085_v59 = vmul.f32 %v2436_v57, %v2426_v39 }
 0x6b5   :  { %v6091_v30 = vmul.f32 %v2437_v56, %v2428_v2 }
 0x6b6   :  { %2469 = vrot.lane.b32.xlu1 %v6085_v59, %s5526_s8  ;;  %2457 = vrot.lane.b32.xlu0 %v6085_v59, %s5528_s10  ;;  %v6098_v1 = vrot.slane %v6085_v59, 2  ;;  %v6109_v23 = vrot.slane %v6085_v59, 4  ;;  %v6116_v3 = vrot.slane %v6085_v59, 6 }
 0x6b7   :  { %v6127_v4 = vrot.slane %v6091_v30, 2  ;;  %v6138_v32 = vrot.slane %v6091_v30, 4  ;;  %v6145_v7 = vrot.slane %v6091_v30, 6  ;;  %3220 = vmatpush1.bf16.msra.mxu1 %v5238_v22 }
 0x6b8   :  { %3221 = vmatprep.subr.bf16.mxu1 %v5243_v25 }
 0x6ba   :  { %2688 = vrot.lane.b32.xlu1 %v6091_v30, %s5526_s8  ;;  %2472 = vrot.lane.b32.xlu0 %v6085_v59, %s5523_s0 }
 0x6bb   :  { %3222 = vmatpush1.bf16.msra.mxu1 %v5241_v28 }
 0x6bc   :  { %3223 = vmatprep.subr.bf16.mxu1 %v5246_v54 }
 0x6be   :  { %2676 = vrot.lane.b32.xlu0 %v6091_v30, %s5528_s10  ;;  %2516 = vrot.lane.b32.xlu1 %v6098_v1, %s5528_s10 }
 0x6bf   :  { %3224 = vmatpush1.bf16.msra.mxu1 %v5244_v29 }
 0x6c0   :  { %3225 = vmatprep.subr.bf16.mxu1 %v5249_v55 }
 0x6c2   :  { %2691 = vrot.lane.b32.xlu0 %v6091_v30, %s5523_s0  ;;  %2531 = vrot.lane.b32.xlu1 %v6098_v1, %s5523_s0 }
 0x6c3   :  { %3226 = vmatpush1.bf16.msra.mxu1 %v5247_v41 }
 0x6c4   :  { %3227 = vmatprep.subr.bf16.mxu1 %v5252_v36 }
 0x6c6   :  { %2460 = vrot.lane.b32.xlu0 %v6085_v59, %s5515_s23  ;;  %2582 = vrot.lane.b32.xlu1 %v6109_v23, %s5526_s8 }
 0x6c7   :  { %3228 = vmatpush1.bf16.msra.mxu1 %v5250_v31 }
 0x6c8   :  { %3229 = vmatprep.subr.bf16.mxu1 %v5255_v37 }
 0x6ca   :  { %2679 = vrot.lane.b32.xlu0 %v6091_v30, %s5515_s23  ;;  %2626 = vrot.lane.b32.xlu1 %v6116_v3, %s5528_s10 }
 0x6cb   :  { %3230 = vmatpush1.bf16.msra.mxu1 %v5253_v35 }
 0x6cc   :  { %3231 = vmatprep.subr.bf16.mxu1 %v5258_v26 }
 0x6ce   :  { %2475 = vrot.lane.b32.xlu0 %v6085_v59, %s5525_s30  ;;  %2641 = vrot.lane.b32.xlu1 %v6116_v3, %s5523_s0 }
 0x6cf   :  { %3232 = vmatpush1.bf16.msra.mxu1 %v5256_v40 }
 0x6d0   :  { %3254 = vmatprep.subr.bf16.mxu1 %v5261_v58 }
 0x6d2   :  { %2694 = vrot.lane.b32.xlu0 %v6091_v30, %s5525_s30  ;;  %2733 = vrot.lane.b32.xlu1 %v6127_v4, %s5528_s10 }
 0x6d6   :  { %2463 = vrot.lane.b32.xlu0 %v6085_v59, %s5527_s9  ;;  %2748 = vrot.lane.b32.xlu1 %v6127_v4, %s5523_s0 }
 0x6da   :  { %2682 = vrot.lane.b32.xlu0 %v6091_v30, %s5527_s9  ;;  %2797 = vrot.lane.b32.xlu1 %v6138_v32, %s5526_s8 }
 0x6de   :  { %2466 = vrot.lane.b32.xlu0 %v6085_v59, %s5524_s29  ;;  %2841 = vrot.lane.b32.xlu1 %v6145_v7, %s5528_s10 }
 0x6e2   :  { %2685 = vrot.lane.b32.xlu0 %v6091_v30, %s5524_s29  ;;  %2856 = vrot.lane.b32.xlu1 %v6145_v7, %s5523_s0 }
 0x6e6   :  { %2528 = vrot.lane.b32.xlu0 %v6098_v1, %s5526_s8  ;;  %2519 = vrot.lane.b32.xlu1 %v6098_v1, %s5515_s23 }
 0x6ea   :  { %2570 = vrot.lane.b32.xlu0 %v6109_v23, %s5528_s10  ;;  %2629 = vrot.lane.b32.xlu1 %v6116_v3, %s5515_s23 }
 0x6ee   :  { %2585 = vrot.lane.b32.xlu0 %v6109_v23, %s5523_s0  ;;  %2736 = vrot.lane.b32.xlu1 %v6127_v4, %s5515_s23 }
 0x6f2   :  { %2638 = vrot.lane.b32.xlu0 %v6116_v3, %s5526_s8  ;;  %2844 = vrot.lane.b32.xlu1 %v6145_v7, %s5515_s23 }
 0x6f6   :  { %2745 = vrot.lane.b32.xlu0 %v6127_v4, %s5526_s8  ;;  %2534 = vrot.lane.b32.xlu1 %v6098_v1, %s5525_s30 }
 0x6fa   :  { %2785 = vrot.lane.b32.xlu0 %v6138_v32, %s5528_s10  ;;  %2644 = vrot.lane.b32.xlu1 %v6116_v3, %s5525_s30 }
 0x6fe   :  { %2800 = vrot.lane.b32.xlu0 %v6138_v32, %s5523_s0  ;;  %2751 = vrot.lane.b32.xlu1 %v6127_v4, %s5525_s30 }
 0x702   :  { %2853 = vrot.lane.b32.xlu0 %v6145_v7, %s5526_s8  ;;  %2859 = vrot.lane.b32.xlu1 %v6145_v7, %s5525_s30 }
 0x706   :  { %2573 = vrot.lane.b32.xlu0 %v6109_v23, %s5515_s23  ;;  %2522 = vrot.lane.b32.xlu1 %v6098_v1, %s5527_s9 }
 0x70a   :  { %2788 = vrot.lane.b32.xlu0 %v6138_v32, %s5515_s23  ;;  %2632 = vrot.lane.b32.xlu1 %v6116_v3, %s5527_s9 }
 0x70e   :  { %2588 = vrot.lane.b32.xlu0 %v6109_v23, %s5525_s30  ;;  %2739 = vrot.lane.b32.xlu1 %v6127_v4, %s5527_s9 }
 0x712   :  { %2803 = vrot.lane.b32.xlu0 %v6138_v32, %s5525_s30  ;;  %2847 = vrot.lane.b32.xlu1 %v6145_v7, %s5527_s9 }
 0x716   :  { %2576 = vrot.lane.b32.xlu0 %v6109_v23, %s5527_s9  ;;  %2525 = vrot.lane.b32.xlu1 %v6098_v1, %s5524_s29 }
 0x71a   :  { %2791 = vrot.lane.b32.xlu0 %v6138_v32, %s5527_s9  ;;  %2635 = vrot.lane.b32.xlu1 %v6116_v3, %s5524_s29 }
 0x71e   :  { %2579 = vrot.lane.b32.xlu0 %v6109_v23, %s5524_s29  ;;  %2742 = vrot.lane.b32.xlu1 %v6127_v4, %s5524_s29 }
 0x722   :  { %2794 = vrot.lane.b32.xlu0 %v6138_v32, %s5524_s29  ;;  %2850 = vrot.lane.b32.xlu1 %v6145_v7, %s5524_s29 }
 0x728   :  { %v2470_v42 = vpop.permute.xlu1 %2469  ;;  %v6219_v43 = vpop.permute.xlu0 %2457 }
 0x729   :  { %v2491_v46 = vsel %vm2173_vm12, %v6219_v43, 0.0  ;;  %v2478_v41 = vsel %vm2173_vm12, 0.0, %v6219_v43 }
 0x72a   :  { %v2497_v6 = vrot.slane %v2491_v46, 6  ;;  %v2507_v45 = vrot.slane %v2491_v46, 4  ;;  %v2551_v17 = vrot.slane %v2491_v46, 2 }
 0x72c   :  { %2504 = vst.msk [vmem:[#allocation3 + $0x10] sm:$0xc] %vm2503_vm1, %v2497_v6  ;;  %v2557_v48 = vrot.slane %v2551_v17, 2  ;;  %v2609_v49 = vrot.slane %v2507_v45, 6  ;;  %v2618_v50 = vrot.slane %v2507_v45, 4  ;;  %v2665_v51 = vrot.slane %v2497_v6, 2  ;;  %v2689_v47 = vpop.permute.xlu1 %2688  ;;  %v2473_v44 = vpop.permute.xlu0 %2472 }
 0x72d   :  { %2514 = vst.msk [vmem:[#allocation3 + $0x10] sm:$0x30] %vm2513_vm4, %v2507_v45  ;;  %v2485_v15 = vsel %vm905_vm3, %v2470_v42, %v2473_v44 }
 0x72e   :  { %2568 = vst.msk [vmem:[#allocation3 + $0x28] sm:$0x3] %vm2567_vm5, %v2551_v17  ;;  %2674 = vst.msk [vmem:[#allocation3 + $0x40] sm:$0x3] %vm2567_vm5, %v2497_v6  ;;  %v2486_v27 = vsel %vm2176_vm13, %v2485_v15, %v2473_v44 }
 0x72f   :  { %2564 = vst.msk [vmem:[#allocation3 + $0x10] sm:$0xc0] %vm2563_vm6, %v2557_v48  ;;  %2671 = vst.msk [vmem:[#allocation3 + $0x28] sm:$0xc0] %vm2563_vm6, %v2665_v51 }
 0x730   :  { %2615 = vst.msk [vmem:[#allocation3 + $0x28] sm:$0xc] %vm2503_vm1, %v2609_v49  ;;  %v2677_v52 = vpop.permute.xlu0 %2676  ;;  %v6231_v53 = vpop.permute.xlu1 %2516 }
 0x731   :  { %2624 = vst.msk [vmem:[#allocation3 + $0x28] sm:$0x30] %vm2513_vm4, %v2618_v50  ;;  %v2710_v24 = vsel %vm2173_vm12, %v2677_v52, 0.0  ;;  %v2697_v40 = vsel %vm2173_vm12, 0.0, %v2677_v52 }
 0x732   :  { %v2716_v38 = vrot.slane %v2710_v24, 6  ;;  %v2725_v39 = vrot.slane %v2710_v24, 4  ;;  %v2768_v57 = vrot.slane %v2710_v24, 2 }
 0x734   :  { %2722 = vst.msk [vmem:[#allocation3 + $0x40] sm:$0xc] %vm2503_vm1, %v2716_v38  ;;  %v2774_v56 = vrot.slane %v2768_v57, 2  ;;  %v2824_v2 = vrot.slane %v2725_v39, 6  ;;  %v2833_v10 = vrot.slane %v2725_v39, 4  ;;  %v2880_v12 = vrot.slane %v2716_v38, 2  ;;  %v2692_v9 = vpop.permute.xlu0 %2691  ;;  %v6238_v13 = vpop.permute.xlu1 %2531 }
 0x735   :  { %2731 = vst.msk [vmem:[#allocation3 + $0x40] sm:$0x30] %vm2513_vm4, %v2725_v39  ;;  %v2704_v19 = vsel %vm905_vm3, %v2689_v47, %v2692_v9 }
 0x736   :  { %2783 = vst.msk [vmem:[#allocation3 + $0x58] sm:$0x3] %vm2567_vm5, %v2768_v57  ;;  %2889 = vst.msk [vmem:[#allocation3 + $0x70] sm:$0x3] %vm2567_vm5, %v2716_v38  ;;  %v2705_v61 = vsel %vm2176_vm13, %v2704_v19, %v2692_v9  ;;  %vm4166_vm5 = vcmask 982016  }
 0x737   :  { %2780 = vst.msk [vmem:[#allocation3 + $0x40] sm:$0xc0] %vm2563_vm6, %v2774_v56  ;;  %2886 = vst.msk [vmem:[#allocation3 + $0x58] sm:$0xc0] %vm2563_vm6, %v2880_v12 }
 0x738   :  { %2830 = vst.msk [vmem:[#allocation3 + $0x58] sm:$0xc] %vm2503_vm1, %v2824_v2  ;;  %v2461_v5 = vpop.permute.xlu0 %2460  ;;  %v6244_v14 = vpop.permute.xlu1 %2582  ;;  %vm4160_vm1 = vcmask 719872  }
 0x739   :  { %2839 = vst.msk [vmem:[#allocation3 + $0x58] sm:$0x30] %vm2513_vm4, %v2833_v10  ;;  %v2479_v37 = vsel %vm905_vm3, %v2478_v41, %v2461_v5  ;;  %vm4163_vm4 = vcmask 850944  }
 0x73a   :  { %v2480_v58 = vsel %vm2176_vm13, %v2479_v37, %v2461_v5 }
 0x73c   :  { %v2680_v34 = vpop.permute.xlu0 %2679  ;;  %v6246_v8 = vpop.permute.xlu1 %2626 }
 0x73d   :  { %v2698_v43 = vsel %vm905_vm3, %v2697_v40, %v2680_v34 }
 0x740   :  { %v2476_v16 = vpop.permute.xlu0 %2475  ;;  %v6250_v18 = vpop.permute.xlu1 %2641 }
 0x741   :  { %v2487_v20 = vsel %vm886_vm2, %v2486_v27, %v2476_v16 }
 0x742   :  { %v2488_v60 = vsel %vm322_vm0, %v2487_v20, %v2476_v16 }
 0x743   :  { %v2489_v21 = vsel %vm908_vm9, %v2488_v60, %v6085_v59 }
 0x744   :  { %v2490_v62 = vsel %vm2181_vm14, %v2489_v21, %v6085_v59  ;;  %v2695_v63 = vpop.permute.xlu0 %2694  ;;  %v6260_v22 = vpop.permute.xlu1 %2733 }
 0x745   :  { %v2496_v25 = vrot.slane %v2490_v62, 6  ;;  %v2506_v28 = vrot.slane %v2490_v62, 4  ;;  %v2706_v54 = vsel %vm886_vm2, %v2705_v61, %v2695_v63 }
 0x746   :  { %v2707_v29 = vsel %vm322_vm0, %v2706_v54, %v2695_v63 }
 0x747   :  { %2502 = vst [vmem:[#allocation3 + $0x8] sm:$0xc] %v2496_v25  ;;  %2512 = vst [vmem:[#allocation3 + $0x8] sm:$0x30] %v2506_v28  ;;  %v2708_v55 = vsel %vm908_vm9, %v2707_v29, %v6091_v30 }
 0x748   :  { %v2709_v59 = vsel %vm2181_vm14, %v2708_v55, %v6091_v30  ;;  %v2464_v31 = vpop.permute.xlu0 %2463  ;;  %v2749_v36 = vpop.permute.xlu1 %2748  ;;  %v2699_v30 = vsel %vm2176_vm13, %v2698_v43, %v2680_v34 }
 0x749   :  { %v2715_v35 = vrot.slane %v2709_v59, 6  ;;  %v2724_v26 = vrot.slane %v2709_v59, 4  ;;  %v2481_v6 = vsel %vm886_vm2, %v2480_v58, %v2464_v31 }
 0x74a   :  { %v2482_v45 = vsel %vm322_vm0, %v2481_v6, %v2464_v31 }
 0x74b   :  { %2721 = vst [vmem:[#allocation3 + $0x38] sm:$0xc] %v2715_v35  ;;  %2730 = vst [vmem:[#allocation3 + $0x38] sm:$0x30] %v2724_v26 }
 0x74c   :  { %v2683_v42 = vpop.permute.xlu0 %2682  ;;  %v6273_v46 = vpop.permute.xlu1 %2797 }
 0x74d   :  { %v2700_v49 = vsel %vm886_vm2, %v2699_v30, %v2683_v42 }
 0x74e   :  { %v2701_v52 = vsel %vm322_vm0, %v2700_v49, %v2683_v42 }
 0x750   :  { %v2467_v17 = vpop.permute.xlu0 %2466  ;;  %v6279_v48 = vpop.permute.xlu1 %2841 }
 0x751   :  { %v2483_v50 = vsel %vm908_vm9, %v2482_v45, %v2467_v17 }
 0x752   :  { %v2484_v51 = vsel %vm2181_vm14, %v2483_v50, %v2467_v17 }
 0x753   :  { %v2495_v47 = vrot.slane %v2484_v51, 6  ;;  %v2505_v44 = vrot.slane %v2484_v51, 4 }
 0x754   :  { %v2686_v24 = vpop.permute.xlu0 %2685  ;;  %v2857_v38 = vpop.permute.xlu1 %2856 }
 0x755   :  { %2501 = vst [vmem:[#allocation3] sm:$0xc] %v2495_v47  ;;  %2511 = vst [vmem:[#allocation3] sm:$0x30] %v2505_v44  ;;  %v2702_v39 = vsel %vm908_vm9, %v2701_v52, %v2686_v24 }
 0x756   :  { %v2703_v57 = vsel %vm2181_vm14, %v2702_v39, %v2686_v24 }
 0x757   :  { %v2714_v56 = vrot.slane %v2703_v57, 6  ;;  %v2723_v2 = vrot.slane %v2703_v57, 4  ;;  %v2538_v57 = vsel %vm2173_vm12, 0.0, %v6231_v53 }
 0x758   :  { %v2529_v10 = vpop.permute.xlu0 %2528  ;;  %v6287_v12 = vpop.permute.xlu1 %2519 }
 0x759   :  { %2720 = vst [vmem:[#allocation3 + $0x30] sm:$0xc] %v2714_v56  ;;  %2729 = vst [vmem:[#allocation3 + $0x30] sm:$0x30] %v2723_v2  ;;  %v2545_v19 = vsel %vm905_vm3, %v2529_v10, %v6238_v13 }
 0x75a   :  { %v2546_v20 = vsel %vm2176_vm13, %v2545_v19, %v6238_v13 }
 0x75c   :  { %v6289_v9 = vpop.permute.xlu0 %2570  ;;  %v6291_v5 = vpop.permute.xlu1 %2629 }
 0x760   :  { %v2586_v34 = vpop.permute.xlu0 %2585  ;;  %v6293_v15 = vpop.permute.xlu1 %2736 }
 0x764   :  { %v2639_v27 = vpop.permute.xlu0 %2638  ;;  %v6295_v16 = vpop.permute.xlu1 %2844 }
 0x765   :  { %v2655_v61 = vsel %vm905_vm3, %v2639_v27, %v6250_v18  ;;  %v2539_v27 = vsel %vm905_vm3, %v2538_v57, %v6287_v12 }
 0x766   :  { %v2656_v28 = vsel %vm2176_vm13, %v2655_v61, %v6250_v18 }
 0x768   :  { %v2746_v60 = vpop.permute.xlu0 %2745  ;;  %v2535_v21 = vpop.permute.xlu1 %2534 }
 0x769   :  { %v2547_v62 = vsel %vm886_vm2, %v2546_v20, %v2535_v21  ;;  %v2762_v55 = vsel %vm905_vm3, %v2746_v60, %v2749_v36 }
 0x76a   :  { %v2548_v63 = vsel %vm322_vm0, %v2547_v62, %v2535_v21  ;;  %v2763_v18 = vsel %vm2176_vm13, %v2762_v55, %v2749_v36 }
 0x76b   :  { %v2549_v25 = vsel %vm908_vm9, %v2548_v63, %v6098_v1 }
 0x76c   :  { %v2550_v54 = vsel %vm2181_vm14, %v2549_v25, %v6098_v1  ;;  %v6311_v29 = vpop.permute.xlu0 %2785  ;;  %v2645_v13 = vpop.permute.xlu1 %2644 }
 0x76d   :  { %v2556_v41 = vrot.slane %v2550_v54, 2  ;;  %2566 = vst [vmem:[#allocation3 + $0x20] sm:$0x3] %v2550_v54  ;;  %v2657_v59 = vsel %vm886_vm2, %v2656_v28, %v2645_v13 }
 0x76e   :  { %v2658_v31 = vsel %vm322_vm0, %v2657_v59, %v2645_v13  ;;  %v2592_v13 = vsel %vm2173_vm12, 0.0, %v6289_v9 }
 0x76f   :  { %2562 = vst [vmem:[#allocation3 + $0x8] sm:$0xc0] %v2556_v41  ;;  %v2659_v37 = vsel %vm908_vm9, %v2658_v31, %v6116_v3 }
 0x770   :  { %v2660_v1 = vsel %vm2181_vm14, %v2659_v37, %v6116_v3  ;;  %v2801_v35 = vpop.permute.xlu0 %2800  ;;  %v2752_v26 = vpop.permute.xlu1 %2751 }
 0x771   :  { %v2664_v40 = vrot.slane %v2660_v1, 2  ;;  %2673 = vst [vmem:[#allocation3 + $0x38] sm:$0x3] %v2660_v1  ;;  %v2764_v58 = vsel %vm886_vm2, %v2763_v18, %v2752_v26 }
 0x772   :  { %v2765_v42 = vsel %vm322_vm0, %v2764_v58, %v2752_v26 }
 0x773   :  { %2670 = vst [vmem:[#allocation3 + $0x20] sm:$0xc0] %v2664_v40  ;;  %v2766_v43 = vsel %vm908_vm9, %v2765_v42, %v6127_v4  ;;  %v2863_v40 = vsel %vm2173_vm12, 0.0, %v6279_v48 }
 0x774   :  { %v2767_v6 = vsel %vm2181_vm14, %v2766_v43, %v6127_v4  ;;  %v2854_v30 = vpop.permute.xlu0 %2853  ;;  %v2860_v36 = vpop.permute.xlu1 %2859  ;;  %v2807_v43 = vsel %vm2173_vm12, 0.0, %v6311_v29 }
 0x775   :  { %v2773_v45 = vrot.slane %v2767_v6, 2  ;;  %2782 = vst [vmem:[#allocation3 + $0x50] sm:$0x3] %v2767_v6  ;;  %v2870_v3 = vsel %vm905_vm3, %v2854_v30, %v2857_v38 }
 0x776   :  { %v2871_v17 = vsel %vm2176_vm13, %v2870_v3, %v2857_v38  ;;  %v2599_v38 = vsel %vm905_vm3, %v6244_v14, %v2586_v34  ;;  %v2648_v14 = vsel %vm2173_vm12, 0.0, %v6246_v8  ;;  %v2891_v57 = vld [vmem:[#allocation3 + $0x8] sm:$0xff] }
 0x777   :  { %2779 = vst [vmem:[#allocation3 + $0x38] sm:$0xc0] %v2773_v45  ;;  %v2872_v49 = vsel %vm886_vm2, %v2871_v17, %v2860_v36  ;;  %v2600_v56 = vsel %vm2176_vm13, %v2599_v38, %v2586_v34  ;;  %v2540_v34 = vsel %vm2176_vm13, %v2539_v27, %v6287_v12  ;;  %v2649_v60 = vsel %vm905_vm3, %v2648_v14, %v6291_v5 }
 0x778   :  { %v2873_v50 = vsel %vm322_vm0, %v2872_v49, %v2860_v36  ;;  %v2574_v51 = vpop.permute.xlu0 %2573  ;;  %v2523_v47 = vpop.permute.xlu1 %2522  ;;  %v2755_v12 = vsel %vm2173_vm12, 0.0, %v6260_v22 }
 0x779   :  { %v2874_v44 = vsel %vm908_vm9, %v2873_v50, %v6145_v7  ;;  %v2541_v63 = vsel %vm886_vm2, %v2540_v34, %v2523_v47  ;;  %v2756_v41 = vsel %vm905_vm3, %v2755_v12, %v6293_v15  ;;  %v2593_v59 = vsel %vm905_vm3, %v2592_v13, %v2574_v51 }
 0x77a   :  { %v2875_v4 = vsel %vm2181_vm14, %v2874_v44, %v6145_v7  ;;  %v2814_v7 = vsel %vm905_vm3, %v6273_v46, %v2801_v35  ;;  %v2542_v31 = vsel %vm322_vm0, %v2541_v63, %v2523_v47  ;;  %v2757_v58 = vsel %vm2176_vm13, %v2756_v41, %v6293_v15 }
 0x77b   :  { %v2879_v52 = vrot.slane %v2875_v4, 2  ;;  %2888 = vst [vmem:[#allocation3 + $0x68] sm:$0x3] %v2875_v4  ;;  %v2815_v21 = vsel %vm2176_vm13, %v2814_v7, %v2801_v35  ;;  %v2594_v6 = vsel %vm2176_vm13, %v2593_v59, %v2574_v51 }
 0x77c   :  { %v6335_v24 = vpop.permute.xlu0 %2788  ;;  %v2633_v39 = vpop.permute.xlu1 %2632 }
 0x77d   :  { %2885 = vst [vmem:[#allocation3 + $0x50] sm:$0xc0] %v2879_v52  ;;  %v2808_v48 = vsel %vm905_vm3, %v2807_v43, %v6335_v24 }
 0x77e   :  { %v2809_v47 = vsel %vm2176_vm13, %v2808_v48, %v6335_v24  ;;  %v2897_v7 = vld [vmem:[#allocation3 + $0x38] sm:$0xff] }
 0x77f   :  { %v2901_v48 = vld [vmem:[#allocation3 + $0x58] sm:$0xff] }
 0x780   :  { %v2589_v2 = vpop.permute.xlu0 %2588  ;;  %v2740_v10 = vpop.permute.xlu1 %2739 }
 0x781   :  { %v2601_v19 = vsel %vm886_vm2, %v2600_v56, %v2589_v2  ;;  %v2758_v15 = vsel %vm886_vm2, %v2757_v58, %v2740_v10 }
 0x782   :  { %v2602_v20 = vsel %vm322_vm0, %v2601_v19, %v2589_v2  ;;  %v2759_v44 = vsel %vm322_vm0, %v2758_v15, %v2740_v10  ;;  %v2903_v59 = vld [vmem:[#allocation3 + $0x68] sm:$0xf] }
 0x783   :  { %v2603_v53 = vsel %vm908_vm9, %v2602_v20, %v6109_v23 }
 0x784   :  { %v2604_v46 = vsel %vm2181_vm14, %v2603_v53, %v6109_v23  ;;  %v2804_v61 = vpop.permute.xlu0 %2803  ;;  %v6359_v62 = vpop.permute.xlu1 %2847  ;;  %v2650_v23 = vsel %vm2176_vm13, %v2649_v60, %v6291_v5 }
 0x785   :  { %v2608_v8 = vrot.slane %v2604_v46, 6  ;;  %v2617_v25 = vrot.slane %v2604_v46, 4  ;;  %v2816_v28 = vsel %vm886_vm2, %v2815_v21, %v2804_v61  ;;  %v2651_v18 = vsel %vm886_vm2, %v2650_v23, %v2633_v39 }
 0x786   :  { %v2817_v54 = vsel %vm322_vm0, %v2816_v28, %v2804_v61  ;;  %v2652_v30 = vsel %vm322_vm0, %v2651_v18, %v2633_v39  ;;  %v6426_v18 = vpack.c.bf16 %v2903_v59, %v2903_v59  ;;  %v5304_v59 = vld [vmem:[#allocation9 + $0xd0] ss:$8 sps:$4 sm:$0xff]  }
 0x787   :  { %2614 = vst [vmem:[#allocation3 + $0x20] sm:$0xc] %v2608_v8  ;;  %2623 = vst [vmem:[#allocation3 + $0x20] sm:$0x30] %v2617_v25  ;;  %v2818_v55 = vsel %vm908_vm9, %v2817_v54, %v6138_v32 }
 0x788   :  { %v2819_v22 = vsel %vm2181_vm14, %v2818_v55, %v6138_v32  ;;  %v2577_v37 = vpop.permute.xlu0 %2576  ;;  %v2526_v9 = vpop.permute.xlu1 %2525  ;;  %v2864_v32 = vsel %vm905_vm3, %v2863_v40, %v6295_v16  ;;  %v3007_v40 = vrot.slane %v6426_v18, 1 }
 0x789   :  { %v2823_v5 = vrot.slane %v2819_v22, 6  ;;  %v2832_v1 = vrot.slane %v2819_v22, 4  ;;  %v2543_v35 = vsel %vm908_vm9, %v2542_v31, %v2526_v9  ;;  %v2595_v3 = vsel %vm886_vm2, %v2594_v6, %v2577_v37 }
 0x78a   :  { %v2544_v26 = vsel %vm2181_vm14, %v2543_v35, %v2526_v9  ;;  %v2865_v29 = vsel %vm2176_vm13, %v2864_v32, %v6295_v16  ;;  %v2596_v52 = vsel %vm322_vm0, %v2595_v3, %v2577_v37  ;;  %v2892_v3 = vld [vmem:[#allocation3 + $0x10] sm:$0xff] }
 0x78b   :  { %2829 = vst [vmem:[#allocation3 + $0x50] sm:$0xc] %v2823_v5  ;;  %2838 = vst [vmem:[#allocation3 + $0x50] sm:$0x30] %v2832_v1  ;;  %v2555_v42 = vrot.slane %v2544_v26, 2  ;;  %v2866_v4 = vsel %vm886_vm2, %v2865_v29, %v6359_v62 }
 0x78c   :  { %2565 = vst [vmem:[#allocation3 + $0x18] sm:$0x3] %v2544_v26  ;;  %v2792_v36 = vpop.permute.xlu0 %2791  ;;  %v2636_v45 = vpop.permute.xlu1 %2635  ;;  %v2867_v60 = vsel %vm322_vm0, %v2866_v4, %v6359_v62  ;;  %v5259_v26 = vld [vmem:[#allocation9 + $0x220] ss:$8 sps:$4 sm:$0xff]   ;;  %v5270_v4 = vld [vmem:[#allocation9 + $0x14] ss:$8 sps:$4 sm:$0xff]  }
 0x78d   :  { %2561 = vst [vmem:[#allocation3] sm:$0xc0] %v2555_v42  ;;  %v2653_v17 = vsel %vm908_vm9, %v2652_v30, %v2636_v45  ;;  %v2810_v56 = vsel %vm886_vm2, %v2809_v47, %v2792_v36  ;;  %v5264_v42 = vld [vmem:[#allocation9 + $0x234] ss:$8 sps:$4 sm:$0xff]   ;;  %v5262_v30 = vld [vmem:[#allocation9 + $0x230] ss:$8 sps:$4 sm:$0xff]  }
 0x78e   :  { %v2654_v49 = vsel %vm2181_vm14, %v2653_v17, %v2636_v45  ;;  %v2894_v50 = vld [vmem:[#allocation3 + $0x20] sm:$0xff]  ;;  %v2811_v21 = vsel %vm322_vm0, %v2810_v56, %v2792_v36  ;;  %v5267_v36 = vld [vmem:[#allocation9 + $0x4] ss:$8 sps:$4 sm:$0xff]   ;;  %v5265_v47 = vld [vmem:[#allocation9] ss:$8 sps:$4 sm:$0xff]  }
 0x78f   :  { %v2663_v51 = vrot.slane %v2654_v49, 2  ;;  %2672 = vst [vmem:[#allocation3 + $0x30] sm:$0x3] %v2654_v49  ;;  %v6408_v27 = vpack.c.bf16 %v2894_v50, %v2891_v57  ;;  %v2898_v45 = vld [vmem:[#allocation3 + $0x40] sm:$0xff]  ;;  %v2895_v17 = vld [vmem:[#allocation3 + $0x28] sm:$0xff] }
 0x790   :  { %v2580_v39 = vpop.permute.xlu0 %2579  ;;  %v2743_v38 = vpop.permute.xlu1 %2742  ;;  %v6439_v50 = vpack.c.bf16 %v2901_v48, %v2898_v45  ;;  %v6442_v29 = vpack.c.bf16 %v2895_v17, %v2892_v3  ;;  %v5273_v56 = vld [vmem:[#allocation9 + $0x24] ss:$8 sps:$4 sm:$0xff]   ;;  %v5325_v48 = vld [vmem:[#allocation9 + $0x260] ss:$8 sps:$4 sm:$0xff]   ;;  %v5330_v3 = vld [vmem:[#allocation9 + $0x274] ss:$8 sps:$4 sm:$0xff]  }
 0x791   :  { %2669 = vst [vmem:[#allocation3 + $0x18] sm:$0xc0] %v2663_v51  ;;  %v2597_v16 = vsel %vm908_vm9, %v2596_v52, %v2580_v39  ;;  %v2760_v2 = vsel %vm908_vm9, %v2759_v44, %v2743_v38  ;;  %v2999_v25 = vrot.slane %v6408_v27, 1  ;;  %v2904_v52 = vld [vmem:[#allocation3 + $0x70] sm:$0xf] }
 0x792   :  { %v2598_v24 = vsel %vm2181_vm14, %v2597_v16, %v2580_v39  ;;  %v2761_v10 = vsel %vm2181_vm14, %v2760_v2, %v2743_v38  ;;  %v2900_v19 = vld [vmem:[#allocation3 + $0x50] sm:$0xff]  ;;  %v3003_v51 = vrot.slane %v6439_v50, 1  ;;  %v3002_v44 = vrot.slane %v6442_v29, 1  ;;  %v5268_v38 = vld [vmem:[#allocation9 + $0x10] ss:$8 sps:$4 sm:$0xff]  }
 0x793   :  { %v2607_v20 = vrot.slane %v2598_v24, 6  ;;  %v2616_v14 = vrot.slane %v2598_v24, 4  ;;  %v2772_v53 = vrot.slane %v2761_v10, 2  ;;  %2781 = vst [vmem:[#allocation3 + $0x48] sm:$0x3] %v2761_v10  ;;  %v6412_v34 = vpack.c.bf16 %v2900_v19, %v2897_v7 }
 0x794   :  { %v2795_v46 = vpop.permute.xlu0 %2794  ;;  %v2851_v61 = vpop.permute.xlu1 %2850  ;;  %v2890_v31 = vld [vmem:[#allocation3] sm:$0xff]  ;;  %v3004_v39 = vsel %vm1139_vm10, %v3002_v44, %v3003_v51  ;;  %v6449_v57 = vpack.c.bf16 %v2904_v52, %v2904_v52  ;;  %v5271_v16 = vld [vmem:[#allocation9 + $0x20] ss:$8 sps:$4 sm:$0xff]   ;;  %v5279_v19 = vld [vmem:[#allocation9 + $0x44] ss:$8 sps:$4 sm:$0xff]  }
 0x795   :  { %2613 = vst [vmem:[#allocation3 + $0x18] sm:$0xc] %v2607_v20  ;;  %2622 = vst [vmem:[#allocation3 + $0x18] sm:$0x30] %v2616_v14  ;;  %v2812_v63 = vsel %vm908_vm9, %v2811_v21, %v2795_v46  ;;  %v2868_v8 = vsel %vm908_vm9, %v2867_v60, %v2851_v61  ;;  %v3000_v28 = vrot.slane %v6412_v34, 1  ;;  %v3640_v45 = vrot.slane %v6412_v34, 2 }
 0x796   :  { %2778 = vst [vmem:[#allocation3 + $0x30] sm:$0xc0] %v2772_v53  ;;  %v2813_v54 = vsel %vm2181_vm14, %v2812_v63, %v2795_v46  ;;  %v2869_v12 = vsel %vm2181_vm14, %v2868_v8, %v2851_v61  ;;  %v3009_v2 = vrot.slane %v6449_v57, 1  ;;  %v5276_v24 = vld [vmem:[#allocation9 + $0x34] ss:$8 sps:$4 sm:$0xff]  }
 0x797   :  { %v2822_v62 = vrot.slane %v2813_v54, 6  ;;  %v2831_v13 = vrot.slane %v2813_v54, 4  ;;  %v2878_v23 = vrot.slane %v2869_v12, 2  ;;  %2887 = vst [vmem:[#allocation3 + $0x60] sm:$0x3] %v2869_v12  ;;  %v3001_v55 = vsel %vm1139_vm10, %v2999_v25, %v3000_v28 }
 0x798   :  { %3233 = vmatprep.mubr.bf16.mxu1 %v3001_v55  ;;  %v3008_v43 = vsel %vm1139_vm10, %v3000_v28, %v3007_v40  ;;  %v3010_v10 = vsel %vm1139_vm10, %v3003_v51, %v3009_v2  ;;  %v5274_v7 = vld [vmem:[#allocation9 + $0x30] ss:$8 sps:$4 sm:$0xff]   ;;  %v5277_v20 = vld [vmem:[#allocation9 + $0x40] ss:$8 sps:$4 sm:$0xff]   ;;  %v5282_v14 = vld [vmem:[#allocation9 + $0x54] ss:$8 sps:$4 sm:$0xff]  }
 0x799   :  { %2828 = vst [vmem:[#allocation3 + $0x48] sm:$0xc] %v2822_v62  ;;  %2837 = vst [vmem:[#allocation3 + $0x48] sm:$0x30] %v2831_v13  ;;  %v5280_v53 = vld [vmem:[#allocation9 + $0x50] ss:$8 sps:$4 sm:$0xff]  }
 0x79a   :  { %2884 = vst [vmem:[#allocation3 + $0x48] sm:$0xc0] %v2878_v23  ;;  %v5285_v60 = vld [vmem:[#allocation9 + $0x64] ss:$8 sps:$4 sm:$0xff]   ;;  %v5283_v21 = vld [vmem:[#allocation9 + $0x60] ss:$8 sps:$4 sm:$0xff]  }
 0x79b   :  { %v5288_v46 = vld [vmem:[#allocation9 + $0x74] ss:$8 sps:$4 sm:$0xff]   ;;  %v5286_v61 = vld [vmem:[#allocation9 + $0x70] ss:$8 sps:$4 sm:$0xff]   ;;  %v5291_v63 = vld [vmem:[#allocation9 + $0x84] ss:$8 sps:$4 sm:$0xff]  }
 0x79c   :  { %v2893_v41 = vld [vmem:[#allocation3 + $0x18] sm:$0xff]  ;;  %v5289_v8 = vld [vmem:[#allocation9 + $0x80] ss:$8 sps:$4 sm:$0xff]   ;;  %v5297_v54 = vld [vmem:[#allocation9 + $0xa4] ss:$8 sps:$4 sm:$0xff]  }
 0x79d   :  { %v6424_v22 = vpack.c.bf16 %v2893_v41, %v2890_v31  ;;  %v2896_v37 = vld [vmem:[#allocation3 + $0x30] sm:$0xff]  ;;  %v5294_v25 = vld [vmem:[#allocation9 + $0x94] ss:$8 sps:$4 sm:$0xff]   ;;  %v5292_v28 = vld [vmem:[#allocation9 + $0x90] ss:$8 sps:$4 sm:$0xff]  }
 0x79e   :  { %v2902_v58 = vld [vmem:[#allocation3 + $0x60] sm:$0xf]  ;;  %v5295_v12 = vld [vmem:[#allocation9 + $0xa0] ss:$8 sps:$4 sm:$0xff]   ;;  %v5300_v62 = vld [vmem:[#allocation9 + $0xb4] ss:$8 sps:$4 sm:$0xff]  }
 0x79f   :  { %v2996_v1 = vrot.slane %v6424_v22, 1  ;;  %v6435_v6 = vpack.c.bf16 %v2902_v58, %v2902_v58  ;;  %v5298_v13 = vld [vmem:[#allocation9 + $0xb0] ss:$8 sps:$4 sm:$0xff]   ;;  %v5303_v23 = vld [vmem:[#allocation9 + $0xc4] ss:$8 sps:$4 sm:$0xff]  }
 0x7a0   :  { %v5301_v55 = vld [vmem:[#allocation9 + $0xc0] ss:$8 sps:$4 sm:$0xff]   ;;  %v5306_v41 = vld [vmem:[#allocation9 + $0xd4] ss:$8 sps:$4 sm:$0xff]   ;;  %v5309_v31 = vld [vmem:[#allocation9 + $0xe4] ss:$8 sps:$4 sm:$0xff]  }
 0x7a1   :  { %v2899_v9 = vld [vmem:[#allocation3 + $0x48] sm:$0xff]  ;;  %v3005_v15 = vrot.slane %v6435_v6, 1  ;;  %v5318_v40 = vld [vmem:[#allocation9 + $0x114] ss:$8 sps:$4 sm:$0xff]   ;;  %v5316_v58 = vld [vmem:[#allocation9 + $0x110] ss:$8 sps:$4 sm:$0xff]  }
 0x7a2   :  { %v6428_v5 = vpack.c.bf16 %v2899_v9, %v2896_v37  ;;  %v5307_v37 = vld [vmem:[#allocation9 + $0xe0] ss:$8 sps:$4 sm:$0xff]   ;;  %v5312_v9 = vld [vmem:[#allocation9 + $0xf4] ss:$8 sps:$4 sm:$0xff]   ;;  %v5333_v51 = vld [vmem:[#allocation9 + $0x284] ss:$8 sps:$4 sm:$0xff]  }
 0x7a3   :  { %v5336_v44 = vld [vmem:[#allocation9 + $0x294] ss:$8 sps:$4 sm:$0xff]   ;;  %v5337_v52 = vld [vmem:[#allocation9 + $0x2a0] ss:$8 sps:$4 sm:$0xff]  }
 0x7a4   :  { %v2997_v35 = vrot.slane %v6428_v5, 1  ;;  %v5348_v2 = vld [vmem:[#allocation9 + $0x2d4] ss:$8 sps:$4 sm:$0xff]  }
 0x7a6   :  { %v2998_v32 = vsel %vm1139_vm10, %v2996_v1, %v2997_v35  ;;  %v3006_v49 = vsel %vm1139_vm10, %v2997_v35, %v3005_v15  ;;  %v5310_v1 = vld [vmem:[#allocation9 + $0xf0] ss:$8 sps:$4 sm:$0xff]   ;;  %v5315_v35 = vld [vmem:[#allocation9 + $0x104] ss:$8 sps:$4 sm:$0xff]   ;;  %v3639_v15 = vrot.slane %v6408_v27, 2  ;;  %vm4151_vm10 = vcmask 326656  }
 0x7a7   :  { %3234 = vmatmul.mubr.bf16.vlgmr.msra.gmra.mrb[8].mxu1 %v2998_v32  ;;  %v5319_v32 = vld [vmem:[#allocation9 + $0x240] ss:$8 sps:$4 sm:$0xff]  }
 0x7a8   :  { %3243 = vmatprep.mubr.bf16.mxu1 %v3008_v43  ;;  %3255 = vmatpush1.bf16.msra.mxu1 %v5259_v26  ;;  %v5313_v26 = vld [vmem:[#allocation9 + $0x100] ss:$8 sps:$4 sm:$0xff]   ;;  %v5324_v43 = vld [vmem:[#allocation9 + $0x254] ss:$8 sps:$4 sm:$0xff]   ;;  %v3641_v17 = vsel %vm1770_vm11, %v3639_v15, %v3640_v45 }
 0x7a9   :  { %3256 = vmatprep.subr.bf16.mxu1 %v5264_v42  ;;  %v5321_v42 = vld [vmem:[#allocation9 + $0x244] ss:$8 sps:$4 sm:$0xff]  }
 0x7ac   :  { %3257 = vmatpush1.bf16.msra.mxu1 %v5262_v30  ;;  %v5322_v30 = vld [vmem:[#allocation9 + $0x250] ss:$8 sps:$4 sm:$0xff]  }
 0x7ad   :  { %3493 = vmatprep.subr.bf16.mxu1 %v5267_v36  ;;  %v5327_v36 = vld [vmem:[#allocation9 + $0x264] ss:$8 sps:$4 sm:$0xff]  }
 0x7af   :  { %3244 = vmatmul.mubr.bf16.gmra.mrb[12].mxu1 %v3006_v49  ;;  %v5328_v49 = vld [vmem:[#allocation9 + $0x270] ss:$8 sps:$4 sm:$0xff]  }
 0x7b0   :  { %3286 = vmatprep.mubr.bf16.mxu1 %v5520_v0 }
 0x7b7   :  { %4869 = vmatmul.mubr.msk.bf16.vlgmr.msra.gmra.mrb[8].mxu1 %vm905_vm3, %v3004_v39  ;;  %v5342_v39 = vld [vmem:[#allocation9 + $0x2b4] ss:$8 sps:$4 sm:$0xff]  }
 0x7b8   :  { %3494 = vmatpush1.bf16.msra.mxu1 %v5265_v47  ;;  %3296 = vmatprep.mubr.bf16.mxu1 %v5520_v0  ;;  %v5331_v47 = vld [vmem:[#allocation9 + $0x280] ss:$8 sps:$4 sm:$0xff]  }
 0x7b9   :  { %3495 = vmatprep.subr.bf16.mxu1 %v5270_v4  ;;  %v5334_v4 = vld [vmem:[#allocation9 + $0x290] ss:$8 sps:$4 sm:$0xff]  }
 0x7bc   :  { %3496 = vmatpush1.bf16.msra.mxu1 %v5268_v38  ;;  %v5340_v38 = vld [vmem:[#allocation9 + $0x2b0] ss:$8 sps:$4 sm:$0xff]  }
 0x7bd   :  { %3497 = vmatprep.subr.bf16.mxu1 %v5273_v56  ;;  %v5345_v56 = vld [vmem:[#allocation9 + $0x2c4] ss:$8 sps:$4 sm:$0xff]  }
 0x7bf   :  { %4870 = vmatmul.mubr.msk.bf16.gmra.mrb[12].mxu1 %vm905_vm3, %v3010_v10  ;;  %v5351_v10 = vld [vmem:[#allocation9 + $0x2e4] ss:$8 sps:$4 sm:$0xff]  }
 0x7c0   :  { %3498 = vmatpush1.bf16.msra.mxu1 %v5271_v16  ;;  %3525 = vmatprep.mubr.bf16.mxu1 %v6408_v27  ;;  %v5339_v27 = vld [vmem:[#allocation9 + $0x2a4] ss:$8 sps:$4 sm:$0xff]   ;;  %v5343_v16 = vld [vmem:[#allocation9 + $0x2c0] ss:$8 sps:$4 sm:$0xff]  }
 0x7c1   :  { %3499 = vmatprep.subr.bf16.mxu1 %v5276_v24  ;;  %v5346_v24 = vld [vmem:[#allocation9 + $0x2d0] ss:$8 sps:$4 sm:$0xff]  }
 0x7c4   :  { %3500 = vmatpush1.bf16.msra.mxu1 %v5274_v7  ;;  %v5349_v7 = vld [vmem:[#allocation9 + $0x2e0] ss:$8 sps:$4 sm:$0xff]  }
 0x7c5   :  { %3501 = vmatprep.subr.bf16.mxu1 %v5279_v19  ;;  %v5354_v19 = vld [vmem:[#allocation9 + $0x2f4] ss:$8 sps:$4 sm:$0xff]  }
 0x7c8   :  { %3502 = vmatpush1.bf16.msra.mxu1 %v5277_v20  ;;  %v5352_v20 = vld [vmem:[#allocation9 + $0x2f0] ss:$8 sps:$4 sm:$0xff]  }
 0x7c9   :  { %3503 = vmatprep.subr.bf16.mxu1 %v5282_v14  ;;  %v5357_v14 = vld [vmem:[#allocation9 + $0x304] ss:$8 sps:$4 sm:$0xff]  }
 0x7cc   :  { %3504 = vmatpush1.bf16.msra.mxu1 %v5280_v53  ;;  %v5355_v53 = vld [vmem:[#allocation9 + $0x300] ss:$8 sps:$4 sm:$0xff]  }
 0x7cd   :  { %3505 = vmatprep.subr.bf16.mxu1 %v5285_v60  ;;  %v5360_v60 = vld [vmem:[#allocation9 + $0x314] ss:$8 sps:$4 sm:$0xff]  }
 0x7d0   :  { %3506 = vmatpush1.bf16.msra.mxu1 %v5283_v21  ;;  %v5358_v21 = vld [vmem:[#allocation9 + $0x310] ss:$8 sps:$4 sm:$0xff]  }
 0x7d1   :  { %3507 = vmatprep.subr.bf16.mxu1 %v5288_v46  ;;  %v5363_v46 = vld [vmem:[#allocation9 + $0x324] ss:$8 sps:$4 sm:$0xff]  }
 0x7d4   :  { %3508 = vmatpush1.bf16.msra.mxu1 %v5286_v61  ;;  %v5361_v61 = vld [vmem:[#allocation9 + $0x320] ss:$8 sps:$4 sm:$0xff]  }
 0x7d5   :  { %3509 = vmatprep.subr.bf16.mxu1 %v5291_v63  ;;  %v5366_v63 = vld [vmem:[#allocation9 + $0x334] ss:$8 sps:$4 sm:$0xff]  }
 0x7d8   :  { %3510 = vmatpush1.bf16.msra.mxu1 %v5289_v8  ;;  %v5364_v8 = vld [vmem:[#allocation9 + $0x330] ss:$8 sps:$4 sm:$0xff]  }
 0x7d9   :  { %3511 = vmatprep.subr.bf16.mxu1 %v5294_v25  ;;  %v5369_v25 = vld [vmem:[#allocation9 + $0x344] ss:$8 sps:$4 sm:$0xff]  }
 0x7dc   :  { %3512 = vmatpush1.bf16.msra.mxu1 %v5292_v28  ;;  %v3637_v28 = vrot.slane %v6428_v5, 2 }
 0x7dd   :  { %3513 = vmatprep.subr.bf16.mxu1 %v5297_v54  ;;  %v3636_v54 = vrot.slane %v6424_v22, 2 }
 0x7e0   :  { %3514 = vmatpush1.bf16.msra.mxu1 %v5295_v12  ;;  %v5367_v12 = vld [vmem:[#allocation9 + $0x340] ss:$8 sps:$4 sm:$0xff]  }
 0x7e1   :  { %3515 = vmatprep.subr.bf16.mxu1 %v5300_v62  ;;  %v3647_v62 = vrot.slane %v6426_v18, 2  ;;  %v3643_v18 = vrot.slane %v6439_v50, 2 }
 0x7e4   :  { %3516 = vmatpush1.bf16.msra.mxu1 %v5298_v13  ;;  %v5372_v13 = vld [vmem:[#allocation9 + $0x354] ss:$8 sps:$4 sm:$0xff]  }
 0x7e5   :  { %3517 = vmatprep.subr.bf16.mxu1 %v5303_v23  ;;  %v3638_v23 = vsel %vm1770_vm11, %v3636_v54, %v3637_v28 }
 0x7e8   :  { %3518 = vmatpush1.bf16.msra.mxu1 %v5301_v55  ;;  %v3648_v55 = vsel %vm1770_vm11, %v3640_v45, %v3647_v62 }
 0x7e9   :  { %3519 = vmatprep.subr.bf16.mxu1 %v5306_v41  ;;  %v5370_v41 = vld [vmem:[#allocation9 + $0x350] ss:$8 sps:$4 sm:$0xff]  }
 0x7ec   :  { %3520 = vmatpush1.bf16.msra.mxu1 %v5304_v59  ;;  %v3642_v59 = vrot.slane %v6442_v29, 2 }
 0x7ed   :  { %3521 = vmatprep.subr.bf16.mxu1 %v5309_v31  ;;  %v3649_v31 = vrot.slane %v6449_v57, 2 }
 0x7f0   :  { %3522 = vmatpush1.bf16.msra.mxu1 %v5307_v37 }
 0x7f1   :  { %3523 = vmatprep.subr.bf16.mxu1 %v5312_v9 }
 0x7f4   :  { %3524 = vmatpush1.bf16.msra.mxu1 %v5310_v1 }
 0x7f5   :  { %3546 = vmatprep.subr.bf16.mxu1 %v5315_v35 }
 0x7f7   :  { %3526 = vmatmul.mubr.bf16.vlgmr.msra.gmra.mrb[8].mxu1 %v6424_v22 }
 0x7f8   :  { %3535 = vmatprep.mubr.bf16.mxu1 %v6412_v34  ;;  %3547 = vmatpush1.bf16.msra.mxu1 %v5313_v26  ;;  %v3644_v34 = vsel %vm1770_vm11, %v3642_v59, %v3643_v18 }
 0x7f9   :  { %3548 = vmatprep.subr.bf16.mxu1 %v5318_v40 }
 0x7fc   :  { %3549 = vmatpush1.bf16.msra.mxu1 %v5316_v58 }
 0x7fd   :  { %3841 = vmatprep.subr.bf16.mxu1 %v5321_v42 }
 0x7ff   :  { %3536 = vmatmul.mubr.bf16.gmra.mrb[12].mxu1 %v6428_v5  ;;  %v3645_v5 = vrot.slane %v6435_v6, 2  ;;  %v3650_v6 = vsel %vm1770_vm11, %v3643_v18, %v3649_v31 }
 0x800   :  { %3578 = vmatprep.mubr.bf16.mxu1 %v5520_v0 }
 0x801   :  { %v3646_v22 = vsel %vm1770_vm11, %v3637_v28, %v3645_v5  ;;  %vm4154_vm11 = vcmask 457728  }
 0x807   :  { %4907 = vmatmul.mubr.msk.bf16.vlgmr.msra.gmra.mrb[8].mxu1 %vm905_vm3, %v6442_v29 }
 0x808   :  { %3842 = vmatpush1.bf16.msra.mxu1 %v5319_v32  ;;  %3588 = vmatprep.mubr.bf16.mxu1 %v5520_v0 }
 0x809   :  { %3843 = vmatprep.subr.bf16.mxu1 %v5324_v43 }
 0x80c   :  { %3844 = vmatpush1.bf16.msra.mxu1 %v5322_v30 }
 0x80d   :  { %3845 = vmatprep.subr.bf16.mxu1 %v5327_v36 }
 0x80f   :  { %4908 = vmatmul.mubr.msk.bf16.gmra.mrb[12].mxu1 %vm905_vm3, %v6439_v50 }
 0x810   :  { %3846 = vmatpush1.bf16.msra.mxu1 %v5325_v48  ;;  %3873 = vmatprep.mubr.bf16.mxu1 %v3641_v17 }
 0x811   :  { %3847 = vmatprep.subr.bf16.mxu1 %v5330_v3 }
 0x814   :  { %3848 = vmatpush1.bf16.msra.mxu1 %v5328_v49 }
 0x815   :  { %3849 = vmatprep.subr.bf16.mxu1 %v5333_v51 }
 0x818   :  { %3850 = vmatpush1.bf16.msra.mxu1 %v5331_v47 }
 0x819   :  { %3851 = vmatprep.subr.bf16.mxu1 %v5336_v44 }
 0x81c   :  { %3852 = vmatpush1.bf16.msra.mxu1 %v5334_v4 }
 0x81d   :  { %3853 = vmatprep.subr.bf16.mxu1 %v5339_v27 }
 0x820   :  { %3854 = vmatpush1.bf16.msra.mxu1 %v5337_v52 }
 0x821   :  { %3855 = vmatprep.subr.bf16.mxu1 %v5342_v39 }
 0x824   :  { %3856 = vmatpush1.bf16.msra.mxu1 %v5340_v38 }
 0x825   :  { %3857 = vmatprep.subr.bf16.mxu1 %v5345_v56 }
 0x828   :  { %3858 = vmatpush1.bf16.msra.mxu1 %v5343_v16 }
 0x829   :  { %3859 = vmatprep.subr.bf16.mxu1 %v5348_v2 }
 0x82c   :  { %3860 = vmatpush1.bf16.msra.mxu1 %v5346_v24 }
 0x82d   :  { %3861 = vmatprep.subr.bf16.mxu1 %v5351_v10 }
 0x830   :  { %3862 = vmatpush1.bf16.msra.mxu1 %v5349_v7 }
 0x831   :  { %3863 = vmatprep.subr.bf16.mxu1 %v5354_v19 }
 0x834   :  { %3864 = vmatpush1.bf16.msra.mxu1 %v5352_v20 }
 0x835   :  { %3865 = vmatprep.subr.bf16.mxu1 %v5357_v14 }
 0x838   :  { %3866 = vmatpush1.bf16.msra.mxu1 %v5355_v53 }
 0x839   :  { %3867 = vmatprep.subr.bf16.mxu1 %v5360_v60 }
 0x83c   :  { %3868 = vmatpush1.bf16.msra.mxu1 %v5358_v21 }
 0x83d   :  { %3869 = vmatprep.subr.bf16.mxu1 %v5363_v46 }
 0x840   :  { %3870 = vmatpush1.bf16.msra.mxu1 %v5361_v61 }
 0x841   :  { %3871 = vmatprep.subr.bf16.mxu1 %v5366_v63 }
 0x844   :  { %3872 = vmatpush1.bf16.msra.mxu1 %v5364_v8 }
 0x845   :  { %3894 = vmatprep.subr.bf16.mxu1 %v5369_v25 }
 0x847   :  { %3874 = vmatmul.mubr.bf16.vlgmr.msra.gmra.mrb[8].mxu1 %v3638_v23 }
 0x848   :  { %3883 = vmatprep.mubr.bf16.mxu1 %v3648_v55  ;;  %3895 = vmatpush1.bf16.msra.mxu1 %v5367_v12 }
 0x849   :  { %3896 = vmatprep.subr.bf16.mxu1 %v5372_v13 }
 0x84c   :  { %3897 = vmatpush1.bf16.msra.mxu1 %v5370_v41 }
 0x84f   :  { %3884 = vmatmul.mubr.bf16.gmra.mrb[12].mxu1 %v3646_v22 }
 0x850   :  { %3926 = vmatprep.mubr.bf16.mxu1 %v5520_v0 }
 0x857   :  { %4945 = vmatmul.mubr.msk.bf16.vlgmr.msra.gmra.mrb[8].mxu1 %vm905_vm3, %v3644_v34 }
 0x858   :  { %3936 = vmatprep.mubr.bf16.mxu1 %v5520_v0 }
 0x85f   :  { %4946 = vmatmul.mubr.msk.bf16.gmra.mrb[12].mxu1 %vm905_vm3, %v3650_v6 }
 0x92a   :  { %v6487_v37 = vpop.f32.mrb[8].mxu1 }
 0x92b   :  { %v6489_v9 = vpop.f32.mrb[9].mxu1 }
 0x92c   :  { %v6491_v1 = vpop.f32.mrb[10].mxu1 }
 0x92d   :  { %v3956_v50 = vadd.f32 %v6491_v1, %v6487_v37  ;;  %v6495_v29 = vpop.f32.mrb[11].mxu1 }
 0x92e   :  { %v3965_v0 = vadd.f32 %v6495_v29, %v6489_v9 }
 0x932   :  { %v6499_v35 = vpop.f32.mrb[12].mxu1 }
 0x933   :  { %v3957_v57 = vadd.f32 %v3956_v50, %v6499_v35  ;;  %v6502_v26 = vpop.f32.mrb[13].mxu1 }
 0x934   :  { %v3966_v40 = vadd.f32 %v3965_v0, %v6502_v26  ;;  %v6505_v58 = vpop.f32.mrb[14].mxu1 }
 0x935   :  { %v3958_v42 = vadd.f32 %v3957_v57, %v6505_v58  ;;  %v6508_v32 = vpop.f32.mrb[15].mxu1 }
 0x936   :  { %v3967_v43 = vadd.f32 %v3966_v40, %v6508_v32 }
 0x937   :  { %v3959_v17 = vrot.slane %v3958_v42, 4 }
 0x938   :  { %v3968_v30 = vrot.slane %v3967_v43, 4 }
 0x939   :  { %v3960_v49 = vadd.f32 %v3959_v17, %v3958_v42 }
 0x93a   :  { %v3969_v36 = vadd.f32 %v3968_v30, %v3967_v43 }
 0x93b   :  { %v3961_v51 = vrot.slane %v3960_v49, 2 }
 0x93c   :  { %v3970_v45 = vrot.slane %v3969_v36, 2 }
 0x93d   :  { %v3962_v47 = vadd.f32 %v3961_v51, %v3960_v49 }
 0x93e   :  { %v3971_v48 = vadd.f32 %v3970_v45, %v3969_v36 }
 0x93f   :  { %v3963_v44 = vrot.slane %v3962_v47, 1 }
 0x940   :  { %v3972_v15 = vrot.slane %v3971_v48, 1 }
 0x941   :  { %v3964_v4 = vadd.f32 %v3963_v44, %v3962_v47 }
 0x942   :  { %v3973_v3 = vadd.f32 %v3972_v15, %v3971_v48 }
 0x944   :  { %4042 = vrot.lane.b32.xlu1 %v3973_v3, %s5525_s30  ;;  %4038 = vrot.lane.b32.xlu0 %v3973_v3, %s5529_s4 }
 0x948   :  { %4050 = vrot.lane.b32.xlu1 %v3973_v3, %s5523_s0  ;;  %4046 = vrot.lane.b32.xlu0 %v3973_v3, %s5530_s13 }
 0x94c   :  { %4058 = vrot.lane.b32.xlu1 %v3973_v3, %s5526_s8  ;;  %4054 = vrot.lane.b32.xlu0 %v3973_v3, %s5531_s1 }
 0x950   :  { %4066 = vrot.lane.b32.xlu1 %v3973_v3, %s5524_s29  ;;  %4062 = vrot.lane.b32.xlu0 %v3973_v3, %s5532_s14 }
 0x954   :  { %4074 = vrot.lane.b32.xlu1 %v3973_v3, %s5527_s9  ;;  %4070 = vrot.lane.b32.xlu0 %v3973_v3, %s5533_s15 }
 0x958   :  { %4082 = vrot.lane.b32.xlu1 %v3973_v3, %s5515_s23  ;;  %4078 = vrot.lane.b32.xlu0 %v3973_v3, %s5534_s16 }
 0x95c   :  { %4090 = vrot.lane.b32.xlu1 %v3973_v3, %s5528_s10  ;;  %4086 = vrot.lane.b32.xlu0 %v3973_v3, %s5535_s17 }
 0x960   :  { %3975 = vrot.lane.b32.xlu1 %v3964_v4, %s5529_s4  ;;  %4094 = vrot.lane.b32.xlu0 %v3973_v3, %s5518_s27 }
 0x964   :  { %3983 = vrot.lane.b32.xlu1 %v3964_v4, %s5530_s13  ;;  %3979 = vrot.lane.b32.xlu0 %v3964_v4, %s5525_s30 }
 0x968   :  { %3991 = vrot.lane.b32.xlu1 %v3964_v4, %s5531_s1  ;;  %3987 = vrot.lane.b32.xlu0 %v3964_v4, %s5523_s0 }
 0x96c   :  { %3999 = vrot.lane.b32.xlu1 %v3964_v4, %s5532_s14  ;;  %3995 = vrot.lane.b32.xlu0 %v3964_v4, %s5526_s8 }
 0x970   :  { %4011 = vrot.lane.b32.xlu1 %v3964_v4, %s5527_s9  ;;  %4003 = vrot.lane.b32.xlu0 %v3964_v4, %s5524_s29 }
 0x974   :  { %4019 = vrot.lane.b32.xlu1 %v3964_v4, %s5515_s23  ;;  %4007 = vrot.lane.b32.xlu0 %v3964_v4, %s5533_s15 }
 0x978   :  { %4027 = vrot.lane.b32.xlu1 %v3964_v4, %s5528_s10  ;;  %4015 = vrot.lane.b32.xlu0 %v3964_v4, %s5534_s16 }
 0x97c   :  { %4023 = vrot.lane.b32.xlu0 %v3964_v4, %s5535_s17 }
 0x980   :  { %4031 = vrot.lane.b32.xlu0 %v3964_v4, %s5518_s27 }
 0x9b6   :  { %v4043_v27 = vpop.permute.xlu1 %4042  ;;  %v4039_v52 = vpop.permute.xlu0 %4038 }
 0x9b7   :  { %v4041_v39 = vadd.f32 %v4039_v52, %v3973_v3 }
 0x9b9   :  { %v4045_v38 = vadd.f32 %v4043_v27, %v4041_v39 }
 0x9ba   :  { %v4051_v56 = vpop.permute.xlu1 %4050  ;;  %v4047_v16 = vpop.permute.xlu0 %4046 }
 0x9bb   :  { %v4049_v2 = vadd.f32 %v4047_v16, %v4045_v38 }
 0x9bd   :  { %v4053_v24 = vadd.f32 %v4051_v56, %v4049_v2 }
 0x9be   :  { %v4059_v10 = vpop.permute.xlu1 %4058  ;;  %v4055_v7 = vpop.permute.xlu0 %4054 }
 0x9bf   :  { %v4057_v19 = vadd.f32 %v4055_v7, %v4053_v24 }
 0x9c1   :  { %v4061_v20 = vadd.f32 %v4059_v10, %v4057_v19 }
 0x9c2   :  { %v4067_v14 = vpop.permute.xlu1 %4066  ;;  %v4063_v53 = vpop.permute.xlu0 %4062 }
 0x9c3   :  { %v4065_v60 = vadd.f32 %v4063_v53, %v4061_v20 }
 0x9c5   :  { %v4069_v21 = vadd.f32 %v4067_v14, %v4065_v60 }
 0x9c6   :  { %v4075_v46 = vpop.permute.xlu1 %4074  ;;  %v4071_v61 = vpop.permute.xlu0 %4070 }
 0x9c7   :  { %v4073_v63 = vadd.f32 %v4071_v61, %v4069_v21 }
 0x9c9   :  { %v4077_v8 = vadd.f32 %v4075_v46, %v4073_v63 }
 0x9ca   :  { %v4083_v25 = vpop.permute.xlu1 %4082  ;;  %v4079_v28 = vpop.permute.xlu0 %4078 }
 0x9cb   :  { %v4081_v54 = vadd.f32 %v4079_v28, %v4077_v8 }
 0x9cd   :  { %v4085_v12 = vadd.f32 %v4083_v25, %v4081_v54 }
 0x9ce   :  { %v4091_v62 = vpop.permute.xlu1 %4090  ;;  %v4087_v13 = vpop.permute.xlu0 %4086 }
 0x9cf   :  { %v4089_v23 = vadd.f32 %v4087_v13, %v4085_v12 }
 0x9d1   :  { %v4093_v55 = vadd.f32 %v4091_v62, %v4089_v23 }
 0x9d2   :  { %v3976_v41 = vpop.permute.xlu1 %3975  ;;  %v4095_v5 = vpop.permute.xlu0 %4094 }
 0x9d3   :  { %v4097_v22 = vadd.f32 %v4095_v5, %v4093_v55  ;;  %v3978_v18 = vadd.f32 %v3976_v41, %v3964_v4 }
 0x9d5   :  { %v6541_v59 = vmul.f32 0.001953125, %v4097_v22 }
 0x9d6   :  { %v3984_v34 = vpop.permute.xlu1 %3983  ;;  %v3980_v31 = vpop.permute.xlu0 %3979 }
 0x9d7   :  { %v3982_v6 = vadd.f32 %v3980_v31, %v3978_v18  ;;  %4175 = vrot.lane.b32.xlu0 %v6541_v59, %s5535_s17  ;;  %4169 = vrot.lane.b32.xlu1 %v6541_v59, %s5518_s27 }
 0x9d9   :  { %v3986_v50 = vadd.f32 %v3984_v34, %v3982_v6 }
 0x9da   :  { %v3992_v0 = vpop.permute.xlu1 %3991  ;;  %v3988_v57 = vpop.permute.xlu0 %3987 }
 0x9db   :  { %v3990_v40 = vadd.f32 %v3988_v57, %v3986_v50  ;;  %4178 = vrot.lane.b32.xlu0 %v6541_v59, %s5515_s23  ;;  %4172 = vrot.lane.b32.xlu1 %v6541_v59, %s5528_s10 }
 0x9dd   :  { %v3994_v42 = vadd.f32 %v3992_v0, %v3990_v40 }
 0x9de   :  { %v4000_v43 = vpop.permute.xlu1 %3999  ;;  %v3996_v30 = vpop.permute.xlu0 %3995 }
 0x9df   :  { %v3998_v36 = vadd.f32 %v3996_v30, %v3994_v42  ;;  %4187 = vrot.lane.b32.xlu0 %v6541_v59, %s5533_s15  ;;  %4181 = vrot.lane.b32.xlu1 %v6541_v59, %s5534_s16 }
 0x9e1   :  { %v4002_v45 = vadd.f32 %v4000_v43, %v3998_v36 }
 0x9e2   :  { %v4004_v48 = vpop.permute.xlu0 %4003  ;;  %v4012_v15 = vpop.permute.xlu1 %4011 }
 0x9e3   :  { %4190 = vrot.lane.b32.xlu0 %v6541_v59, %s5524_s29  ;;  %4184 = vrot.lane.b32.xlu1 %v6541_v59, %s5527_s9  ;;  %v4006_v3 = vadd.f32 %v4004_v48, %v4002_v45 }
 0x9e6   :  { %v4008_v17 = vpop.permute.xlu0 %4007  ;;  %v4020_v47 = vpop.permute.xlu1 %4019 }
 0x9e7   :  { %v4010_v49 = vadd.f32 %v4008_v17, %v4006_v3  ;;  %4199 = vrot.lane.b32.xlu0 %v6541_v59, %s5531_s1  ;;  %4193 = vrot.lane.b32.xlu1 %v6541_v59, %s5532_s14 }
 0x9e9   :  { %v4014_v51 = vadd.f32 %v4012_v15, %v4010_v49 }
 0x9ea   :  { %v4016_v44 = vpop.permute.xlu0 %4015  ;;  %v4028_v38 = vpop.permute.xlu1 %4027 }
 0x9eb   :  { %v4018_v4 = vadd.f32 %v4016_v44, %v4014_v51  ;;  %4202 = vrot.lane.b32.xlu0 %v6541_v59, %s5523_s0  ;;  %4196 = vrot.lane.b32.xlu1 %v6541_v59, %s5526_s8 }
 0x9ed   :  { %v4022_v27 = vadd.f32 %v4020_v47, %v4018_v4 }
 0x9ee   :  { %v4024_v52 = vpop.permute.xlu0 %4023 }
 0x9ef   :  { %v4026_v39 = vadd.f32 %v4024_v52, %v4022_v27  ;;  %4211 = vrot.lane.b32.xlu0 %v6541_v59, %s5529_s4  ;;  %4205 = vrot.lane.b32.xlu1 %v6541_v59, %s5530_s13 }
 0x9f1   :  { %v4030_v56 = vadd.f32 %v4028_v38, %v4026_v39 }
 0x9f2   :  { %v4032_v16 = vpop.permute.xlu0 %4031 }
 0x9f3   :  { %v4034_v2 = vadd.f32 %v4032_v16, %v4030_v56  ;;  %4208 = vrot.lane.b32.xlu1 %v6541_v59, %s5525_s30 }
 0x9f5   :  { %v4036_v24 = vmul.f32 0.001953125, %v4034_v2 }
 0x9f7   :  { %4103 = vrot.lane.b32.xlu0 %v4036_v24, %s5528_s10  ;;  %4100 = vrot.lane.b32.xlu1 %v4036_v24, %s5518_s27 }
 0x9fb   :  { %4109 = vrot.lane.b32.xlu0 %v4036_v24, %s5515_s23  ;;  %4106 = vrot.lane.b32.xlu1 %v4036_v24, %s5535_s17 }
 0x9ff   :  { %4115 = vrot.lane.b32.xlu0 %v4036_v24, %s5527_s9  ;;  %4112 = vrot.lane.b32.xlu1 %v4036_v24, %s5534_s16 }
 0xa03   :  { %4121 = vrot.lane.b32.xlu0 %v4036_v24, %s5524_s29  ;;  %4118 = vrot.lane.b32.xlu1 %v4036_v24, %s5533_s15 }
 0xa07   :  { %4127 = vrot.lane.b32.xlu0 %v4036_v24, %s5526_s8  ;;  %4124 = vrot.lane.b32.xlu1 %v4036_v24, %s5532_s14 }
 0xa0b   :  { %4133 = vrot.lane.b32.xlu0 %v4036_v24, %s5523_s0  ;;  %4130 = vrot.lane.b32.xlu1 %v4036_v24, %s5531_s1 }
 0xa0f   :  { %4139 = vrot.lane.b32.xlu0 %v4036_v24, %s5525_s30  ;;  %4136 = vrot.lane.b32.xlu1 %v4036_v24, %s5530_s13 }
 0xa13   :  { %4142 = vrot.lane.b32.xlu1 %v4036_v24, %s5529_s4 }
 0xa49   :  { %v4170_v10 = vpop.permute.xlu1 %4169  ;;  %v4176_v7 = vpop.permute.xlu0 %4175 }
 0xa4a   :  { %v4214_v19 = vsel %vm4145_vm7, %v6541_v59, %v4170_v10 }
 0xa4d   :  { %v4173_v20 = vpop.permute.xlu1 %4172  ;;  %v4179_v14 = vpop.permute.xlu0 %4178 }
 0xa4e   :  { %v4215_v53 = vsel %vm2173_vm12, %v4214_v19, %v4173_v20 }
 0xa4f   :  { %v4216_v60 = vsel %vm4148_vm8, %v4215_v53, %v4176_v7 }
 0xa50   :  { %v4217_v61 = vsel %vm905_vm3, %v4216_v60, %v4179_v14 }
 0xa51   :  { %v4182_v21 = vpop.permute.xlu1 %4181  ;;  %v4188_v46 = vpop.permute.xlu0 %4187 }
 0xa52   :  { %v4218_v63 = vsel %vm4151_vm10, %v4217_v61, %v4182_v21 }
 0xa55   :  { %v4185_v8 = vpop.permute.xlu1 %4184  ;;  %v4191_v25 = vpop.permute.xlu0 %4190 }
 0xa56   :  { %v4219_v28 = vsel %vm2176_vm13, %v4218_v63, %v4185_v8 }
 0xa57   :  { %v4220_v54 = vsel %vm4154_vm11, %v4219_v28, %v4188_v46 }
 0xa58   :  { %v4221_v13 = vsel %vm886_vm2, %v4220_v54, %v4191_v25 }
 0xa59   :  { %v4194_v12 = vpop.permute.xlu1 %4193  ;;  %v4200_v62 = vpop.permute.xlu0 %4199 }
 0xa5a   :  { %v4222_v23 = vsel %vm4157_vm15, %v4221_v13, %v4194_v12 }
 0xa5d   :  { %v4197_v55 = vpop.permute.xlu1 %4196  ;;  %v4203_v22 = vpop.permute.xlu0 %4202 }
 0xa5e   :  { %v4223_v41 = vsel %vm322_vm0, %v4222_v23, %v4197_v55 }
 0xa5f   :  { %v4224_v5 = vsel %vm4160_vm1, %v4223_v41, %v4200_v62 }
 0xa60   :  { %v4225_v59 = vsel %vm908_vm9, %v4224_v5, %v4203_v22 }
 0xa61   :  { %v4206_v18 = vpop.permute.xlu1 %4205  ;;  %v4212_v31 = vpop.permute.xlu0 %4211 }
 0xa62   :  { %v4226_v34 = vsel %vm4163_vm4, %v4225_v59, %v4206_v18 }
 0xa65   :  { %v4209_v6 = vpop.permute.xlu1 %4208 }
 0xa66   :  { %v4227_v50 = vsel %vm2181_vm14, %v4226_v34, %v4209_v6 }
 0xa67   :  { %v4228_v0 = vsel %vm4166_vm5, %v4227_v50, %v4212_v31 }
 0xa68   :  { %v4236_v57 = vrot.slane %v4228_v0, %v5759_v33 }
 0xa69   :  { %v4101_v40 = vpop.permute.xlu1 %4100  ;;  %v4104_v42 = vpop.permute.xlu0 %4103 }
 0xa6a   :  { %v6606_v43 = vsub.f32 %v6489_v9, %v4236_v57  ;;  %v6609_v30 = vsub.f32 %v6495_v29, %v4236_v57  ;;  %v6612_v36 = vsub.f32 %v6502_v26, %v4236_v57  ;;  %v4146_v45 = vsel %vm4145_vm7, %v4036_v24, %v4101_v40 }
 0xa6b   :  { %v6616_v48 = vsub.f32 %v6508_v32, %v4236_v57  ;;  %v4147_v9 = vsel %vm2173_vm12, %v4146_v45, %v4104_v42 }
 0xa6c   :  { %v4246_v15 = vmul.f32 %v6606_v43, %v6606_v43  ;;  %v4248_v3 = vmul.f32 %v6609_v30, %v6609_v30  ;;  %v4250_v29 = vmul.f32 %v6612_v36, %v6612_v36 }
 0xa6d   :  { %v4107_v17 = vpop.permute.xlu1 %4106  ;;  %v4110_v49 = vpop.permute.xlu0 %4109  ;;  %v4252_v32 = vmul.f32 %v6616_v48, %v6616_v48 }
 0xa6e   :  { %v4262_v26 = vadd.f32 %v4248_v3, %v4246_v15  ;;  %v4149_v51 = vsel %vm4148_vm8, %v4147_v9, %v4107_v17  ;;  %v6711_v15 = vld [vmem:[%s6914_s6] sm:$0x3] }
 0xa6f   :  { %v4150_v44 = vsel %vm905_vm3, %v4149_v51, %v4110_v49 }
 0xa70   :  { %v4263_v47 = vadd.f32 %v4262_v26, %v4250_v29 }
 0xa71   :  { %v4113_v4 = vpop.permute.xlu1 %4112  ;;  %v4116_v27 = vpop.permute.xlu0 %4115 }
 0xa72   :  { %v4264_v52 = vadd.f32 %v4263_v47, %v4252_v32  ;;  %v4152_v39 = vsel %vm4151_vm10, %v4150_v44, %v4113_v4 }
 0xa73   :  { %v4153_v56 = vsel %vm2176_vm13, %v4152_v39, %v4116_v27 }
 0xa74   :  { %v4265_v38 = vrot.slane %v4264_v52, 4 }
 0xa75   :  { %v4119_v16 = vpop.permute.xlu1 %4118  ;;  %v4122_v2 = vpop.permute.xlu0 %4121 }
 0xa76   :  { %v4266_v24 = vadd.f32 %v4265_v38, %v4264_v52  ;;  %v4155_v10 = vsel %vm4154_vm11, %v4153_v56, %v4119_v16 }
 0xa77   :  { %v4156_v19 = vsel %vm886_vm2, %v4155_v10, %v4122_v2 }
 0xa78   :  { %v4267_v7 = vrot.slane %v4266_v24, 2 }
 0xa79   :  { %v4125_v20 = vpop.permute.xlu1 %4124  ;;  %v4128_v14 = vpop.permute.xlu0 %4127 }
 0xa7a   :  { %v4268_v53 = vadd.f32 %v4267_v7, %v4266_v24  ;;  %v4158_v60 = vsel %vm4157_vm15, %v4156_v19, %v4125_v20 }
 0xa7b   :  { %v4159_v46 = vsel %vm322_vm0, %v4158_v60, %v4128_v14 }
 0xa7c   :  { %v4269_v21 = vrot.slane %v4268_v53, 1 }
 0xa7d   :  { %v4131_v61 = vpop.permute.xlu1 %4130  ;;  %v4134_v63 = vpop.permute.xlu0 %4133 }
 0xa7e   :  { %v4270_v8 = vadd.f32 %v4269_v21, %v4268_v53  ;;  %v4161_v25 = vsel %vm4160_vm1, %v4159_v46, %v4131_v61 }
 0xa7f   :  { %v4162_v28 = vsel %vm908_vm9, %v4161_v25, %v4134_v63 }
 0xa80   :  { %4338 = vrot.lane.b32.xlu1 %v4270_v8, %s5525_s30  ;;  %4334 = vrot.lane.b32.xlu0 %v4270_v8, %s5529_s4 }
 0xa81   :  { %v4137_v54 = vpop.permute.xlu1 %4136  ;;  %v4140_v62 = vpop.permute.xlu0 %4139 }
 0xa82   :  { %v4164_v12 = vsel %vm4163_vm4, %v4162_v28, %v4137_v54 }
 0xa83   :  { %v4165_v13 = vsel %vm2181_vm14, %v4164_v12, %v4140_v62 }
 0xa84   :  { %4346 = vrot.lane.b32.xlu1 %v4270_v8, %s5523_s0  ;;  %4342 = vrot.lane.b32.xlu0 %v4270_v8, %s5530_s13 }
 0xa85   :  { %v4143_v23 = vpop.permute.xlu1 %4142 }
 0xa86   :  { %v4167_v55 = vsel %vm4166_vm5, %v4165_v13, %v4143_v23 }
 0xa87   :  { %v4232_v41 = vrot.slane %v4167_v55, %v5759_v33 }
 0xa88   :  { %4354 = vrot.lane.b32.xlu1 %v4270_v8, %s5526_s8  ;;  %4350 = vrot.lane.b32.xlu0 %v4270_v8, %s5531_s1 }
 0xa89   :  { %v6648_v5 = vsub.f32 %v6487_v37, %v4232_v41  ;;  %v6651_v22 = vsub.f32 %v6491_v1, %v4232_v41  ;;  %v6654_v18 = vsub.f32 %v6499_v35, %v4232_v41  ;;  %v6657_v59 = vsub.f32 %v6505_v58, %v4232_v41 }
 0xa8b   :  { %v4245_v34 = vmul.f32 %v6648_v5, %v6648_v5  ;;  %v4247_v31 = vmul.f32 %v6651_v22, %v6651_v22  ;;  %v4249_v37 = vmul.f32 %v6654_v18, %v6654_v18  ;;  %v4251_v35 = vmul.f32 %v6657_v59, %v6657_v59 }
 0xa8c   :  { %4362 = vrot.lane.b32.xlu1 %v4270_v8, %s5524_s29  ;;  %4358 = vrot.lane.b32.xlu0 %v4270_v8, %s5532_s14 }
 0xa8d   :  { %v4253_v1 = vadd.f32 %v4247_v31, %v4245_v34 }
 0xa8f   :  { %v4254_v6 = vadd.f32 %v4253_v1, %v4249_v37 }
 0xa90   :  { %4370 = vrot.lane.b32.xlu1 %v4270_v8, %s5527_s9  ;;  %4366 = vrot.lane.b32.xlu0 %v4270_v8, %s5533_s15 }
 0xa91   :  { %v4255_v58 = vadd.f32 %v4254_v6, %v4251_v35 }
 0xa93   :  { %v4256_v50 = vrot.slane %v4255_v58, 4 }
 0xa94   :  { %4378 = vrot.lane.b32.xlu1 %v4270_v8, %s5515_s23  ;;  %4374 = vrot.lane.b32.xlu0 %v4270_v8, %s5534_s16 }
 0xa95   :  { %v4257_v0 = vadd.f32 %v4256_v50, %v4255_v58 }
 0xa97   :  { %v4258_v57 = vrot.slane %v4257_v0, 2 }
 0xa98   :  { %4386 = vrot.lane.b32.xlu1 %v4270_v8, %s5528_s10  ;;  %4382 = vrot.lane.b32.xlu0 %v4270_v8, %s5535_s17 }
 0xa99   :  { %v4259_v40 = vadd.f32 %v4258_v57, %v4257_v0 }
 0xa9b   :  { %v4260_v42 = vrot.slane %v4259_v40, 1 }
 0xa9c   :  { %4390 = vrot.lane.b32.xlu0 %v4270_v8, %s5518_s27 }
 0xa9d   :  { %v6676_v45 = vadd.f32 %v4260_v42, %v4259_v40 }
 0xa9f   :  { %4272 = vrot.lane.b32.xlu1 %v6676_v45, %s5529_s4 }
 0xaa0   :  { %4276 = vrot.lane.b32.xlu0 %v6676_v45, %s5525_s30 }
 0xaa3   :  { %4280 = vrot.lane.b32.xlu1 %v6676_v45, %s5530_s13 }
 0xaa4   :  { %4284 = vrot.lane.b32.xlu0 %v6676_v45, %s5523_s0 }
 0xaa7   :  { %4288 = vrot.lane.b32.xlu1 %v6676_v45, %s5531_s1 }
 0xaa8   :  { %4292 = vrot.lane.b32.xlu0 %v6676_v45, %s5526_s8 }
 0xaab   :  { %4296 = vrot.lane.b32.xlu1 %v6676_v45, %s5532_s14 }
 0xaac   :  { %4300 = vrot.lane.b32.xlu0 %v6676_v45, %s5524_s29 }
 0xaaf   :  { %4304 = vrot.lane.b32.xlu1 %v6676_v45, %s5533_s15 }
 0xab0   :  { %4308 = vrot.lane.b32.xlu0 %v6676_v45, %s5527_s9 }
 0xab3   :  { %4312 = vrot.lane.b32.xlu1 %v6676_v45, %s5534_s16 }
 0xab4   :  { %4316 = vrot.lane.b32.xlu0 %v6676_v45, %s5515_s23 }
 0xab7   :  { %4320 = vrot.lane.b32.xlu1 %v6676_v45, %s5535_s17 }
 0xab8   :  { %4324 = vrot.lane.b32.xlu0 %v6676_v45, %s5528_s10 }
 0xabb   :  { %4328 = vrot.lane.b32.xlu1 %v6676_v45, %s5518_s27 }
 0xabf   :  { %4580 = vrot.lane.b32.xlu1 %v6711_v15, %s5530_s13 }
 0xaf2   :  { %v4339_v3 = vpop.permute.xlu1 %4338  ;;  %v4335_v9 = vpop.permute.xlu0 %4334 }
 0xaf3   :  { %v4337_v17 = vadd.f32 %v4335_v9, %v4270_v8 }
 0xaf5   :  { %v4341_v49 = vadd.f32 %v4339_v3, %v4337_v17 }
 0xaf6   :  { %v4347_v29 = vpop.permute.xlu1 %4346  ;;  %v4343_v26 = vpop.permute.xlu0 %4342 }
 0xaf7   :  { %v4345_v51 = vadd.f32 %v4343_v26, %v4341_v49 }
 0xaf9   :  { %v4349_v32 = vadd.f32 %v4347_v29, %v4345_v51 }
 0xafa   :  { %v4355_v47 = vpop.permute.xlu1 %4354  ;;  %v4351_v44 = vpop.permute.xlu0 %4350 }
 0xafb   :  { %v4353_v4 = vadd.f32 %v4351_v44, %v4349_v32 }
 0xafd   :  { %v4357_v27 = vadd.f32 %v4355_v47, %v4353_v4 }
 0xafe   :  { %v4363_v52 = vpop.permute.xlu1 %4362  ;;  %v4359_v39 = vpop.permute.xlu0 %4358 }
 0xaff   :  { %v4361_v38 = vadd.f32 %v4359_v39, %v4357_v27 }
 0xb01   :  { %v4365_v56 = vadd.f32 %v4363_v52, %v4361_v38 }
 0xb02   :  { %v4371_v16 = vpop.permute.xlu1 %4370  ;;  %v4367_v2 = vpop.permute.xlu0 %4366 }
 0xb03   :  { %v4369_v24 = vadd.f32 %v4367_v2, %v4365_v56 }
 0xb05   :  { %v4373_v10 = vadd.f32 %v4371_v16, %v4369_v24 }
 0xb06   :  { %v4379_v7 = vpop.permute.xlu1 %4378  ;;  %v4375_v19 = vpop.permute.xlu0 %4374 }
 0xb07   :  { %v4377_v20 = vadd.f32 %v4375_v19, %v4373_v10 }
 0xb09   :  { %v4381_v14 = vadd.f32 %v4379_v7, %v4377_v20 }
 0xb0a   :  { %v4383_v53 = vpop.permute.xlu0 %4382  ;;  %v4387_v21 = vpop.permute.xlu1 %4386 }
 0xb0b   :  { %v4385_v60 = vadd.f32 %v4383_v53, %v4381_v14 }
 0xb0d   :  { %v4389_v46 = vadd.f32 %v4387_v21, %v4385_v60 }
 0xb0e   :  { %v4391_v61 = vpop.permute.xlu0 %4390 }
 0xb0f   :  { %v4393_v63 = vadd.f32 %v4391_v61, %v4389_v46 }
 0xb11   :  { %v4394_v8 = vmul.f32 0.001953125, %v4393_v63  ;;  %v4273_v54 = vpop.permute.xlu1 %4272 }
 0xb12   :  { %v4275_v12 = vadd.f32 %v4273_v54, %v6676_v45  ;;  %v4277_v62 = vpop.permute.xlu0 %4276 }
 0xb13   :  { %v4398_v25 = vadd.f32 1e-05, %v4394_v8 }
 0xb14   :  { %v4279_v13 = vadd.f32 %v4277_v62, %v4275_v12 }
 0xb15   :  { %5405 = vrsqrt.f32 %v4398_v25  ;;  %v4281_v23 = vpop.permute.xlu1 %4280 }
 0xb16   :  { %v4283_v55 = vadd.f32 %v4281_v23, %v4279_v13  ;;  %v4285_v41 = vpop.permute.xlu0 %4284 }
 0xb18   :  { %v4287_v34 = vadd.f32 %v4285_v41, %v4283_v55 }
 0xb19   :  { %v4289_v31 = vpop.permute.xlu1 %4288 }
 0xb1a   :  { %v4291_v37 = vadd.f32 %v4289_v31, %v4287_v34  ;;  %v4293_v1 = vpop.permute.xlu0 %4292 }
 0xb1c   :  { %v4295_v35 = vadd.f32 %v4293_v1, %v4291_v37 }
 0xb1d   :  { %v4297_v6 = vpop.permute.xlu1 %4296 }
 0xb1e   :  { %v4299_v58 = vadd.f32 %v4297_v6, %v4295_v35  ;;  %v4301_v50 = vpop.permute.xlu0 %4300 }
 0xb1f   :  { %v5406_v28 = vpop.eup %5405 }
 0xb20   :  { %4401 = vrot.lane.b32.xlu0 %v5406_v28, %s5518_s27  ;;  %v4303_v0 = vadd.f32 %v4301_v50, %v4299_v58 }
 0xb21   :  { %v4305_v57 = vpop.permute.xlu1 %4304 }
 0xb22   :  { %v4307_v40 = vadd.f32 %v4305_v57, %v4303_v0  ;;  %v4309_v42 = vpop.permute.xlu0 %4308 }
 0xb24   :  { %4586 = vrot.lane.b32.xlu0 %v6711_v15, %s5529_s4  ;;  %v4311_v45 = vadd.f32 %v4309_v42, %v4307_v40 }
 0xb25   :  { %v4313_v3 = vpop.permute.xlu1 %4312 }
 0xb26   :  { %v4315_v9 = vadd.f32 %v4313_v3, %v4311_v45  ;;  %v4317_v17 = vpop.permute.xlu0 %4316 }
 0xb28   :  { %4544 = vrot.lane.b32.xlu0 %v6711_v15, %s5518_s27  ;;  %v4319_v49 = vadd.f32 %v4317_v17, %v4315_v9 }
 0xb29   :  { %v4321_v29 = vpop.permute.xlu1 %4320 }
 0xb2a   :  { %v4323_v26 = vadd.f32 %v4321_v29, %v4319_v49  ;;  %v4325_v51 = vpop.permute.xlu0 %4324 }
 0xb2c   :  { %4547 = vrot.lane.b32.xlu0 %v6711_v15, %s5528_s10  ;;  %v4327_v32 = vadd.f32 %v4325_v51, %v4323_v26 }
 0xb2d   :  { %v4329_v47 = vpop.permute.xlu1 %4328 }
 0xb2e   :  { %v4331_v44 = vadd.f32 %v4329_v47, %v4327_v32 }
 0xb30   :  { %4550 = vrot.lane.b32.xlu0 %v6711_v15, %s5535_s17  ;;  %v4332_v4 = vmul.f32 0.001953125, %v4331_v44 }
 0xb31   :  { %v6804_v41 = vpop.permute.xlu1 %4580 }
 0xb32   :  { %v4395_v27 = vadd.f32 1e-05, %v4332_v4 }
 0xb34   :  { %4553 = vrot.lane.b32.xlu0 %v6711_v15, %s5515_s23  ;;  %5407 = vrsqrt.f32 %v4395_v27 }
 0xb38   :  { %4556 = vrot.lane.b32.xlu0 %v6711_v15, %s5534_s16 }
 0xb3c   :  { %4559 = vrot.lane.b32.xlu0 %v6711_v15, %s5527_s9 }
 0xb3e   :  { %v5408_v38 = vpop.eup %5407 }
 0xb3f   :  { %v4397_v16 = vmul.f32 %v5408_v38, %v6711_v15 }
 0xb40   :  { %4562 = vrot.lane.b32.xlu0 %v6711_v15, %s5533_s15 }
 0xb44   :  { %4565 = vrot.lane.b32.xlu0 %v6711_v15, %s5524_s29 }
 0xb48   :  { %4568 = vrot.lane.b32.xlu0 %v6711_v15, %s5532_s14 }
 0xb4c   :  { %4571 = vrot.lane.b32.xlu0 %v6711_v15, %s5526_s8 }
 0xb50   :  { %4574 = vrot.lane.b32.xlu0 %v6711_v15, %s5531_s1 }
 0xb54   :  { %4577 = vrot.lane.b32.xlu0 %v6711_v15, %s5523_s0 }
 0xb92   :  { %v4402_v52 = vpop.permute.xlu0 %4401 }
 0xb93   :  { %v6744_v39 = vmul.f32 %v4402_v52, %v6711_v15 }
 0xb95   :  { %4470 = vrot.lane.b32.xlu0 %v6744_v39, %s5518_s27  ;;  %4467 = vrot.lane.b32.xlu1 %v6744_v39, %s5529_s4 }
 0xb96   :  { %v6750_v56 = vpop.permute.xlu0 %4586 }
 0xb97   :  { %v4604_v17 = vsel %vm4145_vm7, %v6750_v56, %v6711_v15 }
 0xb99   :  { %4583 = vrot.lane.b32.xlu0 %v6711_v15, %s5525_s30  ;;  %4406 = vrot.lane.b32.xlu1 %v4397_v16, %s5518_s27 }
 0xb9a   :  { %v6756_v2 = vpop.permute.xlu0 %4544 }
 0xb9b   :  { %v4589_v24 = vsel %vm4145_vm7, %v6711_v15, %v6756_v2  ;;  %v4605_v29 = vsel %vm2173_vm12, %v4604_v17, %v6756_v2 }
 0xb9d   :  { %4409 = vrot.lane.b32.xlu0 %v4397_v16, %s5528_s10  ;;  %4412 = vrot.lane.b32.xlu1 %v4397_v16, %s5535_s17 }
 0xb9e   :  { %v6763_v10 = vpop.permute.xlu0 %4547 }
 0xb9f   :  { %v4590_v7 = vsel %vm2173_vm12, %v4589_v24, %v6763_v10  ;;  %v4606_v51 = vsel %vm4148_vm8, %v4605_v29, %v6763_v10 }
 0xba1   :  { %4415 = vrot.lane.b32.xlu0 %v4397_v16, %s5515_s23  ;;  %4418 = vrot.lane.b32.xlu1 %v4397_v16, %s5534_s16 }
 0xba2   :  { %v6769_v19 = vpop.permute.xlu0 %4550 }
 0xba3   :  { %v4591_v53 = vsel %vm4148_vm8, %v4590_v7, %v6769_v19  ;;  %v4607_v47 = vsel %vm905_vm3, %v4606_v51, %v6769_v19 }
 0xba5   :  { %4421 = vrot.lane.b32.xlu0 %v4397_v16, %s5527_s9  ;;  %4473 = vrot.lane.b32.xlu1 %v6744_v39, %s5528_s10 }
 0xba6   :  { %v4554_v20 = vpop.permute.xlu0 %4553 }
 0xba7   :  { %v4592_v21 = vsel %vm905_vm3, %v4591_v53, %v4554_v20  ;;  %v4608_v44 = vsel %vm4151_vm10, %v4607_v47, %v4554_v20 }
 0xba9   :  { %4427 = vrot.lane.b32.xlu0 %v4397_v16, %s5524_s29  ;;  %4476 = vrot.lane.b32.xlu1 %v6744_v39, %s5535_s17 }
 0xbaa   :  { %v4557_v14 = vpop.permute.xlu0 %4556 }
 0xbab   :  { %v4593_v46 = vsel %vm4151_vm10, %v4592_v21, %v4557_v14  ;;  %v4609_v27 = vsel %vm2176_vm13, %v4608_v44, %v4557_v14 }
 0xbad   :  { %4433 = vrot.lane.b32.xlu0 %v4397_v16, %s5526_s8  ;;  %4479 = vrot.lane.b32.xlu1 %v6744_v39, %s5515_s23 }
 0xbae   :  { %v4560_v60 = vpop.permute.xlu0 %4559 }
 0xbaf   :  { %v4594_v63 = vsel %vm2176_vm13, %v4593_v46, %v4560_v60  ;;  %v4610_v15 = vsel %vm4154_vm11, %v4609_v27, %v4560_v60 }
 0xbb1   :  { %4439 = vrot.lane.b32.xlu0 %v4397_v16, %s5523_s0  ;;  %4482 = vrot.lane.b32.xlu1 %v6744_v39, %s5534_s16 }
 0xbb2   :  { %v4563_v61 = vpop.permute.xlu0 %4562 }
 0xbb3   :  { %v4595_v25 = vsel %vm4154_vm11, %v4594_v63, %v4563_v61 }
 0xbb5   :  { %4445 = vrot.lane.b32.xlu0 %v4397_v16, %s5525_s30  ;;  %4485 = vrot.lane.b32.xlu1 %v6744_v39, %s5527_s9 }
 0xbb6   :  { %v4566_v8 = vpop.permute.xlu0 %4565 }
 0xbb7   :  { %v4596_v54 = vsel %vm886_vm2, %v4595_v25, %v4566_v8 }
 0xbb9   :  { %4488 = vrot.lane.b32.xlu1 %v6744_v39, %s5533_s15 }
 0xbba   :  { %v4569_v28 = vpop.permute.xlu0 %4568 }
 0xbbb   :  { %v4597_v12 = vsel %vm4157_vm15, %v4596_v54, %v4569_v28 }
 0xbbd   :  { %4491 = vrot.lane.b32.xlu1 %v6744_v39, %s5524_s29 }
 0xbbe   :  { %v4572_v62 = vpop.permute.xlu0 %4571 }
 0xbbf   :  { %v4598_v13 = vsel %vm322_vm0, %v4597_v12, %v4572_v62 }
 0xbc1   :  { %4494 = vrot.lane.b32.xlu1 %v6744_v39, %s5532_s14 }
 0xbc2   :  { %v4575_v23 = vpop.permute.xlu0 %4574 }
 0xbc3   :  { %v4599_v55 = vsel %vm4160_vm1, %v4598_v13, %v4575_v23 }
 0xbc5   :  { %4497 = vrot.lane.b32.xlu1 %v6744_v39, %s5526_s8 }
 0xbc6   :  { %v4578_v34 = vpop.permute.xlu0 %4577 }
 0xbc7   :  { %v4600_v31 = vsel %vm908_vm9, %v4599_v55, %v4578_v34 }
 0xbc8   :  { %v6809_v37 = vsel %vm4163_vm4, %v4600_v31, %v6804_v41 }
 0xbc9   :  { %4500 = vrot.lane.b32.xlu1 %v6744_v39, %s5531_s1 }
 0xbcd   :  { %4503 = vrot.lane.b32.xlu1 %v6744_v39, %s5523_s0 }
 0xbd1   :  { %4506 = vrot.lane.b32.xlu1 %v6744_v39, %s5530_s13 }
 0xbd5   :  { %4509 = vrot.lane.b32.xlu1 %v6744_v39, %s5525_s30 }
 0xbd9   :  { %4424 = vrot.lane.b32.xlu1 %v4397_v16, %s5533_s15 }
 0xbdd   :  { %4430 = vrot.lane.b32.xlu1 %v4397_v16, %s5532_s14 }
 0xbe1   :  { %4436 = vrot.lane.b32.xlu1 %v4397_v16, %s5531_s1 }
 0xbe5   :  { %4442 = vrot.lane.b32.xlu1 %v4397_v16, %s5530_s13 }
 0xbe9   :  { %4448 = vrot.lane.b32.xlu1 %v4397_v16, %s5529_s4 }
 0xc07   :  { %v4468_v1 = vpop.permute.xlu1 %4467  ;;  %v4471_v35 = vpop.permute.xlu0 %4470 }
 0xc08   :  { %v4512_v10 = vsel %vm4145_vm7, %v4468_v1, %v6744_v39 }
 0xc09   :  { %v4513_v19 = vsel %vm2173_vm12, %v4512_v10, %v4471_v35 }
 0xc0b   :  { %v4407_v6 = vpop.permute.xlu1 %4406  ;;  %v6824_v58 = vpop.permute.xlu0 %4583 }
 0xc0c   :  { %v4451_v50 = vsel %vm4145_vm7, %v4397_v16, %v4407_v6  ;;  %v4611_v16 = vsel %vm886_vm2, %v4610_v15, %v4563_v61 }
 0xc0d   :  { %v4612_v2 = vsel %vm4157_vm15, %v4611_v16, %v4566_v8 }
 0xc0e   :  { %v4613_v7 = vsel %vm322_vm0, %v4612_v2, %v4569_v28 }
 0xc0f   :  { %v4413_v0 = vpop.permute.xlu1 %4412  ;;  %v4410_v57 = vpop.permute.xlu0 %4409  ;;  %v4614_v21 = vsel %vm4160_vm1, %v4613_v7, %v4572_v62 }
 0xc10   :  { %v4452_v40 = vsel %vm2173_vm12, %v4451_v50, %v4410_v57  ;;  %v4615_v8 = vsel %vm908_vm9, %v4614_v21, %v4575_v23 }
 0xc11   :  { %v4453_v42 = vsel %vm4148_vm8, %v4452_v40, %v4413_v0  ;;  %v4616_v12 = vsel %vm4163_vm4, %v4615_v8, %v4578_v34 }
 0xc12   :  { %v4617_v1 = vsel %vm2181_vm14, %v4616_v12, %v6804_v41 }
 0xc13   :  { %v4419_v45 = vpop.permute.xlu1 %4418  ;;  %v4416_v53 = vpop.permute.xlu0 %4415  ;;  %v4618_v6 = vsel %vm4166_vm5, %v4617_v1, %v6824_v58 }
 0xc14   :  { %v4454_v23 = vsel %vm905_vm3, %v4453_v42, %v4416_v53 }
 0xc15   :  { %v4455_v40 = vsel %vm4151_vm10, %v4454_v23, %v4419_v45 }
 0xc17   :  { %v4474_v3 = vpop.permute.xlu1 %4473  ;;  %v4422_v28 = vpop.permute.xlu0 %4421 }
 0xc18   :  { %v4514_v14 = vsel %vm4148_vm8, %v4513_v19, %v4474_v3  ;;  %v4456_v41 = vsel %vm2176_vm13, %v4455_v40, %v4422_v28  ;;  %v4602_v19 = vsel %vm2181_vm14, %v6809_v37, %v6824_v58 }
 0xc19   :  { %v4603_v21 = vsel %vm4166_vm5, %v4602_v19, %v6750_v56 }
 0xc1a   :  { %v4622_v37 = vrot.slane %v4603_v21, %v5783_v11 }
 0xc1b   :  { %v4477_v9 = vpop.permute.xlu1 %4476  ;;  %v4428_v0 = vpop.permute.xlu0 %4427 }
 0xc1c   :  { %v4515_v60 = vsel %vm905_vm3, %v4514_v14, %v4477_v9  ;;  %v4626_v9 = vrot.slane %v4618_v6, %v5783_v11 }
 0xc1f   :  { %v4480_v49 = vpop.permute.xlu1 %4479 }
 0xc20   :  { %v4516_v46 = vsel %vm4151_vm10, %v4515_v60, %v4480_v49 }
 0xc23   :  { %v4483_v26 = vpop.permute.xlu1 %4482 }
 0xc24   :  { %v4517_v61 = vsel %vm2176_vm13, %v4516_v46, %v4483_v26 }
 0xc27   :  { %v4486_v32 = vpop.permute.xlu1 %4485 }
 0xc28   :  { %v4518_v39 = vsel %vm4154_vm11, %v4517_v61, %v4486_v32 }
 0xc2b   :  { %v4489_v4 = vpop.permute.xlu1 %4488 }
 0xc2c   :  { %v4519_v25 = vsel %vm886_vm2, %v4518_v39, %v4489_v4  ;;  %v4434_v4 = vpop.permute.xlu0 %4433 }
 0xc2f   :  { %v4492_v52 = vpop.permute.xlu1 %4491 }
 0xc30   :  { %v4520_v54 = vsel %vm4157_vm15, %v4519_v25, %v4492_v52  ;;  %v4440_v2 = vpop.permute.xlu0 %4439 }
 0xc33   :  { %v4495_v38 = vpop.permute.xlu1 %4494 }
 0xc34   :  { %v4521_v62 = vsel %vm322_vm0, %v4520_v54, %v4495_v38  ;;  %v4446_v53 = vpop.permute.xlu0 %4445 }
 0xc37   :  { %v4498_v24 = vpop.permute.xlu1 %4497 }
 0xc38   :  { %v4522_v55 = vsel %vm4160_vm1, %v4521_v62, %v4498_v24 }
 0xc3b   :  { %v4501_v20 = vpop.permute.xlu1 %4500 }
 0xc3c   :  { %v4523_v31 = vsel %vm908_vm9, %v4522_v55, %v4501_v20 }
 0xc3f   :  { %v4504_v63 = vpop.permute.xlu1 %4503 }
 0xc40   :  { %v4524_v35 = vsel %vm4163_vm4, %v4523_v31, %v4504_v63 }
 0xc43   :  { %v4507_v13 = vpop.permute.xlu1 %4506 }
 0xc44   :  { %v4525_v50 = vsel %vm2181_vm14, %v4524_v35, %v4507_v13 }
 0xc47   :  { %v4510_v34 = vpop.permute.xlu1 %4509 }
 0xc48   :  { %v4526_v57 = vsel %vm4166_vm5, %v4525_v50, %v4510_v34 }
 0xc49   :  { %v4534_v3 = vrot.slane %v4526_v57, %v5759_v33 }
 0xc4b   :  { %v4536_v42 = vmul.f32 %v4534_v3, %v6606_v43  ;;  %v4538_v17 = vmul.f32 %v4534_v3, %v6609_v30  ;;  %v4540_v49 = vmul.f32 %v4534_v3, %v6612_v36  ;;  %v4542_v29 = vmul.f32 %v4534_v3, %v6616_v48  ;;  %v4425_v26 = vpop.permute.xlu1 %4424 }
 0xc4c   :  { %v4457_v51 = vsel %vm4154_vm11, %v4456_v41, %v4425_v26 }
 0xc4d   :  { %v4628_v32 = vadd.f32 %v4626_v9, %v4536_v42  ;;  %v4630_v47 = vadd.f32 %v4626_v9, %v4538_v17  ;;  %v4632_v45 = vadd.f32 %v4626_v9, %v4540_v49  ;;  %v4634_v44 = vadd.f32 %v4626_v9, %v4542_v29 }
 0xc4e   :  { %v4458_v43 = vsel %vm886_vm2, %v4457_v51, %v4428_v0 }
 0xc4f   :  { %v4635_v27 = vmul.f32 0.5, %v4628_v32  ;;  %v4636_v52 = vmul.f32 0.5, %v4630_v47  ;;  %v4637_v15 = vmul.f32 0.5, %v4632_v45  ;;  %v4431_v38 = vpop.permute.xlu1 %4430  ;;  %v4638_v16 = vmul.f32 0.5, %v4634_v44 }
 0xc50   :  { %v4459_v30 = vsel %vm4157_vm15, %v4458_v43, %v4431_v38 }
 0xc51   :  { %5409 = vtanh.f32 %v4635_v27  ;;  %v4460_v48 = vsel %vm322_vm0, %v4459_v30, %v4434_v4 }
 0xc52   :  { %5411 = vtanh.f32 %v4636_v52 }
 0xc53   :  { %5413 = vtanh.f32 %v4637_v15  ;;  %v4437_v36 = vpop.permute.xlu1 %4436 }
 0xc54   :  { %5415 = vtanh.f32 %v4638_v16  ;;  %v4461_v24 = vsel %vm4160_vm1, %v4460_v48, %v4437_v36 }
 0xc55   :  { %v4462_v7 = vsel %vm908_vm9, %v4461_v24, %v4440_v2 }
 0xc57   :  { %v4443_v10 = vpop.permute.xlu1 %4442 }
 0xc58   :  { %v4463_v20 = vsel %vm4163_vm4, %v4462_v7, %v4443_v10 }
 0xc59   :  { %v4464_v46 = vsel %vm2181_vm14, %v4463_v20, %v4446_v53 }
 0xc5b   :  { %v5410_v14 = vpop.eup %5409  ;;  %v4449_v60 = vpop.permute.xlu1 %4448 }
 0xc5c   :  { %v5412_v61 = vpop.eup %5411  ;;  %v4643_v63 = vadd.f32 1.0, %v5410_v14  ;;  %v4465_v8 = vsel %vm4166_vm5, %v4464_v46, %v4449_v60 }
 0xc5d   :  { %v5414_v39 = vpop.eup %5413  ;;  %v4644_v25 = vadd.f32 1.0, %v5412_v61  ;;  %v4530_v28 = vrot.slane %v4465_v8, %v5759_v33 }
 0xc5e   :  { %v5416_v54 = vpop.eup %5415  ;;  %v4645_v58 = vadd.f32 1.0, %v5414_v39  ;;  %v4647_v31 = vmul.f32 0.5, %v4643_v63 }
 0xc5f   :  { %v4646_v12 = vadd.f32 1.0, %v5416_v54  ;;  %v4535_v62 = vmul.f32 %v4530_v28, %v6648_v5  ;;  %v4537_v56 = vmul.f32 %v4530_v28, %v6651_v22  ;;  %v4539_v13 = vmul.f32 %v4530_v28, %v6654_v18 }
 0xc60   :  { %v4541_v55 = vmul.f32 %v4530_v28, %v6657_v59  ;;  %v4648_v1 = vmul.f32 0.5, %v4644_v25  ;;  %v4649_v50 = vmul.f32 0.5, %v4645_v58 }
 0xc61   :  { %v4627_v23 = vadd.f32 %v4622_v37, %v4535_v62  ;;  %v4629_v35 = vadd.f32 %v4622_v37, %v4537_v56  ;;  %v4631_v6 = vadd.f32 %v4622_v37, %v4539_v13  ;;  %v4650_v34 = vmul.f32 0.5, %v4646_v12 }
 0xc62   :  { %v4633_v33 = vadd.f32 %v4622_v37, %v4541_v55 }
 0xc63   :  { %v4651_v0 = vmul.f32 %v4647_v31, %v4627_v23  ;;  %v4652_v11 = vmul.f32 %v4648_v1, %v4629_v35  ;;  %v4653_v57 = vmul.f32 %v4649_v50, %v4631_v6 }
 0xc64   :  { %v4654_v40 = vmul.f32 %v4650_v34, %v4633_v33 }
 0xc65   :  { %4655 = vst [vmem:[%s6915_s7] sm:$0xff] %v4651_v0  ;;  %4656 = vst [vmem:[%s6915_s7 + $0x8] sm:$0xff] %v4652_v11 }
 0xc66   :  { %4657 = vst [vmem:[%s6915_s7 + $0x10] sm:$0xff] %v4653_v57  ;;  %4658 = vst [vmem:[%s6915_s7 + $0x18] sm:$0xff] %v4654_v40 }
 0xc67   :  { %4663 = vsyncpa [#allocation5], 1 }
 0xc68   :  { %4664 = vsyncpa [#allocation7], 1 }
 0xc69   :  { %4665 = vsyncpa [#allocation10], 1 }

</bundles_post_ra>
